<compile_context>
chip_gen: v7x
topology: tpu7x:2x2x1
jax: 0.10.0
libtpu: 0.0.40
codegen_flags: <defaults>
</compile_context>

<pallas_src>
import jax
import jax.numpy as jnp
from jax.experimental import pallas as pl
from jax.experimental.pallas import tpu as pltpu


_LANE = 128     # lane width: S tiles / padding are multiples of this
_TB_MAX = 128   # max batch rows per grid step (fills the MXU M dimension)
_TS_MAX = 512   # max sequence columns per grid step


def _round_up(x, m):
    return pl.cdiv(x, m) * m


def _choose_tiles(B, S, E2, D):
    """Pick (TB, TS) so the per-step working set stays within a conservative
    VMEM budget (v7x has only 64 MiB physical)."""
    TB = min(_TB_MAX, _round_up(max(B, 1), 16))
    TS = min(_TS_MAX, _round_up(S, _LANE))

    def est(tb, ts):
        s_pad = _round_up(S, ts)
        enc = 2 * tb * ts * E2 * 2          # double-buffered bf16 encoder tile
        outb = 2 * tb * s_pad * 4           # resident f32 score / softmax block
        interm = 2 * tb * ts * D * 4        # e_proj + energy f32 intermediates
        fixed = (D * D + E2 * D) * 2 + tb * D * 8 + 2 * D * 4
        return enc + outb + interm + fixed

    budget = 24 * 1024 * 1024
    while est(TB, TS) > budget and TS > _LANE:
        TS -= _LANE
    while est(TB, TS) > budget and TB > 16:
        TB //= 2

    S_pad = _round_up(S, TS)
    B_pad = _round_up(B, TB)
    return TB, TS, B_pad, S_pad, est(TB, TS)


def _attn_kernel(hidden_ref, enc_ref, lens_ref, w_h_ref, w_e_ref, bias_ref,
                 v_ref, out_ref, hb_ref):
    """Grid (batch_tile, seq_tile): project one encoder S-chunk, tanh,
    v-reduce into the resident score row; masked softmax on the last chunk."""
    s_idx = pl.program_id(1)
    tb, ts, e2 = enc_ref.shape
    d = w_h_ref.shape[1]
    s_pad = out_ref.shape[1]

    # --- hidden projection (+ bias folded in), once per batch tile ----------
    @pl.when(s_idx == 0)
    def _():
        h_proj = jnp.dot(hidden_ref[...], w_h_ref[...],
                         preferred_element_type=jnp.float32)          # (TB, D)
        hb_ref[...] = h_proj + bias_ref[...]                          # bias folded here

    # --- encoder projection for this S chunk (MXU: bf16 operands, f32 acc) --
    e_proj = jnp.dot(enc_ref[...].reshape(tb * ts, e2), w_e_ref[...],
                     preferred_element_type=jnp.float32)
    e_proj = e_proj.reshape(tb, ts, d)

    # f32 tanh (EUP) keeps v5e correct; use bf16 here on v6e/v7x if EUP-bound.
    energy = jnp.tanh(e_proj + hb_ref[...][:, None, :])               # (TB, TS, D)
    chunk = jnp.sum(energy * v_ref[...][None, :, :], axis=-1)         # (TB, TS)

    col0 = pl.multiple_of(s_idx * ts, _LANE)
    out_ref[:, pl.ds(col0, ts)] = chunk       # resident accumulator (lane-aligned)

    # --- last S chunk: masked softmax over the full resident score row ------
    @pl.when(s_idx == pl.num_programs(1) - 1)
    def _():
        scores = out_ref[...]                                         # (TB, S_pad)
        col_id = jax.lax.broadcasted_iota(jnp.int32, (tb, s_pad), 1)
        mask = col_id < lens_ref[...]          # (TB,1) lens block -> one compare
        masked = jnp.where(mask, scores, jnp.float32(-1e30))
        m = jnp.max(masked, axis=-1, keepdims=True)
        p = jnp.exp(masked - m)
        denom = jnp.sum(p, axis=-1, keepdims=True)
        out_ref[...] = p * pl.reciprocal(denom, approx=True)


def prepare_attention_params(params):
    """One-time weight prep (hoisted out of the decode loop)."""
    d = params["v"].shape[0]
    w = jnp.asarray(params["attn_w"])            # (D, D + 2*ENC) torch Linear weight
    return {
        "w_h": jnp.asarray(w[:, :d].T, jnp.bfloat16),    # (D, D)
        "w_e": jnp.asarray(w[:, d:].T, jnp.bfloat16),    # (2*ENC, D)
        "b": jnp.asarray(params["attn_b"], jnp.float32).reshape(1, d),
        "v": jnp.asarray(params["v"], jnp.float32).reshape(1, d),
    }


def prepare_encoder(encoder_output, src_seq_lens, decoder_dim):
    """One-time per source sequence (constant across decode steps): choose
    tiles, pad + cast the encoder to bf16, pad/reshape the lengths."""
    B, S, E2 = encoder_output.shape
    TB, TS, B_pad, S_pad, est = _choose_tiles(B, S, E2, decoder_dim)
    enc_p = jnp.pad(encoder_output,
                    ((0, B_pad - B), (0, S_pad - S), (0, 0))).astype(jnp.bfloat16)
    lens_p = jnp.pad(src_seq_lens.astype(jnp.int32),
                     (0, B_pad - B)).reshape(B_pad, 1)
    vmem_limit = int(min(64 << 20, max(32 << 20, est + (8 << 20))))
    return {"enc": enc_p, "lens": lens_p, "B": B, "S": S, "E2": E2,
            "TB": TB, "TS": TS, "B_pad": B_pad, "S_pad": S_pad,
            "vmem_limit": vmem_limit}


def seq2seq_attention(hidden_states, enc_prep, prepared):
    """hidden_states: tuple of (1, B, *) arrays whose last dims sum to D.
    Returns (B, 1, S) softmaxed attention, matching the PyTorch forward."""
    hidden = jnp.concatenate(hidden_states, axis=2)[0]                 # (B, D)
    D = prepared["w_h"].shape[0]
    B, S, E2 = enc_prep["B"], enc_prep["S"], enc_prep["E2"]
    TB, TS = enc_prep["TB"], enc_prep["TS"]
    B_pad, S_pad = enc_prep["B_pad"], enc_prep["S_pad"]

    hid_p = jnp.pad(hidden, ((0, B_pad - B), (0, 0))).astype(jnp.bfloat16)

    grid_spec = pltpu.PrefetchScalarGridSpec(
        num_scalar_prefetch=0,
        grid=(B_pad // TB, S_pad // TS),
        in_specs=[
            pl.BlockSpec((TB, D), lambda b, s: (b, 0)),              # hidden
            pl.BlockSpec((TB, TS, E2), lambda b, s: (b, s, 0)),      # encoder chunk
            pl.BlockSpec((TB, 1), lambda b, s: (b, 0)),              # lens block
            pl.BlockSpec((D, D), lambda b, s: (0, 0)),               # W_h (resident)
            pl.BlockSpec((E2, D), lambda b, s: (0, 0)),              # W_e (resident)
            pl.BlockSpec((1, D), lambda b, s: (0, 0)),               # bias
            pl.BlockSpec((1, D), lambda b, s: (0, 0)),               # v row
        ],
        out_specs=pl.BlockSpec((TB, S_pad), lambda b, s: (b, 0)),    # resident over s
        scratch_shapes=[pltpu.VMEM((TB, D), jnp.float32)],           # hidden+bias cache
    )

    out = pl.pallas_call(
        _attn_kernel,
        out_shape=jax.ShapeDtypeStruct((B_pad, S_pad), jnp.float32),
        grid_spec=grid_spec,
        compiler_params=pltpu.CompilerParams(
            dimension_semantics=("parallel", "arbitrary"),   # batch across TCs, S inner
            vmem_limit_bytes=enc_prep["vmem_limit"]),
    )(hid_p, enc_prep["enc"], enc_prep["lens"], prepared["w_h"],
      prepared["w_e"], prepared["b"], prepared["v"])

    return out[:B, :S][:, None, :]                                    # (B, 1, S)


def _reference(hidden_states, encoder_output, src_seq_lens, params):
    hidden = jnp.concatenate(hidden_states, axis=2)[0]                # (B, D)
    B, S, _ = encoder_output.shape
    h_rep = jnp.broadcast_to(hidden[:, None, :], (B, S, hidden.shape[-1]))
    cat = jnp.concatenate([h_rep, encoder_output], axis=2)
    energy = jnp.tanh(cat @ params["attn_w"].T + params["attn_b"])
    score = jnp.einsum("bsd,d->bs", energy, params["v"])
    idx = jnp.arange(S)[None, :]
    mask = idx < src_seq_lens[:, None]
    masked = jnp.where(mask, score, -jnp.inf)
    return jax.nn.softmax(masked, axis=1)[:, None, :]


if __name__ == "__main__":
    B, S = 2, 8
    ENC, DEC = 32, 32

    key = jax.random.PRNGKey(0)
    k = jax.random.split(key, 6)

    # deterministic parameter init (shapes from the module's __init__)
    params = {
        "attn_w": 0.1 * jax.random.normal(k[0], (DEC, 2 * ENC + DEC), jnp.float32),
        "attn_b": 0.1 * jax.random.normal(k[1], (DEC,), jnp.float32),
        "v": jax.random.normal(k[2], (DEC,), jnp.float32) / (DEC ** 0.5),
    }

    # hidden_states is a tuple (forward does torch.cat(hidden_states, 2))
    h_fwd = jax.random.normal(k[3], (1, B, DEC // 2), jnp.float32)
    h_bwd = jax.random.normal(k[4], (1, B, DEC // 2), jnp.float32)
    hidden_states = (h_fwd, h_bwd)

    encoder_output = jax.random.normal(k[5], (B, S, 2 * ENC), jnp.float32)
    src_seq_lens = jnp.array([5, 8], dtype=jnp.int32)

    prepared = prepare_attention_params(params)              # hoisted weight prep
    enc_prep = prepare_encoder(encoder_output, src_seq_lens, DEC)  # hoisted per sequence

    out = seq2seq_attention(hidden_states, enc_prep, prepared)
    out = jax.block_until_ready(out)

    ref = _reference(hidden_states, encoder_output, src_seq_lens, params)
    assert out.shape == (B, 1, S)
    assert jnp.allclose(out, ref, atol=2e-2, rtol=2e-2), \
        float(jnp.max(jnp.abs(out - ref)))
    # rows sum to 1 (approx-reciprocal softmax -> loose tolerance)
    assert jnp.allclose(jnp.sum(out, axis=-1), 1.0, atol=1e-2)
    # masked positions (idx >= len) must get zero probability
    assert float(jnp.max(out[0, 0, 5:])) < 1e-6

    print("KERNEL_OK")
</pallas_src>

<mosaic_0001>
module attributes {stable_mosaic.version = 11 : i64} {
  func.func @_attn_kernel(%arg0: i32, %arg1: i32, %arg2: memref<16x32xbf16, #tpu.memory_space<vmem>>, %arg3: memref<16x128x64xbf16, #tpu.memory_space<vmem>>, %arg4: memref<16x1xi32, #tpu.memory_space<vmem>>, %arg5: memref<32x32xbf16, #tpu.memory_space<vmem>>, %arg6: memref<64x32xbf16, #tpu.memory_space<vmem>>, %arg7: memref<1x32xf32, #tpu.memory_space<vmem>>, %arg8: memref<1x32xf32, #tpu.memory_space<vmem>>, %arg9: memref<16x128xf32, #tpu.memory_space<vmem>>, %arg10: memref<16x32xf32, #tpu.memory_space<vmem>>) attributes {dimension_semantics = [#tpu.dimension_semantics<parallel>, #tpu.dimension_semantics<arbitrary>], iteration_bounds = array<i64: 1, 1>, scalar_prefetch = 0 : i64, scratch_operands = 1 : i64, tpu.core_type = #tpu.core_type<tc>, window_params = [{transform_indices = @transform_0, window_bounds = array<i64: 16, 32>}, {transform_indices = @transform_1, window_bounds = array<i64: 16, 128, 64>}, {transform_indices = @transform_2, window_bounds = array<i64: 16, 1>}, {pipeline_mode = #tpu.pipeline_mode<synchronous>, transform_indices = @transform_3, window_bounds = array<i64: 32, 32>}, {pipeline_mode = #tpu.pipeline_mode<synchronous>, transform_indices = @transform_4, window_bounds = array<i64: 64, 32>}, {pipeline_mode = #tpu.pipeline_mode<synchronous>, transform_indices = @transform_5, window_bounds = array<i64: 1, 32>}, {pipeline_mode = #tpu.pipeline_mode<synchronous>, transform_indices = @transform_6, window_bounds = array<i64: 1, 32>}, {transform_indices = @transform_7, window_bounds = array<i64: 16, 128>}]} {
    %c0_i32 = arith.constant 0 : i32
    %0 = arith.cmpi eq, %arg1, %c0_i32 : i32
    %1 = arith.extui %0 : i1 to i32
    %c0_i32_0 = arith.constant 0 : i32
    %2 = arith.cmpi ne, %1, %c0_i32_0 : i32
    scf.if %2 {
      %c0_13 = arith.constant 0 : index
      %c0_14 = arith.constant 0 : index
      %25 = vector.load %arg2[%c0_13, %c0_14] : memref<16x32xbf16, #tpu.memory_space<vmem>>, vector<16x32xbf16>
      %c0_15 = arith.constant 0 : index
      %c0_16 = arith.constant 0 : index
      %26 = vector.load %arg5[%c0_15, %c0_16] : memref<32x32xbf16, #tpu.memory_space<vmem>>, vector<32x32xbf16>
      %cst_17 = arith.constant dense<0.000000e+00> : vector<16x32xf32>
      %27 = tpu.matmul %25, %26, %cst_17 {dimension_numbers = #tpu.dot_dimension_numbers<[1], [0], [0], [1], [0, 0, 1, 1], [], []>} : vector<16x32xbf16>, vector<32x32xbf16>, vector<16x32xf32> -> vector<16x32xf32>
      %c0_18 = arith.constant 0 : index
      %c0_19 = arith.constant 0 : index
      %28 = vector.load %arg7[%c0_18, %c0_19] : memref<1x32xf32, #tpu.memory_space<vmem>>, vector<1x32xf32>
      %29 = vector.broadcast %28 : vector<1x32xf32> to vector<16x32xf32>
      %30 = arith.addf %27, %29 : vector<16x32xf32>
      %c0_20 = arith.constant 0 : index
      %c0_21 = arith.constant 0 : index
      %31 = vector.load %arg10[%c0_20, %c0_21] : memref<16x32xf32, #tpu.memory_space<vmem>>, vector<16x32xf32>
      tpu.vector_store %arg10[%c0_20, %c0_21], %30 {strides = array<i32>} : memref<16x32xf32, #tpu.memory_space<vmem>>, vector<16x32xf32>,
    } else {
    }
    %c0 = arith.constant 0 : index
    %c0_1 = arith.constant 0 : index
    %c0_2 = arith.constant 0 : index
    %3 = vector.load %arg3[%c0, %c0_1, %c0_2] : memref<16x128x64xbf16, #tpu.memory_space<vmem>>, vector<16x128x64xbf16>
    %4 = vector.shape_cast %3 : vector<16x128x64xbf16> to vector<2048x64xbf16>
    %c0_3 = arith.constant 0 : index
    %c0_4 = arith.constant 0 : index
    %5 = vector.load %arg6[%c0_3, %c0_4] : memref<64x32xbf16, #tpu.memory_space<vmem>>, vector<64x32xbf16>
    %cst = arith.constant dense<0.000000e+00> : vector<2048x32xf32>
    %6 = tpu.matmul %4, %5, %cst {dimension_numbers = #tpu.dot_dimension_numbers<[1], [0], [0], [1], [0, 0, 1, 1], [], []>} : vector<2048x64xbf16>, vector<64x32xbf16>, vector<2048x32xf32> -> vector<2048x32xf32>
    %7 = vector.shape_cast %6 : vector<2048x32xf32> to vector<16x128x32xf32>
    %c0_5 = arith.constant 0 : index
    %c0_6 = arith.constant 0 : index
    %8 = vector.load %arg10[%c0_5, %c0_6] : memref<16x32xf32, #tpu.memory_space<vmem>>, vector<16x32xf32>
    %9 = vector.shape_cast %8 : vector<16x32xf32> to vector<16x1x32xf32>
    %10 = vector.broadcast %9 : vector<16x1x32xf32> to vector<16x128x32xf32>
    %11 = arith.addf %7, %10 : vector<16x128x32xf32>
    %12 = math.tanh %11 : vector<16x128x32xf32>
    %c0_7 = arith.constant 0 : index
    %c0_8 = arith.constant 0 : index
    %13 = vector.load %arg8[%c0_7, %c0_8] : memref<1x32xf32, #tpu.memory_space<vmem>>, vector<1x32xf32>
    %14 = vector.shape_cast %13 : vector<1x32xf32> to vector<1x1x32xf32>
    %15 = vector.broadcast %14 : vector<1x1x32xf32> to vector<16x128x32xf32>
    %16 = arith.mulf %12, %15 : vector<16x128x32xf32>
    %cst_9 = arith.constant dense<0.000000e+00> : vector<16x128xf32>
    %17 = vector.multi_reduction <add>, %16, %cst_9 [2] : vector<16x128x32xf32> to vector<16x128xf32>
    %c128_i32 = arith.constant 128 : i32
    %18 = arith.muli %arg1, %c128_i32 : i32
    %19 = tpu.assume_multiple %18, 128 : i32
    %c0_10 = arith.constant 0 : index
    %20 = arith.index_cast %19 : i32 to index
    %21 = vector.load %arg9[%c0_10, %20] : memref<16x128xf32, #tpu.memory_space<vmem>>, vector<16x128xf32>
    tpu.vector_store %arg9[%c0_10, %20], %17 {strides = array<i32>} : memref<16x128xf32, #tpu.memory_space<vmem>>, vector<16x128xf32>,
    %c0_i32_11 = arith.constant 0 : i32
    %22 = arith.cmpi eq, %arg1, %c0_i32_11 : i32
    %23 = arith.extui %22 : i1 to i32
    %c0_i32_12 = arith.constant 0 : i32
    %24 = arith.cmpi ne, %23, %c0_i32_12 : i32
    scf.if %24 {
      %c0_13 = arith.constant 0 : index
      %c0_14 = arith.constant 0 : index
      %25 = vector.load %arg9[%c0_13, %c0_14] : memref<16x128xf32, #tpu.memory_space<vmem>>, vector<16x128xf32>
      %26 = tpu.iota {dimensions = array<i32: 1>} : vector<16x128xi32>
      %c0_15 = arith.constant 0 : index
      %c0_16 = arith.constant 0 : index
      %27 = vector.load %arg4[%c0_15, %c0_16] : memref<16x1xi32, #tpu.memory_space<vmem>>, vector<16x1xi32>
      %28 = vector.broadcast %27 : vector<16x1xi32> to vector<16x128xi32>
      %29 = arith.cmpi slt, %26, %28 : vector<16x128xi32>
      %cst_17 = arith.constant -1.000000e+30 : f32
      %30 = vector.broadcast %cst_17 : f32 to vector<16x128xf32>
      %31 = arith.select %29, %25, %30 : vector<16x128xi1>, vector<16x128xf32>
      %cst_18 = arith.constant dense<0xFF800000> : vector<16xf32>
      %32 = vector.multi_reduction <maximumf>, %31, %cst_18 [1] : vector<16x128xf32> to vector<16xf32>
      %33 = vector.shape_cast %32 : vector<16xf32> to vector<16x1xf32>
      %34 = vector.broadcast %33 : vector<16x1xf32> to vector<16x128xf32>
      %35 = arith.subf %31, %34 : vector<16x128xf32>
      %36 = math.exp %35 : vector<16x128xf32>
      %cst_19 = arith.constant dense<0.000000e+00> : vector<16xf32>
      %37 = vector.multi_reduction <add>, %36, %cst_19 [1] : vector<16x128xf32> to vector<16xf32>
      %38 = vector.shape_cast %37 : vector<16xf32> to vector<16x1xf32>
      %39 = tpu.reciprocal %38 {approx = true} : vector<16x1xf32> -> vector<16x1xf32>
      %40 = vector.broadcast %39 : vector<16x1xf32> to vector<16x128xf32>
      %41 = arith.mulf %36, %40 : vector<16x128xf32>
      %c0_20 = arith.constant 0 : index
      %c0_21 = arith.constant 0 : index
      %42 = vector.load %arg9[%c0_20, %c0_21] : memref<16x128xf32, #tpu.memory_space<vmem>>, vector<16x128xf32>
      tpu.vector_store %arg9[%c0_20, %c0_21], %41 {strides = array<i32>} : memref<16x128xf32, #tpu.memory_space<vmem>>, vector<16x128xf32>,
    } else {
    }
    return
  }
  func.func @transform_0(%arg0: i32, %arg1: i32) -> (i32, i32) {
    %c0_i32 = arith.constant 0 : i32
    %c0_i32_0 = arith.constant 0 : i32
    return %arg0, %c0_i32 : i32, i32
  }
  func.func @transform_1(%arg0: i32, %arg1: i32) -> (i32, i32, i32) {
    %c0_i32 = arith.constant 0 : i32
    %c0_i32_0 = arith.constant 0 : i32
    return %arg0, %arg1, %c0_i32 : i32, i32, i32
  }
  func.func @transform_2(%arg0: i32, %arg1: i32) -> (i32, i32) {
    %c0_i32 = arith.constant 0 : i32
    %c0_i32_0 = arith.constant 0 : i32
    return %arg0, %c0_i32 : i32, i32
  }
  func.func @transform_3(%arg0: i32, %arg1: i32) -> (i32, i32) {
    %c0_i32 = arith.constant 0 : i32
    %c0_i32_0 = arith.constant 0 : i32
    %c0_i32_1 = arith.constant 0 : i32
    return %c0_i32, %c0_i32_0 : i32, i32
  }
  func.func @transform_4(%arg0: i32, %arg1: i32) -> (i32, i32) {
    %c0_i32 = arith.constant 0 : i32
    %c0_i32_0 = arith.constant 0 : i32
    %c0_i32_1 = arith.constant 0 : i32
    return %c0_i32, %c0_i32_0 : i32, i32
  }
  func.func @transform_5(%arg0: i32, %arg1: i32) -> (i32, i32) {
    %c0_i32 = arith.constant 0 : i32
    %c0_i32_0 = arith.constant 0 : i32
    %c0_i32_1 = arith.constant 0 : i32
    return %c0_i32, %c0_i32_0 : i32, i32
  }
  func.func @transform_6(%arg0: i32, %arg1: i32) -> (i32, i32) {
    %c0_i32 = arith.constant 0 : i32
    %c0_i32_0 = arith.constant 0 : i32
    %c0_i32_1 = arith.constant 0 : i32
    return %c0_i32, %c0_i32_0 : i32, i32
  }
  func.func @transform_7(%arg0: i32, %arg1: i32) -> (i32, i32) {
    %c0_i32 = arith.constant 0 : i32
    %c0_i32_0 = arith.constant 0 : i32
    return %arg0, %c0_i32 : i32, i32
  }
}

</mosaic_0001>

<bundles_post_ra>
// kernel: tpu_custom_call.1
= control target key start
LH: loop header
LB: loop body
LE: loop exit
PB: predicated region body
PF: predicated region fallthrough
CT: control target
= control target key end

     0   :  { %v7215_v1 = vmov 0.0   ;;  %vm7216_vm0 = vmmov 0   ;;  %vm62_vm1 = vcmask 261120   ;;  %vm1037_vm2 = vcmask 523264   ;;  %s10250_s0 = inlined_call_operand.vmem [shape: bf16[16,32], index: 0, kind: input, shape index: {}]   ;;  %s10251_s1 = inlined_call_operand.vmem [shape: bf16[16,128,64], index: 1, kind: input, shape index: {}]   ;;  %s10252_s2 = inlined_call_operand.vmem [shape: s32[16,1], index: 2, kind: input, shape index: {}]   ;;  %s10253_s3 = inlined_call_operand.vmem [shape: bf16[32,32], index: 3, kind: input, shape index: {}]   ;;  %s10254_s4 = inlined_call_operand.vmem [shape: bf16[64,32], index: 4, kind: input, shape index: {}]   ;;  %s10255_s5 = inlined_call_operand.vmem [shape: f32[1,32], index: 5, kind: input, shape index: {}]   ;;  %s10256_s6 = inlined_call_operand.vmem [shape: f32[1,32], index: 6, kind: input, shape index: {}]   ;;  %s10257_s7 = inlined_call_operand.hbm [shape: f32[16,128], index: 7, kind: output, shape index: {}]  }
   0x1   :  { %v6530_v0 = vld [vmem:[%s10253_s3] sm:$0xff]   ;;  %6241 = vmatprep.subr.bf16.mxu0 %v7215_v1  ;;  %v6532_v3 = vld [vmem:[%s10253_s3 + $0x8] sm:$0xff]   ;;  %6245 = vmatprep.mubr.msk.bf16.mxu0 %vm7216_vm0, %v7215_v1  ;;  %v6535_v6 = vld [vmem:[%s10254_s4 + $0x10] sm:$0xff]  }
   0x2   :  { %v6531_v2 = vld [vmem:[%s10254_s4] sm:$0xff]   ;;  %6242 = vmatpush3.bf16.msra.mxu0 %v6530_v0  ;;  %v6533_v4 = vld [vmem:[%s10254_s4 + $0x8] sm:$0xff]   ;;  %v6537_v7 = vld [vmem:[%s10251_s1 + $0x1f0] sm:$0xff]  }
   0x3   :  { %6513 = vmatprep.subr.bf16.mxu1 %v6531_v2  ;;  %6243 = vmatprep.subr.bf16.mxu0 %v7215_v1  ;;  %v6534_v5 = vld [vmem:[%s10250_s0] sm:$0xff]   ;;  %v6536_v8 = vld [vmem:[%s10254_s4 + $0x18] sm:$0xff]   ;;  %v6540_v12 = vld [vmem:[%s10251_s1 + $0x8] sm:$0xff]  }
   0x4   :  { %6517 = vmatpush3.bf16.msra.mxu1 %v6531_v2  ;;  %v6539_v9 = vld [vmem:[%s10251_s1] sm:$0xff]   ;;  %6381 = vmatprep.mubr.msk.bf16.mxu1 %vm1037_vm2, %v6537_v7  ;;  %v6538_v10 = vld [vmem:[%s10251_s1 + $0x1f8] sm:$0xff]   ;;  %v6543_v13 = vld [vmem:[%s10251_s1 + $0x10] sm:$0xff]  }
   0x5   :  { %6514 = vmatprep.subr.bf16.mxu1 %v6533_v4  ;;  %v6541_v11 = vld [vmem:[%s10251_s1 + $0x200] sm:$0xff]   ;;  %v6542_v14 = vld [vmem:[%s10251_s1 + $0x208] sm:$0xff]   ;;  %v6545_v15 = vld [vmem:[%s10251_s1 + $0x210] sm:$0xff]  }
   0x6   :  { %6244 = vmatpush3.bf16.msra.mxu0 %v6532_v3  ;;  %v6544_v16 = vld [vmem:[%s10251_s1 + $0x18] sm:$0xff]   ;;  %v6547_v17 = vld [vmem:[%s10251_s1 + $0x20] sm:$0xff]   ;;  %v6548_v20 = vld [vmem:[%s10251_s1 + $0x28] sm:$0xff]  }
   0x7   :  { %6249 = vmatprep.subr.bf16.mxu0 %v6531_v2  ;;  %v6546_v18 = vld [vmem:[%s10251_s1 + $0x218] sm:$0xff]   ;;  %v6549_v19 = vld [vmem:[%s10251_s1 + $0x220] sm:$0xff]   ;;  %v6551_v21 = vld [vmem:[%s10251_s1 + $0x30] sm:$0xff]  }
   0x8   :  { %6518 = vmatpush3.bf16.msra.mxu1 %v6533_v4  ;;  %v6550_v22 = vld [vmem:[%s10251_s1 + $0x228] sm:$0xff]   ;;  %v6553_v23 = vld [vmem:[%s10251_s1 + $0x230] sm:$0xff]   ;;  %v6552_v24 = vld [vmem:[%s10251_s1 + $0x38] sm:$0xff]  }
   0x9   :  { %6246 = vmatmul.mubr.msk.bf16.vlgmr.msra.gmra.mrb[0].mxu0 %vm62_vm1, %v6534_v5  ;;  %6515 = vmatprep.subr.bf16.mxu1 %v6535_v6  ;;  %v6555_v25 = vld [vmem:[%s10251_s1 + $0x40] sm:$0xff]   ;;  %v6554_v26 = vld [vmem:[%s10251_s1 + $0x238] sm:$0xff]   ;;  %v6556_v28 = vld [vmem:[%s10251_s1 + $0x48] sm:$0xff]  }
   0xa   :  { %6250 = vmatpush3.bf16.msra.mxu0 %v6531_v2  ;;  %6257 = vmatprep.mubr.msk.bf16.mxu0 %vm1037_vm2, %v6539_v9  ;;  %v6557_v27 = vld [vmem:[%s10251_s1 + $0x240] sm:$0xff]   ;;  %v6559_v29 = vld [vmem:[%s10251_s1 + $0x50] sm:$0xff]   ;;  %v6558_v30 = vld [vmem:[%s10251_s1 + $0x248] sm:$0xff]  }
   0xb   :  { %6251 = vmatprep.subr.bf16.mxu0 %v6533_v4  ;;  %v6561_v31 = vld [vmem:[%s10251_s1 + $0x250] sm:$0xff]   ;;  %v6560_v32 = vld [vmem:[%s10251_s1 + $0x58] sm:$0xff]   ;;  %v6563_v33 = vld [vmem:[%s10251_s1 + $0x60] sm:$0xff]  }
   0xc   :  { %6519 = vmatpush3.bf16.msra.mxu1 %v6535_v6  ;;  %v6562_v34 = vld [vmem:[%s10251_s1 + $0x258] sm:$0xff]   ;;  %v6565_v35 = vld [vmem:[%s10251_s1 + $0x260] sm:$0xff]   ;;  %v6564_v36 = vld [vmem:[%s10251_s1 + $0x68] sm:$0xff]  }
   0xd   :  { %6516 = vmatprep.subr.bf16.mxu1 %v6536_v8  ;;  %v6567_v37 = vld [vmem:[%s10251_s1 + $0x70] sm:$0xff]   ;;  %v6566_v38 = vld [vmem:[%s10251_s1 + $0x268] sm:$0xff]   ;;  %v6568_v40 = vld [vmem:[%s10251_s1 + $0x78] sm:$0xff]  }
   0xe   :  { %6252 = vmatpush3.bf16.msra.mxu0 %v6533_v4  ;;  %v6569_v39 = vld [vmem:[%s10251_s1 + $0x270] sm:$0xff]   ;;  %v6571_v41 = vld [vmem:[%s10251_s1 + $0x80] sm:$0xff]   ;;  %v6570_v42 = vld [vmem:[%s10251_s1 + $0x278] sm:$0xff]  }
   0xf   :  { %6253 = vmatprep.subr.bf16.mxu0 %v6535_v6  ;;  %v6573_v43 = vld [vmem:[%s10251_s1 + $0x280] sm:$0xff]   ;;  %v6572_v44 = vld [vmem:[%s10251_s1 + $0x88] sm:$0xff]   ;;  %v6575_v45 = vld [vmem:[%s10251_s1 + $0x90] sm:$0xff]  }
  0x10   :  { %6520 = vmatpush3.bf16.msra.mxu1 %v6536_v8  ;;  %v6574_v46 = vld [vmem:[%s10251_s1 + $0x288] sm:$0xff]   ;;  %v6577_v47 = vld [vmem:[%s10251_s1 + $0x290] sm:$0xff]   ;;  %v6576_v48 = vld [vmem:[%s10251_s1 + $0x98] sm:$0xff]  }
  0x11   :  { %v6579_v49 = vld [vmem:[%s10251_s1 + $0xa0] sm:$0xff]   ;;  %v6578_v50 = vld [vmem:[%s10251_s1 + $0x298] sm:$0xff]   ;;  %v6580_v52 = vld [vmem:[%s10251_s1 + $0xa8] sm:$0xff]  }
  0x12   :  { %6254 = vmatpush3.bf16.msra.mxu0 %v6535_v6  ;;  %v6581_v51 = vld [vmem:[%s10251_s1 + $0x2a0] sm:$0xff]   ;;  %v6583_v53 = vld [vmem:[%s10251_s1 + $0xb0] sm:$0xff]   ;;  %v6582_v54 = vld [vmem:[%s10251_s1 + $0x2a8] sm:$0xff]  }
  0x13   :  { %6382 = vmatmul.mubr.msk.bf16.vlgmr.msra.gmra.mrb[0].mxu1 %vm1037_vm2, %v6538_v10  ;;  %6255 = vmatprep.subr.bf16.mxu0 %v6536_v8  ;;  %v6585_v55 = vld [vmem:[%s10251_s1 + $0x2b0] sm:$0xff]   ;;  %v6584_v56 = vld [vmem:[%s10251_s1 + $0xb8] sm:$0xff]   ;;  %v6587_v57 = vld [vmem:[%s10251_s1 + $0xc0] sm:$0xff]  }
  0x14   :  { %6385 = vmatprep.mubr.msk.bf16.mxu1 %vm1037_vm2, %v6541_v11  ;;  %v6586_v58 = vld [vmem:[%s10251_s1 + $0x2b8] sm:$0xff]   ;;  %v6589_v59 = vld [vmem:[%s10251_s1 + $0x2c0] sm:$0xff]   ;;  %v6588_v60 = vld [vmem:[%s10251_s1 + $0xc8] sm:$0xff]  }
  0x15   :  { %v6590_v61 = vld [vmem:[%s10251_s1 + $0x2c8] sm:$0xff]   ;;  %v6591_v62 = vld [vmem:[%s10251_s1 + $0xd0] sm:$0xff]   ;;  %v6592_v0 = vld [vmem:[%s10251_s1 + $0xd8] sm:$0xff]  }
  0x16   :  { %6256 = vmatpush3.bf16.msra.mxu0 %v6536_v8  ;;  %v6593_v63 = vld [vmem:[%s10251_s1 + $0x2d0] sm:$0xff]   ;;  %v6594_v1 = vld [vmem:[%s10251_s1 + $0x2d8] sm:$0xff]   ;;  %v6595_v2 = vld [vmem:[%s10251_s1 + $0xe0] sm:$0xff]  }
  0x17   :  { %v6597_v3 = vld [vmem:[%s10251_s1 + $0x2e0] sm:$0xff]  }
  0x19   :  { %6258 = vmatmul.mubr.msk.bf16.vlgmr.msra.gmra.mrb[4].mxu0 %vm1037_vm2, %v6540_v12 }
  0x1a   :  { %6261 = vmatprep.mubr.msk.bf16.mxu0 %vm1037_vm2, %v6543_v13 }
  0x1b   :  { %6386 = vmatmul.mubr.msk.bf16.gmra.mrb[4].mxu1 %vm1037_vm2, %v6542_v14 }
  0x1c   :  { %6389 = vmatprep.mubr.msk.bf16.mxu1 %vm1037_vm2, %v6545_v15 }
  0x21   :  { %6262 = vmatmul.mubr.msk.bf16.gmra.mrb[8].mxu0 %vm1037_vm2, %v6544_v16 }
  0x22   :  { %6265 = vmatprep.mubr.msk.bf16.mxu0 %vm1037_vm2, %v6547_v17 }
  0x23   :  { %6390 = vmatmul.mubr.msk.bf16.gmra.mrb[8].mxu1 %vm1037_vm2, %v6546_v18 }
  0x24   :  { %6393 = vmatprep.mubr.msk.bf16.mxu1 %vm1037_vm2, %v6549_v19 }
  0x29   :  { %6266 = vmatmul.mubr.msk.bf16.gmra.mrb[12].mxu0 %vm1037_vm2, %v6548_v20 }
  0x2a   :  { %6269 = vmatprep.mubr.msk.bf16.mxu0 %vm1037_vm2, %v6551_v21 }
  0x2b   :  { %6394 = vmatmul.mubr.msk.bf16.gmra.mrb[12].mxu1 %vm1037_vm2, %v6550_v22 }
  0x2c   :  { %6397 = vmatprep.mubr.msk.bf16.mxu1 %vm1037_vm2, %v6553_v23 }
  0x31   :  { %6270 = vmatmul.mubr.msk.bf16.gmra.mrb[16].mxu0 %vm1037_vm2, %v6552_v24 }
  0x32   :  { %6273 = vmatprep.mubr.msk.bf16.mxu0 %vm1037_vm2, %v6555_v25 }
  0x33   :  { %6398 = vmatmul.mubr.msk.bf16.gmra.mrb[16].mxu1 %vm1037_vm2, %v6554_v26 }
  0x34   :  { %6401 = vmatprep.mubr.msk.bf16.mxu1 %vm1037_vm2, %v6557_v27 }
  0x39   :  { %6274 = vmatmul.mubr.msk.bf16.gmra.mrb[20].mxu0 %vm1037_vm2, %v6556_v28 }
  0x3a   :  { %6277 = vmatprep.mubr.msk.bf16.mxu0 %vm1037_vm2, %v6559_v29 }
  0x3b   :  { %6402 = vmatmul.mubr.msk.bf16.gmra.mrb[20].mxu1 %vm1037_vm2, %v6558_v30 }
  0x3c   :  { %6405 = vmatprep.mubr.msk.bf16.mxu1 %vm1037_vm2, %v6561_v31 }
  0x41   :  { %6278 = vmatmul.mubr.msk.bf16.gmra.mrb[24].mxu0 %vm1037_vm2, %v6560_v32 }
  0x42   :  { %6281 = vmatprep.mubr.msk.bf16.mxu0 %vm1037_vm2, %v6563_v33 }
  0x43   :  { %6406 = vmatmul.mubr.msk.bf16.gmra.mrb[24].mxu1 %vm1037_vm2, %v6562_v34 }
  0x44   :  { %6409 = vmatprep.mubr.msk.bf16.mxu1 %vm1037_vm2, %v6565_v35 }
  0x49   :  { %6282 = vmatmul.mubr.msk.bf16.gmra.mrb[28].mxu0 %vm1037_vm2, %v6564_v36 }
  0x4a   :  { %6285 = vmatprep.mubr.msk.bf16.mxu0 %vm1037_vm2, %v6567_v37 }
  0x4b   :  { %6410 = vmatmul.mubr.msk.bf16.gmra.mrb[28].mxu1 %vm1037_vm2, %v6566_v38 }
  0x4c   :  { %6413 = vmatprep.mubr.msk.bf16.mxu1 %vm1037_vm2, %v6569_v39 }
  0x51   :  { %6286 = vmatmul.mubr.msk.bf16.gmra.mrb[32].mxu0 %vm1037_vm2, %v6568_v40 }
  0x52   :  { %6289 = vmatprep.mubr.msk.bf16.mxu0 %vm1037_vm2, %v6571_v41 }
  0x53   :  { %6414 = vmatmul.mubr.msk.bf16.gmra.mrb[32].mxu1 %vm1037_vm2, %v6570_v42 }
  0x54   :  { %6417 = vmatprep.mubr.msk.bf16.mxu1 %vm1037_vm2, %v6573_v43 }
  0x59   :  { %6290 = vmatmul.mubr.msk.bf16.gmra.mrb[36].mxu0 %vm1037_vm2, %v6572_v44 }
  0x5a   :  { %6293 = vmatprep.mubr.msk.bf16.mxu0 %vm1037_vm2, %v6575_v45 }
  0x5b   :  { %6418 = vmatmul.mubr.msk.bf16.gmra.mrb[36].mxu1 %vm1037_vm2, %v6574_v46 }
  0x5c   :  { %6421 = vmatprep.mubr.msk.bf16.mxu1 %vm1037_vm2, %v6577_v47 }
  0x61   :  { %6294 = vmatmul.mubr.msk.bf16.gmra.mrb[40].mxu0 %vm1037_vm2, %v6576_v48 }
  0x62   :  { %6297 = vmatprep.mubr.msk.bf16.mxu0 %vm1037_vm2, %v6579_v49 }
  0x63   :  { %6422 = vmatmul.mubr.msk.bf16.gmra.mrb[40].mxu1 %vm1037_vm2, %v6578_v50 }
  0x64   :  { %6425 = vmatprep.mubr.msk.bf16.mxu1 %vm1037_vm2, %v6581_v51 }
  0x69   :  { %6298 = vmatmul.mubr.msk.bf16.gmra.mrb[44].mxu0 %vm1037_vm2, %v6580_v52 }
  0x6a   :  { %6301 = vmatprep.mubr.msk.bf16.mxu0 %vm1037_vm2, %v6583_v53 }
  0x6b   :  { %6426 = vmatmul.mubr.msk.bf16.gmra.mrb[44].mxu1 %vm1037_vm2, %v6582_v54 }
  0x6c   :  { %6429 = vmatprep.mubr.msk.bf16.mxu1 %vm1037_vm2, %v6585_v55 }
  0x71   :  { %6302 = vmatmul.mubr.msk.bf16.gmra.mrb[48].mxu0 %vm1037_vm2, %v6584_v56 }
  0x72   :  { %6305 = vmatprep.mubr.msk.bf16.mxu0 %vm1037_vm2, %v6587_v57 }
  0x73   :  { %6430 = vmatmul.mubr.msk.bf16.gmra.mrb[48].mxu1 %vm1037_vm2, %v6586_v58 }
  0x74   :  { %6433 = vmatprep.mubr.msk.bf16.mxu1 %vm1037_vm2, %v6589_v59 }
  0x79   :  { %6306 = vmatmul.mubr.msk.bf16.gmra.mrb[52].mxu0 %vm1037_vm2, %v6588_v60 }
  0x7a   :  { %6309 = vmatprep.mubr.msk.bf16.mxu0 %vm1037_vm2, %v6591_v62 }
  0x7b   :  { %6434 = vmatmul.mubr.msk.bf16.gmra.mrb[52].mxu1 %vm1037_vm2, %v6590_v61 }
  0x7c   :  { %6437 = vmatprep.mubr.msk.bf16.mxu1 %vm1037_vm2, %v6593_v63 }
  0x81   :  { %6310 = vmatmul.mubr.msk.bf16.gmra.mrb[56].mxu0 %vm1037_vm2, %v6592_v0 }
  0x82   :  { %6313 = vmatprep.mubr.msk.bf16.mxu0 %vm1037_vm2, %v6595_v2 }
  0x83   :  { %6438 = vmatmul.mubr.msk.bf16.gmra.mrb[56].mxu1 %vm1037_vm2, %v6594_v1 }
  0x84   :  { %12 = vsyncpa [#allocation4], 0  ;;  %6441 = vmatprep.mubr.msk.bf16.mxu1 %vm1037_vm2, %v6597_v3  ;;  %v6596_v4 = vld [vmem:[%s10251_s1 + $0xe8] sm:$0xff]   ;;  %v6599_v5 = vld [vmem:[%s10251_s1 + $0xf0] sm:$0xff]   ;;  %v7217_v49 = vmov 1966171168   ;;  %v10258_v51 = vlaneseq }
  0x85   :  { %v6598_v6 = vld [vmem:[%s10251_s1 + $0x2e8] sm:$0xff]   ;;  %v6601_v7 = vld [vmem:[%s10251_s1 + $0x2f0] sm:$0xff]   ;;  %v6600_v8 = vld [vmem:[%s10251_s1 + $0xf8] sm:$0xff]   ;;  %v2485_v50 = vunpack.c.l.s4 %v7217_v49  ;;  %vm4473_vm3 = vcmask 130112   ;;  %vm4480_vm4 = vcmask 195712   ;;  %vm4487_vm5 = vcmask 261312  }
  0x86   :  { %v6603_v9 = vld [vmem:[%s10251_s1 + $0x100] sm:$0xff]   ;;  %v6602_v10 = vld [vmem:[%s10251_s1 + $0x2f8] sm:$0xff]   ;;  %v6604_v12 = vld [vmem:[%s10251_s1 + $0x108] sm:$0xff]   ;;  %v7711_v59 = vshrl.u32 %v10258_v51, 7  ;;  %vm4494_vm6 = vcmask 326912   ;;  %vm4501_vm7 = vcmask 392512  }
  0x87   :  { %v6605_v11 = vld [vmem:[%s10251_s1 + $0x300] sm:$0xff]   ;;  %v6607_v13 = vld [vmem:[%s10251_s1 + $0x110] sm:$0xff]   ;;  %v6606_v14 = vld [vmem:[%s10251_s1 + $0x308] sm:$0xff]   ;;  %v2486_v58 = vunpack.c.0.s8 %v2485_v50  ;;  %vm4508_vm8 = vcmask 458112   ;;  %vm4515_vm9 = vcmask 523712   ;;  %vm4522_vm10 = vcmask 589312  }
  0x88   :  { %v6609_v15 = vld [vmem:[%s10251_s1 + $0x310] sm:$0xff]   ;;  %v6608_v16 = vld [vmem:[%s10251_s1 + $0x118] sm:$0xff]   ;;  %v6611_v17 = vld [vmem:[%s10251_s1 + $0x120] sm:$0xff]   ;;  %10272 = vst [vmem:[#allocation6_spill] sm:$0xff] %v7711_v59  ;;  %vm4529_vm11 = vcmask 654912   ;;  %vm4536_vm12 = vcmask 720512  }
  0x89   :  { %6314 = vmatmul.mubr.msk.bf16.gmra.mrb[60].mxu0 %vm1037_vm2, %v6596_v4  ;;  %v6610_v18 = vld [vmem:[%s10251_s1 + $0x318] sm:$0xff]   ;;  %v6613_v19 = vld [vmem:[%s10251_s1 + $0x320] sm:$0xff]   ;;  %v6612_v20 = vld [vmem:[%s10251_s1 + $0x128] sm:$0xff]   ;;  %v2489_v0 = vsub.s32 %v2486_v58, %v7711_v59  ;;  %vm10270_vm13 = vcmask 786112   ;;  %vm4550_vm14 = vcmask 851712   ;;  %vm4557_vm15 = vcmask 917312  }
  0x8a   :  { %6317 = vmatprep.mubr.msk.bf16.mxu0 %vm1037_vm2, %v6599_v5  ;;  %v6615_v21 = vld [vmem:[%s10251_s1 + $0x130] sm:$0xff]   ;;  %v6614_v22 = vld [vmem:[%s10251_s1 + $0x328] sm:$0xff]   ;;  %v6616_v24 = vld [vmem:[%s10251_s1 + $0x138] sm:$0xff]   ;;  %vm4564_vm0 = vcmask 982912  }
  0x8b   :  { %6442 = vmatmul.mubr.msk.bf16.gmra.mrb[60].mxu1 %vm1037_vm2, %v6598_v6  ;;  %v6617_v23 = vld [vmem:[%s10251_s1 + $0x330] sm:$0xff]   ;;  %v6619_v25 = vld [vmem:[%s10251_s1 + $0x140] sm:$0xff]   ;;  %v6618_v26 = vld [vmem:[%s10251_s1 + $0x338] sm:$0xff]  }
  0x8c   :  { %6445 = vmatprep.mubr.msk.bf16.mxu1 %vm1037_vm2, %v6601_v7  ;;  %v6621_v27 = vld [vmem:[%s10251_s1 + $0x340] sm:$0xff]   ;;  %v6620_v28 = vld [vmem:[%s10251_s1 + $0x148] sm:$0xff]   ;;  %v6623_v29 = vld [vmem:[%s10251_s1 + $0x150] sm:$0xff]  }
  0x8d   :  { %v6622_v30 = vld [vmem:[%s10251_s1 + $0x348] sm:$0xff]   ;;  %v6625_v31 = vld [vmem:[%s10251_s1 + $0x350] sm:$0xff]   ;;  %v6624_v32 = vld [vmem:[%s10251_s1 + $0x158] sm:$0xff]  }
  0x8e   :  { %v6627_v33 = vld [vmem:[%s10251_s1 + $0x160] sm:$0xff]   ;;  %v6626_v34 = vld [vmem:[%s10251_s1 + $0x358] sm:$0xff]   ;;  %v6628_v36 = vld [vmem:[%s10251_s1 + $0x168] sm:$0xff]  }
  0x8f   :  { %v6629_v35 = vld [vmem:[%s10251_s1 + $0x360] sm:$0xff]   ;;  %v6631_v37 = vld [vmem:[%s10251_s1 + $0x170] sm:$0xff]   ;;  %v6630_v38 = vld [vmem:[%s10251_s1 + $0x368] sm:$0xff]  }
  0x90   :  { %v6633_v39 = vld [vmem:[%s10251_s1 + $0x370] sm:$0xff]   ;;  %v6632_v40 = vld [vmem:[%s10251_s1 + $0x178] sm:$0xff]   ;;  %v6635_v41 = vld [vmem:[%s10251_s1 + $0x180] sm:$0xff]  }
  0x91   :  { %6318 = vmatmul.mubr.msk.bf16.gmra.mrb[64].mxu0 %vm1037_vm2, %v6600_v8  ;;  %v6634_v42 = vld [vmem:[%s10251_s1 + $0x378] sm:$0xff]   ;;  %v6637_v43 = vld [vmem:[%s10251_s1 + $0x380] sm:$0xff]   ;;  %v6636_v44 = vld [vmem:[%s10251_s1 + $0x188] sm:$0xff]  }
  0x92   :  { %6321 = vmatprep.mubr.msk.bf16.mxu0 %vm1037_vm2, %v6603_v9  ;;  %v6641_v45 = vld [vmem:[%s10251_s1 + $0x190] sm:$0xff]   ;;  %v6638_v46 = vld [vmem:[%s10251_s1 + $0x388] sm:$0xff]   ;;  %v5840_v48 = vld [vmem:[%s10255_s5] ss:$0 sm:$0xff] }
  0x93   :  { %6446 = vmatmul.mubr.msk.bf16.gmra.mrb[64].mxu1 %vm1037_vm2, %v6602_v10  ;;  %v6643_v47 = vld [vmem:[%s10251_s1 + $0x390] sm:$0xff]   ;;  %v6642_v55 = vld [vmem:[%s10251_s1 + $0x198] sm:$0xff]   ;;  %v6645_v57 = vld [vmem:[%s10251_s1 + $0x1a0] sm:$0xff]  }
  0x94   :  { %6449 = vmatprep.mubr.msk.bf16.mxu1 %vm1037_vm2, %v6605_v11  ;;  %v6644_v62 = vld [vmem:[%s10251_s1 + $0x398] sm:$0xff]   ;;  %v6647_v63 = vld [vmem:[%s10251_s1 + $0x3a0] sm:$0xff]   ;;  %v6646_v1 = vld [vmem:[%s10251_s1 + $0x1a8] sm:$0xff]  }
  0x95   :  { %v6649_v4 = vld [vmem:[%s10251_s1 + $0x1b0] sm:$0xff]   ;;  %v6648_v8 = vld [vmem:[%s10251_s1 + $0x3a8] sm:$0xff]  }
  0x96   :  { %v6651_v11 = vld [vmem:[%s10251_s1 + $0x3b0] sm:$0xff]  }
  0x99   :  { %6322 = vmatmul.mubr.msk.bf16.gmra.mrb[68].mxu0 %vm1037_vm2, %v6604_v12 }
  0x9a   :  { %6325 = vmatprep.mubr.msk.bf16.mxu0 %vm1037_vm2, %v6607_v13 }
  0x9b   :  { %6450 = vmatmul.mubr.msk.bf16.gmra.mrb[68].mxu1 %vm1037_vm2, %v6606_v14 }
  0x9c   :  { %6453 = vmatprep.mubr.msk.bf16.mxu1 %vm1037_vm2, %v6609_v15 }
  0xa1   :  { %6326 = vmatmul.mubr.msk.bf16.gmra.mrb[72].mxu0 %vm1037_vm2, %v6608_v16 }
  0xa2   :  { %6329 = vmatprep.mubr.msk.bf16.mxu0 %vm1037_vm2, %v6611_v17  ;;  %v7747_v17 = vsub.s32 0, %v7711_v59 }
  0xa3   :  { %6454 = vmatmul.mubr.msk.bf16.gmra.mrb[72].mxu1 %vm1037_vm2, %v6610_v18 }
  0xa4   :  { %6457 = vmatprep.mubr.msk.bf16.mxu1 %vm1037_vm2, %v6613_v19 }
  0xa9   :  { %6330 = vmatmul.mubr.msk.bf16.gmra.mrb[76].mxu0 %vm1037_vm2, %v6612_v20 }
  0xaa   :  { %6333 = vmatprep.mubr.msk.bf16.mxu0 %vm1037_vm2, %v6615_v21 }
  0xab   :  { %6458 = vmatmul.mubr.msk.bf16.gmra.mrb[76].mxu1 %vm1037_vm2, %v6614_v22 }
  0xac   :  { %6461 = vmatprep.mubr.msk.bf16.mxu1 %vm1037_vm2, %v6617_v23 }
  0xb1   :  { %6334 = vmatmul.mubr.msk.bf16.gmra.mrb[80].mxu0 %vm1037_vm2, %v6616_v24 }
  0xb2   :  { %6337 = vmatprep.mubr.msk.bf16.mxu0 %vm1037_vm2, %v6619_v25 }
  0xb3   :  { %6462 = vmatmul.mubr.msk.bf16.gmra.mrb[80].mxu1 %vm1037_vm2, %v6618_v26 }
  0xb4   :  { %6465 = vmatprep.mubr.msk.bf16.mxu1 %vm1037_vm2, %v6621_v27 }
  0xb9   :  { %6338 = vmatmul.mubr.msk.bf16.gmra.mrb[84].mxu0 %vm1037_vm2, %v6620_v28 }
  0xba   :  { %6341 = vmatprep.mubr.msk.bf16.mxu0 %vm1037_vm2, %v6623_v29 }
  0xbb   :  { %6466 = vmatmul.mubr.msk.bf16.gmra.mrb[84].mxu1 %vm1037_vm2, %v6622_v30 }
  0xbc   :  { %6469 = vmatprep.mubr.msk.bf16.mxu1 %vm1037_vm2, %v6625_v31 }
  0xc1   :  { %6342 = vmatmul.mubr.msk.bf16.gmra.mrb[88].mxu0 %vm1037_vm2, %v6624_v32  ;;  %v6650_v32 = vld [vmem:[%s10251_s1 + $0x1b8] sm:$0xff]  }
  0xc2   :  { %6345 = vmatprep.mubr.msk.bf16.mxu0 %vm1037_vm2, %v6627_v33 }
  0xc3   :  { %6470 = vmatmul.mubr.msk.bf16.gmra.mrb[88].mxu1 %vm1037_vm2, %v6626_v34 }
  0xc4   :  { %6473 = vmatprep.mubr.msk.bf16.mxu1 %vm1037_vm2, %v6629_v35 }
  0xc9   :  { %6346 = vmatmul.mubr.msk.bf16.gmra.mrb[92].mxu0 %vm1037_vm2, %v6628_v36 }
  0xca   :  { %6349 = vmatprep.mubr.msk.bf16.mxu0 %vm1037_vm2, %v6631_v37 }
  0xcb   :  { %6474 = vmatmul.mubr.msk.bf16.gmra.mrb[92].mxu1 %vm1037_vm2, %v6630_v38 }
  0xcc   :  { %6477 = vmatprep.mubr.msk.bf16.mxu1 %vm1037_vm2, %v6633_v39  ;;  %v6653_v39 = vld [vmem:[%s10251_s1 + $0x1c0] sm:$0xff]  }
  0xd1   :  { %6350 = vmatmul.mubr.msk.bf16.gmra.mrb[96].mxu0 %vm1037_vm2, %v6632_v40 }
  0xd2   :  { %6353 = vmatprep.mubr.msk.bf16.mxu0 %vm1037_vm2, %v6635_v41 }
  0xd3   :  { %6478 = vmatmul.mubr.msk.bf16.gmra.mrb[96].mxu1 %vm1037_vm2, %v6634_v42 }
  0xd4   :  { %6481 = vmatprep.mubr.msk.bf16.mxu1 %vm1037_vm2, %v6637_v43 }
  0xd9   :  { %6354 = vmatmul.mubr.msk.bf16.gmra.mrb[100].mxu0 %vm1037_vm2, %v6636_v44 }
  0xda   :  { %6357 = vmatprep.mubr.msk.bf16.mxu0 %vm1037_vm2, %v6641_v45  ;;  %v6652_v45 = vld [vmem:[%s10251_s1 + $0x3b8] sm:$0xff]  }
  0xdb   :  { %6482 = vmatmul.mubr.msk.bf16.gmra.mrb[100].mxu1 %vm1037_vm2, %v6638_v46 }
  0xdc   :  { %v100_v52 = vpop.f32.mrb[0].mxu0  ;;  %6485 = vmatprep.mubr.msk.bf16.mxu1 %vm1037_vm2, %v6643_v47 }
  0xdd   :  { %v101_v53 = vadd.f32 %v5840_v48, %v100_v52  ;;  %v6247_v54 = vpop.f32.mrb[1].mxu0  ;;  %v6655_v52 = vld [vmem:[%s10251_s1 + $0x3c0] sm:$0xff]  }
  0xde   :  { %v103_v56 = vpop.f32.mrb[2].mxu0 }
  0xdf   :  { %107 = vst.msk [vmem:[#allocation2] sm:$0xff] %vm62_vm1, %v101_v53  ;;  %v104_v60 = vadd.f32 %v5840_v48, %v103_v56  ;;  %v6248_v61 = vpop.f32.mrb[3].mxu0 }
  0xe1   :  { %108 = vst.msk [vmem:[#allocation2 + $0x8] sm:$0xff] %vm62_vm1, %v104_v60  ;;  %6358 = vmatmul.mubr.msk.bf16.gmra.mrb[104].mxu0 %vm1037_vm2, %v6642_v55 }
  0xe2   :  { %6361 = vmatprep.mubr.msk.bf16.mxu0 %vm1037_vm2, %v6645_v57 }
  0xe3   :  { %6486 = vmatmul.mubr.msk.bf16.gmra.mrb[104].mxu1 %vm1037_vm2, %v6644_v62 }
  0xe4   :  { %6489 = vmatprep.mubr.msk.bf16.mxu1 %vm1037_vm2, %v6647_v63 }
  0xe6   :  { %v2479_v2 = vld [vmem:[#allocation2] sm:$0xff]  ;;  %v7728_v3 = vpop.f32.mrb[0].mxu1 }
  0xe7   :  { %v2483_v5 = vcombine.high %v2479_v2, %v2479_v2  ;;  %v2490_v6 = vrot.slane %v2479_v2, %v2489_v0  ;;  %v7733_v7 = vpop.f32.mrb[1].mxu1 }
  0xe8   :  { %v2480_v9 = vld [vmem:[#allocation2 + $0x8] sm:$0xff]  ;;  %v7738_v10 = vpop.f32.mrb[2].mxu1 }
  0xe9   :  { %v2497_v12 = vrot.slane %v2483_v5, %v2489_v0  ;;  %v2498_v13 = vcombine.high %v2490_v6, %v2490_v6  ;;  %v2506_v14 = vrot.slane %v2490_v6, %v2489_v0  ;;  %v2532_v15 = vcombine.high %v2480_v9, %v2480_v9  ;;  %v7743_v16 = vpop.f32.mrb[3].mxu1  ;;  %6362 = vmatmul.mubr.msk.bf16.gmra.mrb[108].mxu0 %vm1037_vm2, %v6646_v1  ;;  %v6654_v6 = vld [vmem:[%s10251_s1 + $0x1c8] sm:$0xff]  }
  0xea   :  { %v2539_v18 = vrot.slane %v2480_v9, %v2489_v0  ;;  %6365 = vmatprep.mubr.msk.bf16.mxu0 %vm1037_vm2, %v6649_v4 }
  0xeb   :  { %v2499_v19 = vcombine.high %v2497_v12, %v2497_v12  ;;  %v2513_v20 = vrot.slane %v2497_v12, %v2489_v0  ;;  %v2520_v21 = vrot.slane %v2498_v13, %v2489_v0  ;;  %v2528_v22 = vcombine.high %v2506_v14, %v2506_v14  ;;  %6490 = vmatmul.mubr.msk.bf16.gmra.mrb[108].mxu1 %vm1037_vm2, %v6648_v8  ;;  %v6657_v12 = vld [vmem:[%s10251_s1 + $0x1d0] sm:$0xff]  }
  0xec   :  { %v2546_v23 = vrot.slane %v2532_v15, %v2489_v0  ;;  %v2547_v24 = vcombine.high %v2539_v18, %v2539_v18  ;;  %v2555_v25 = vrot.slane %v2539_v18, %v2489_v0  ;;  %v6259_v26 = vpop.f32.mrb[4].mxu0  ;;  %6493 = vmatprep.mubr.msk.bf16.mxu1 %vm1037_vm2, %v6651_v11  ;;  %v7786_v53 = vrot.slane %v2506_v14, %v7747_v17  ;;  %v6656_v15 = vld [vmem:[%s10251_s1 + $0x3c8] sm:$0xff]  }
  0xed   :  { %v7752_v27 = vrot.slane %v2499_v19, %v2489_v0  ;;  %v2529_v28 = vcombine.high %v2513_v20, %v2513_v20  ;;  %v2530_v29 = vcombine.high %v2520_v21, %v2520_v21  ;;  %v7755_v30 = vrot.slane %v2520_v21, %v7747_v17  ;;  %v1456_v31 = vpop.f32.mrb[5].mxu0 }
  0xee   :  { %v7761_v33 = vrot.slane %v2528_v22, %v7747_v17  ;;  %v7764_v34 = vrot.slane %v2513_v20, %v7747_v17  ;;  %v2548_v35 = vcombine.high %v2546_v23, %v2546_v23  ;;  %v2562_v36 = vrot.slane %v2546_v23, %v2489_v0  ;;  %v6387_v37 = vpop.f32.mrb[4].mxu1  ;;  %v6260_v38 = vpop.f32.mrb[6].mxu0  ;;  %v6659_v20 = vld [vmem:[%s10251_s1 + $0x3d0] sm:$0xff]  }
  0xef   :  { %v7770_v40 = vrot.slane %v2530_v29, %v7747_v17  ;;  %v7774_v41 = vrot.slane %v7752_v27, %v7747_v17  ;;  %v7777_v42 = vrot.slane %v2529_v28, %v7747_v17  ;;  %v1968_v43 = vpop.f32.mrb[5].mxu1  ;;  %v1459_v44 = vpop.f32.mrb[7].mxu0  ;;  %v2569_v46 = vrot.slane %v2547_v24, %v2489_v0 }
  0xf0   :  { %v2576_v47 = vrot.slane %v2548_v35, %v2489_v0  ;;  %v2577_v48 = vcombine.high %v2555_v25, %v2555_v25  ;;  %v2578_v49 = vcombine.high %v2562_v36, %v2562_v36  ;;  %v6388_v50 = vpop.f32.mrb[6].mxu1  ;;  %v7789_v54 = vrot.slane %v2562_v36, %v7747_v17 }
  0xf1   :  { %10273 = vst [vmem:[#allocation7_spill] sm:$0xff] %v7774_v41  ;;  %10274 = vst [vmem:[#allocation8_spill] sm:$0xff] %v7777_v42  ;;  %v1971_v55 = vpop.f32.mrb[7].mxu1  ;;  %6366 = vmatmul.mubr.msk.bf16.gmra.mrb[112].mxu0 %vm1037_vm2, %v6650_v32  ;;  %v2579_v56 = vcombine.high %v2569_v46, %v2569_v46  ;;  %v7793_v58 = vrot.slane %v2569_v46, %v7747_v17  ;;  %v7816_v2 = vrot.slane %v2555_v25, %v7747_v17  ;;  %v7892_v46 = vld [vmem:[%s10256_s6] ss:$0 sm:$0xff] }
  0xf2   :  { %v2580_v57 = vcombine.high %v2576_v47, %v2576_v47  ;;  %v7796_v60 = vrot.slane %v2577_v48, %v7747_v17  ;;  %6369 = vmatprep.mubr.msk.bf16.mxu0 %vm1037_vm2, %v6653_v39  ;;  %v7800_v61 = vrot.slane %v2576_v47, %v7747_v17  ;;  %v7803_v62 = vrot.slane %v2578_v49, %v7747_v17  ;;  %v6660_v39 = vld [vmem:[%s10251_s1 + $0x3d8] sm:$0xff]  }
  0xf3   :  { %6494 = vmatmul.mubr.msk.bf16.gmra.mrb[112].mxu1 %vm1037_vm2, %v6652_v45  ;;  %v7807_v63 = vrot.slane %v2579_v56, %v7747_v17  ;;  %v2663_v4 = vadd.f32 %v6259_v26, %v7786_v53  ;;  %v2661_v8 = vadd.f32 %v7786_v53, %v1456_v31  ;;  %v2664_v18 = vadd.f32 %v6260_v38, %v7786_v53  ;;  %v6658_v31 = vld [vmem:[%s10251_s1 + $0x1d8] sm:$0xff]  }
  0xf4   :  { %10275 = vst [vmem:[#allocation9_spill] sm:$0xff] %v7800_v61  ;;  %10276 = vst [vmem:[#allocation10_spill] sm:$0xff] %v7803_v62  ;;  %v7810_v0 = vrot.slane %v2580_v57, %v7747_v17  ;;  %v7812_v1 = vpop.f32.mrb[8].mxu0  ;;  %6497 = vmatprep.mubr.msk.bf16.mxu1 %vm1037_vm2, %v6655_v52  ;;  %v2531_v21 = vcombine.high %v7752_v27, %v7752_v27  ;;  %v2789_v22 = vadd.f32 %v7816_v2, %v1968_v43 }
  0xf5   :  { %v7819_v5 = vpop.f32.mrb[9].mxu0  ;;  %6667 = vtanh.f32 %v2663_v4  ;;  %v2791_v24 = vadd.f32 %v6387_v37, %v7816_v2  ;;  %v2792_v25 = vadd.f32 %v6388_v50, %v7816_v2  ;;  %v2790_v28 = vadd.f32 %v7816_v2, %v1971_v55  ;;  %v6662_v4 = vld [vmem:[%s10251_s1 + $0x1e8] sm:$0xff]  }
  0xf6   :  { %10277 = vst [vmem:[#allocation11_spill] sm:$0xff] %v7810_v0  ;;  %v7825_v9 = vpop.f32.mrb[8].mxu1  ;;  %v7827_v11 = vpop.f32.mrb[10].mxu0  ;;  %6669 = vtanh.f32 %v2661_v8  ;;  %v7859_v27 = vrot.slane %v2531_v21, %v7747_v17  ;;  %v2662_v32 = vadd.f32 %v7786_v53, %v1459_v44  ;;  %v6661_v17 = vld [vmem:[%s10251_s1 + $0x1e0] sm:$0xff]  }
  0xf7   :  { %v7832_v13 = vpop.f32.mrb[9].mxu1  ;;  %v7834_v14 = vpop.f32.mrb[11].mxu0  ;;  %6671 = vtanh.f32 %v2664_v18  ;;  %v6663_v44 = vld [vmem:[%s10251_s1 + $0x3e0] sm:$0xff]  }
  0xf8   :  { %v7840_v19 = vpop.f32.mrb[10].mxu1  ;;  %10278 = vst [vmem:[#allocation12_spill] sm:$0xff] %v7859_v27  ;;  %6673 = vtanh.f32 %v2789_v22  ;;  %v2786_v45 = vadd.f32 %v7859_v27, %v7743_v16  ;;  %v2785_v48 = vadd.f32 %v7859_v27, %v7733_v7  ;;  %v2787_v50 = vadd.f32 %v7728_v3, %v7859_v27  ;;  %v6664_v22 = vld [vmem:[%s10251_s1 + $0x3e8] sm:$0xff]  }
  0xf9   :  { %v7848_v23 = vpop.f32.mrb[11].mxu1  ;;  %6370 = vmatmul.mubr.msk.bf16.gmra.mrb[116].mxu0 %vm1037_vm2, %v6654_v6  ;;  %6675 = vtanh.f32 %v2791_v24  ;;  %v2788_v56 = vadd.f32 %v7738_v10, %v7859_v27 }
  0xfa   :  { %6373 = vmatprep.mubr.msk.bf16.mxu0 %vm1037_vm2, %v6657_v12  ;;  %6677 = vtanh.f32 %v2792_v25 }
  0xfb   :  { %6498 = vmatmul.mubr.msk.bf16.gmra.mrb[116].mxu1 %vm1037_vm2, %v6656_v15  ;;  %6679 = vtanh.f32 %v2790_v28 }
  0xfc   :  { %v7855_v26 = vpop.f32.mrb[12].mxu0  ;;  %6501 = vmatprep.mubr.msk.bf16.mxu1 %vm1037_vm2, %v6659_v20  ;;  %6681 = vtanh.f32 %v2662_v32 }
  0xfd   :  { %v7862_v29 = vpop.f32.mrb[13].mxu0  ;;  %6683 = vtanh.f32 %v2786_v45  ;;  %v2667_v45 = vadd.f32 %v7812_v1, %v7786_v53 }
  0xfe   :  { %v7868_v35 = vpop.f32.mrb[12].mxu1  ;;  %v7870_v36 = vpop.f32.mrb[14].mxu0  ;;  %6685 = vtanh.f32 %v2785_v48 }
  0xff   :  { %v7875_v37 = vpop.f32.mrb[13].mxu1  ;;  %v7877_v38 = vpop.f32.mrb[15].mxu0  ;;  %6687 = vtanh.f32 %v2787_v50 }
 0x100   :  { %v7882_v43 = vpop.f32.mrb[14].mxu1  ;;  %v6668_v49 = vpop.eup %6667  ;;  %6689 = vtanh.f32 %v2788_v56 }
 0x101   :  { %v7894_v47 = vpop.f32.mrb[15].mxu1  ;;  %6374 = vmatmul.mubr.msk.bf16.gmra.mrb[120].mxu0 %vm1037_vm2, %v6658_v31  ;;  %v6670_v16 = vpop.eup %6669  ;;  %v3182_v52 = vmul.f32 %v6668_v49, %v7892_v46  ;;  %v6665_v31 = vld [vmem:[%s10251_s1 + $0x3f0] sm:$0xff]  }
 0x102   :  { %6377 = vmatprep.mubr.msk.bf16.mxu0 %vm1037_vm2, %v6661_v17  ;;  %v3180_v7 = vmul.f32 %v6670_v16, %v7892_v46  ;;  %v6672_v6 = vpop.eup %6671  ;;  %v2668_v17 = vadd.f32 %v7827_v11, %v7786_v53 }
 0x103   :  { %6502 = vmatmul.mubr.msk.bf16.gmra.mrb[120].mxu1 %vm1037_vm2, %v6660_v39  ;;  %v3443_v3 = vsel %vm62_vm1, %v3182_v52, 0.0  ;;  %v6674_v15 = vpop.eup %6673  ;;  %v3183_v18 = vmul.f32 %v6672_v6, %v7892_v46  ;;  %v2666_v6 = vadd.f32 %v7786_v53, %v7834_v14 }
 0x104   :  { %v7904_v55 = vpop.f32.mrb[16].mxu0  ;;  %6505 = vmatprep.mubr.msk.bf16.mxu1 %vm1037_vm2, %v6663_v44  ;;  %3444 = vadd.xlane.f32.xlu1 %v3443_v3  ;;  %v3437_v10 = vsel %vm62_vm1, %v3180_v7, 0.0  ;;  %v6676_v24 = vpop.eup %6675  ;;  %v3308_v25 = vmul.f32 %v6674_v15, %v7892_v46  ;;  %6691 = vtanh.f32 %v2668_v17 }
 0x105   :  { %v7910_v57 = vpop.f32.mrb[17].mxu0  ;;  %3438 = vadd.xlane.f32.xlu0 %v3437_v10  ;;  %v6678_v32 = vpop.eup %6677  ;;  %v3446_v48 = vsel %vm62_vm1, %v3183_v18, 0.0  ;;  %v3310_v52 = vmul.f32 %v6676_v24, %v7892_v46  ;;  %6693 = vtanh.f32 %v2667_v45 }
 0x106   :  { %v7916_v8 = vpop.f32.mrb[16].mxu1  ;;  %v7918_v12 = vpop.f32.mrb[18].mxu0  ;;  %v3311_v49 = vmul.f32 %v6678_v32, %v7892_v46  ;;  %v3821_v11 = vsel %vm62_vm1, %v3308_v25, 0.0  ;;  %6695 = vtanh.f32 %v2666_v6 }
 0x107   :  { %v7922_v20 = vpop.f32.mrb[17].mxu1  ;;  %v1507_v21 = vpop.f32.mrb[19].mxu0 }
 0x108   :  { %v6400_v28 = vpop.f32.mrb[18].mxu1  ;;  %v7934_v39 = vadd.f32 %v7786_v53, %v1507_v21  ;;  %v6680_v50 = vpop.eup %6679  ;;  %3447 = vadd.xlane.f32.xlu1 %v3446_v48  ;;  %v3830_v10 = vsel %vm62_vm1, %v3311_v49, 0.0 }
 0x109   :  { %v2019_v44 = vpop.f32.mrb[19].mxu1  ;;  %6378 = vmatmul.mubr.msk.bf16.gmra.mrb[124].mxu0 %vm1037_vm2, %v6662_v4  ;;  %v7942_v16 = vadd.f32 %v6400_v28, %v7816_v2  ;;  %v6682_v7 = vpop.eup %6681  ;;  %3822 = vadd.xlane.f32.xlu0 %v3821_v11  ;;  %v2665_v4 = vadd.f32 %v7786_v53, %v7819_v5  ;;  %v3309_v18 = vmul.f32 %v6680_v50, %v7892_v46  ;;  %v3827_v5 = vsel %vm62_vm1, %v3310_v52, 0.0 }
 0x10a   :  { %v7947_v56 = vadd.f32 %v7816_v2, %v2019_v44  ;;  %v6684_v25 = vpop.eup %6683  ;;  %v3181_v14 = vmul.f32 %v6682_v7, %v7892_v46  ;;  %v6666_v44 = vld [vmem:[%s10251_s1 + $0x3f8] sm:$0xff]   ;;  %v2795_v11 = vadd.f32 %v7825_v9, %v7816_v2  ;;  %v2796_v52 = vadd.f32 %v7840_v19, %v7816_v2 }
 0x10b   :  { %6506 = vmatmul.mubr.msk.bf16.gmra.mrb[124].mxu1 %vm1037_vm2, %v6664_v22  ;;  %v6686_v45 = vpop.eup %6685  ;;  %6697 = vtanh.f32 %v2665_v4  ;;  %v2793_v4 = vadd.f32 %v7816_v2, %v7832_v13 }
 0x10c   :  { %v6275_v1 = vpop.f32.mrb[20].mxu0  ;;  %6509 = vmatprep.mubr.msk.bf16.mxu1 %vm1037_vm2, %v6665_v31  ;;  %3831 = vadd.xlane.f32.xlu1 %v3830_v10  ;;  %v3824_v10 = vsel %vm62_vm1, %v3309_v18, 0.0  ;;  %v3440_v9 = vsel %vm62_vm1, %v3181_v14, 0.0  ;;  %v3304_v6 = vmul.f32 %v6686_v45, %v7892_v46  ;;  %6699 = vtanh.f32 %v2796_v52 }
 0x10d   :  { %v7956_v3 = vadd.f32 %v6275_v1, %v7755_v30  ;;  %v1520_v15 = vpop.f32.mrb[21].mxu0  ;;  %3828 = vadd.xlane.f32.xlu0 %v3827_v5  ;;  %v2794_v18 = vadd.f32 %v7816_v2, %v7848_v23  ;;  %6701 = vtanh.f32 %v2795_v11 }
 0x10e   :  { %v6403_v21 = vpop.f32.mrb[20].mxu1  ;;  %v7961_v22 = vadd.f32 %v7755_v30, %v1520_v15  ;;  %v6276_v24 = vpop.f32.mrb[22].mxu0  ;;  %v3809_v13 = vsel %vm62_vm1, %v3304_v6, 0.0  ;;  %v2672_v6 = vadd.f32 %v7870_v36, %v7786_v53 }
 0x10f   :  { %v7966_v28 = vadd.f32 %v6403_v21, %v7793_v58  ;;  %v2032_v31 = vpop.f32.mrb[21].mxu1  ;;  %v7969_v32 = vadd.f32 %v6276_v24, %v7755_v30  ;;  %v1523_v17 = vpop.f32.mrb[23].mxu0  ;;  %v3305_v21 = vmul.f32 %v6684_v25, %v7892_v46  ;;  %6703 = vtanh.f32 %v2794_v18 }
 0x110   :  { %v7975_v48 = vadd.f32 %v7793_v58, %v2032_v31  ;;  %v7978_v49 = vadd.f32 %v7755_v30, %v1523_v17  ;;  %v6404_v50 = vpop.f32.mrb[22].mxu1  ;;  %v6688_v15 = vpop.eup %6687  ;;  %3825 = vadd.xlane.f32.xlu1 %v3824_v10  ;;  %6705 = vtanh.f32 %v2793_v4  ;;  %v2670_v4 = vadd.f32 %v7786_v53, %v7877_v38 }
 0x111   :  { %v7985_v7 = vadd.f32 %v6404_v50, %v7793_v58  ;;  %v2035_v1 = vpop.f32.mrb[23].mxu1  ;;  %v6690_v5 = vpop.eup %6689  ;;  %3441 = vadd.xlane.f32.xlu0 %v3440_v9  ;;  %v3812_v14 = vsel %vm62_vm1, %v3305_v21, 0.0  ;;  %v3306_v23 = vmul.f32 %v6688_v15, %v7892_v46  ;;  %v2671_v15 = vadd.f32 %v7855_v26, %v7786_v53 }
 0x112   :  { %v7990_v24 = vadd.f32 %v7793_v58, %v2035_v1  ;;  %v3307_v17 = vmul.f32 %v6690_v5, %v7892_v46  ;;  %v6692_v1 = vpop.eup %6691  ;;  %6707 = vtanh.f32 %v2672_v6 }
 0x113   :  { %6510 = vmatmul.mubr.msk.bf16.gmra.mrb[128].mxu1 %vm1037_vm2, %v6666_v44  ;;  %v6694_v5 = vpop.eup %6693  ;;  %v3815_v18 = vsel %vm62_vm1, %v3306_v23, 0.0  ;;  %6709 = vtanh.f32 %v2671_v15  ;;  %vm4571_vm2 = vcmask 1048512  }
 0x114   :  { %v6279_v19 = vpop.f32.mrb[24].mxu0  ;;  %3813 = vadd.xlane.f32.xlu1 %v3812_v14  ;;  %v3186_v26 = vmul.f32 %v6694_v5, %v7892_v46  ;;  %6711 = vtanh.f32 %v2670_v4 }
 0x115   :  { %v8000_v25 = vadd.f32 %v6279_v19, %v7755_v30  ;;  %v1536_v31 = vpop.f32.mrb[25].mxu0  ;;  %3810 = vadd.xlane.f32.xlu0 %v3809_v13  ;;  %v3187_v13 = vmul.f32 %v6692_v1, %v7892_v46 }
 0x116   :  { %v6407_v45 = vpop.f32.mrb[24].mxu1  ;;  %v8005_v44 = vadd.f32 %v7755_v30, %v1536_v31  ;;  %v6280_v50 = vpop.f32.mrb[26].mxu0 }
 0x117   :  { %v8010_v52 = vadd.f32 %v6407_v45, %v7793_v58  ;;  %v2048_v10 = vpop.f32.mrb[25].mxu1  ;;  %v8013_v11 = vadd.f32 %v6280_v50, %v7755_v30  ;;  %v1539_v21 = vpop.f32.mrb[27].mxu0  ;;  %v3818_v50 = vsel %vm62_vm1, %v3307_v17, 0.0 }
 0x118   :  { %v8016_v9 = vadd.f32 %v7793_v58, %v2048_v10  ;;  %v8019_v19 = vadd.f32 %v7755_v30, %v1539_v21  ;;  %v6408_v31 = vpop.f32.mrb[26].mxu1  ;;  %v6696_v21 = vpop.eup %6695  ;;  %3819 = vadd.xlane.f32.xlu1 %v3818_v50 }
 0x119   :  { %v8026_v14 = vadd.f32 %v6408_v31, %v7793_v58  ;;  %v2051_v45 = vpop.f32.mrb[27].mxu1  ;;  %v6698_v51 = vpop.eup %6697  ;;  %3816 = vadd.xlane.f32.xlu0 %v3815_v18  ;;  %v2669_v31 = vadd.f32 %v7786_v53, %v7862_v29  ;;  %v3185_v23 = vmul.f32 %v6696_v21, %v7892_v46  ;;  %v3455_v29 = vsel %vm62_vm1, %v3186_v26, 0.0 }
 0x11a   :  { %v8031_v10 = vadd.f32 %v7793_v58, %v2051_v45  ;;  %v3458_v45 = vsel %vm62_vm1, %v3187_v13, 0.0  ;;  %v6700_v27 = vpop.eup %6699  ;;  %v3184_v38 = vmul.f32 %v6698_v51, %v7892_v46  ;;  %v2799_v51 = vadd.f32 %v7868_v35, %v7816_v2 }
 0x11b   :  { %v6702_v21 = vpop.eup %6701  ;;  %v2800_v26 = vadd.f32 %v7882_v43, %v7816_v2  ;;  %6713 = vtanh.f32 %v2669_v31  ;;  %v2798_v31 = vadd.f32 %v7816_v2, %v7894_v47 }
 0x11c   :  { %v6283_v36 = vpop.f32.mrb[28].mxu0  ;;  %3459 = vadd.xlane.f32.xlu1 %v3458_v45  ;;  %v6704_v62 = vpop.eup %6703  ;;  %v3449_v35 = vsel %vm62_vm1, %v3184_v38, 0.0  ;;  %v3314_v4 = vmul.f32 %v6702_v21, %v7892_v46 }
 0x11d   :  { %v8040_v17 = vadd.f32 %v6283_v36, %v7755_v30  ;;  %v1552_v1 = vpop.f32.mrb[29].mxu0  ;;  %3456 = vadd.xlane.f32.xlu0 %v3455_v29  ;;  %v3452_v29 = vsel %vm62_vm1, %v3185_v23, 0.0  ;;  %v6706_v42 = vpop.eup %6705  ;;  %6715 = vtanh.f32 %v2800_v26  ;;  %v3313_v38 = vmul.f32 %v6704_v62, %v7892_v46 }
 0x11e   :  { %v6411_v5 = vpop.f32.mrb[28].mxu1  ;;  %v8045_v50 = vadd.f32 %v7755_v30, %v1552_v1  ;;  %v6284_v18 = vpop.f32.mrb[30].mxu0  ;;  %6717 = vtanh.f32 %v2799_v51  ;;  %v3312_v47 = vmul.f32 %v6706_v42, %v7892_v46  ;;  %v2675_v42 = vadd.f32 %v7904_v55, %v7786_v53 }
 0x11f   :  { %v8050_v6 = vadd.f32 %v6411_v5, %v7793_v58  ;;  %v2064_v36 = vpop.f32.mrb[29].mxu1  ;;  %v8053_v15 = vadd.f32 %v6284_v18, %v7755_v30  ;;  %v1555_v13 = vpop.f32.mrb[31].mxu0  ;;  %6719 = vtanh.f32 %v2798_v31 }
 0x120   :  { %v8056_v1 = vadd.f32 %v7793_v58, %v2064_v36  ;;  %v8059_v0 = vadd.f32 %v7755_v30, %v1555_v13  ;;  %v6412_v45 = vpop.f32.mrb[30].mxu1  ;;  %v3315_v36 = vmul.f32 %v6700_v27, %v7892_v46  ;;  %3453 = vadd.xlane.f32.xlu1 %v3452_v29  ;;  %v6708_v59 = vpop.eup %6707  ;;  %v3833_v31 = vsel %vm62_vm1, %v3312_v47, 0.0 }
 0x121   :  { %v8066_v5 = vadd.f32 %v6412_v45, %v7793_v58  ;;  %v2067_v18 = vpop.f32.mrb[31].mxu1  ;;  %3450 = vadd.xlane.f32.xlu0 %v3449_v35  ;;  %v2797_v45 = vadd.f32 %v7816_v2, %v7875_v37  ;;  %v3839_v37 = vsel %vm62_vm1, %v3314_v4, 0.0  ;;  %v6710_v62 = vpop.eup %6709  ;;  %v2803_v4 = vadd.f32 %v7916_v8, %v7816_v2 }
 0x122   :  { %v8071_v13 = vadd.f32 %v7793_v58, %v2067_v18  ;;  %v3842_v18 = vsel %vm62_vm1, %v3315_v36, 0.0  ;;  %v3190_v55 = vmul.f32 %v6710_v62, %v7892_v46 }
 0x123   :  { %6721 = vtanh.f32 %v2797_v45  ;;  %v2673_v45 = vadd.f32 %v7786_v53, %v7910_v57 }
 0x124   :  { %v6287_v43 = vpop.f32.mrb[32].mxu0  ;;  %3843 = vadd.xlane.f32.xlu1 %v3842_v18  ;;  %6723 = vtanh.f32 %v2803_v4  ;;  %v3467_v57 = vsel %vm62_vm1, %v3190_v55, 0.0 }
 0x125   :  { %v8080_v27 = vadd.f32 %v6287_v43, %v7755_v30  ;;  %v1568_v23 = vpop.f32.mrb[33].mxu0  ;;  %3840 = vadd.xlane.f32.xlu0 %v3839_v37  ;;  %v3836_v37 = vsel %vm62_vm1, %v3313_v38, 0.0  ;;  %v2676_v38 = vadd.f32 %v7918_v12, %v7786_v53  ;;  %6725 = vtanh.f32 %v2675_v42 }
 0x126   :  { %v6415_v21 = vpop.f32.mrb[32].mxu1  ;;  %v8085_v29 = vadd.f32 %v7755_v30, %v1568_v23  ;;  %v6288_v35 = vpop.f32.mrb[34].mxu0 }
 0x127   :  { %v8090_v26 = vadd.f32 %v6415_v21, %v7793_v58  ;;  %v2080_v43 = vpop.f32.mrb[33].mxu1  ;;  %v8093_v51 = vadd.f32 %v6288_v35, %v7755_v30  ;;  %v1571_v36 = vpop.f32.mrb[35].mxu0  ;;  %6727 = vtanh.f32 %v2676_v38 }
 0x128   :  { %v8096_v23 = vadd.f32 %v7793_v58, %v2080_v43  ;;  %v8099_v61 = vadd.f32 %v7755_v30, %v1571_v36  ;;  %v6416_v18 = vpop.f32.mrb[34].mxu1  ;;  %v3191_v43 = vmul.f32 %v6708_v59, %v7892_v46  ;;  %v6712_v36 = vpop.eup %6711  ;;  %3837 = vadd.xlane.f32.xlu1 %v3836_v37  ;;  %6729 = vtanh.f32 %v2673_v45 }
 0x129   :  { %v8106_v21 = vadd.f32 %v6416_v18, %v7793_v58  ;;  %v2083_v35 = vpop.f32.mrb[35].mxu1  ;;  %v6714_v41 = vpop.eup %6713  ;;  %3834 = vadd.xlane.f32.xlu0 %v3833_v31  ;;  %v3189_v47 = vmul.f32 %v6712_v36, %v7892_v46  ;;  %6731 = vtanh.f32 %v7934_v39 }
 0x12a   :  { %v8111_v30 = vadd.f32 %v7793_v58, %v2083_v35  ;;  %v3470_v18 = vsel %vm62_vm1, %v3191_v43, 0.0  ;;  %v6716_v37 = vpop.eup %6715  ;;  %v3188_v53 = vmul.f32 %v6714_v41, %v7892_v46  ;;  %v2801_v41 = vadd.f32 %v7816_v2, %v7922_v20 }
 0x12b   :  { %v6718_v36 = vpop.eup %6717 }
 0x12c   :  { %v6291_v8 = vpop.f32.mrb[36].mxu0  ;;  %3471 = vadd.xlane.f32.xlu1 %v3470_v18  ;;  %6733 = vtanh.f32 %v2801_v41 }
 0x12d   :  { %v8120_v59 = vadd.f32 %v6291_v8, %v7761_v33  ;;  %v1584_v58 = vpop.f32.mrb[37].mxu0  ;;  %3468 = vadd.xlane.f32.xlu0 %v3467_v57  ;;  %v3319_v57 = vmul.f32 %v6716_v37, %v7892_v46  ;;  %6735 = vtanh.f32 %v7942_v16 }
 0x12e   :  { %v6419_v62 = vpop.f32.mrb[36].mxu1  ;;  %v8125_v35 = vadd.f32 %v7761_v33, %v1584_v58  ;;  %v6292_v4 = vpop.f32.mrb[38].mxu0  ;;  %6737 = vtanh.f32 %v7956_v3 }
 0x12f   :  { %v8130_v12 = vadd.f32 %v6419_v62, %v7796_v60  ;;  %v2096_v31 = vpop.f32.mrb[37].mxu1  ;;  %v8133_v42 = vadd.f32 %v6292_v4, %v7761_v33  ;;  %v1587_v43 = vpop.f32.mrb[39].mxu0  ;;  %v3464_v4 = vsel %vm62_vm1, %v3189_v47, 0.0  ;;  %v3854_v47 = vsel %vm62_vm1, %v3319_v57, 0.0 }
 0x130   :  { %10279 = vst [vmem:[#allocation13_spill] sm:$0xff] %v8125_v35  ;;  %v8136_v8 = vadd.f32 %v7796_v60, %v2096_v31  ;;  %v8139_v58 = vadd.f32 %v7761_v33, %v1587_v43  ;;  %v6420_v18 = vpop.f32.mrb[38].mxu1  ;;  %3465 = vadd.xlane.f32.xlu1 %v3464_v4  ;;  %v3461_v43 = vsel %vm62_vm1, %v3188_v53, 0.0  ;;  %v3318_v35 = vmul.f32 %v6718_v36, %v7892_v46 }
 0x131   :  { %v8144_v55 = vadd.f32 %v6420_v18, %v7796_v60  ;;  %v2099_v62 = vpop.f32.mrb[39].mxu1  ;;  %3462 = vadd.xlane.f32.xlu0 %v3461_v43  ;;  %6739 = vtanh.f32 %v7947_v56 }
 0x132   :  { %10280 = vst [vmem:[#allocation14_spill] sm:$0xff] %v8136_v8  ;;  %v8149_v31 = vadd.f32 %v7796_v60, %v2099_v62  ;;  %v6720_v8 = vpop.eup %6719  ;;  %v3851_v4 = vsel %vm62_vm1, %v3318_v35, 0.0  ;;  %6741 = vtanh.f32 %v7961_v22 }
 0x133   :  { %v6722_v2 = vpop.eup %6721  ;;  %v3317_v37 = vmul.f32 %v6720_v8, %v7892_v46  ;;  %6743 = vtanh.f32 %v7966_v28 }
 0x134   :  { %v6295_v20 = vpop.f32.mrb[40].mxu0  ;;  %v6724_v36 = vpop.eup %6723  ;;  %3855 = vadd.xlane.f32.xlu1 %v3854_v47  ;;  %v3316_v39 = vmul.f32 %v6722_v2, %v7892_v46  ;;  %6745 = vtanh.f32 %v7985_v7 }
 0x135   :  { %v8155_v45 = vadd.f32 %v6295_v20, %v7761_v33  ;;  %v1600_v38 = vpop.f32.mrb[41].mxu0  ;;  %v6726_v8 = vpop.eup %6725  ;;  %3852 = vadd.xlane.f32.xlu0 %v3851_v4  ;;  %6747 = vtanh.f32 %v7969_v32 }
 0x136   :  { %v6423_v18 = vpop.f32.mrb[40].mxu1  ;;  %v8160_v62 = vadd.f32 %v7761_v33, %v1600_v38  ;;  %v6296_v53 = vpop.f32.mrb[42].mxu0  ;;  %6749 = vtanh.f32 %v7990_v24 }
 0x137   :  { %v8165_v43 = vadd.f32 %v6423_v18, %v7796_v60  ;;  %v2112_v20 = vpop.f32.mrb[41].mxu1  ;;  %v8168_v41 = vadd.f32 %v6296_v53, %v7761_v33  ;;  %v1603_v57 = vpop.f32.mrb[43].mxu0  ;;  %v3848_v18 = vsel %vm62_vm1, %v3317_v37, 0.0  ;;  %v3322_v53 = vmul.f32 %v6724_v36, %v7892_v46 }
 0x138   :  { %10281 = vst [vmem:[#allocation15_spill] sm:$0xff] %v8160_v62  ;;  %v8171_v38 = vadd.f32 %v7796_v60, %v2112_v20  ;;  %v8174_v62 = vadd.f32 %v7761_v33, %v1603_v57  ;;  %v6424_v47 = vpop.f32.mrb[42].mxu1  ;;  %v6728_v20 = vpop.eup %6727  ;;  %3849 = vadd.xlane.f32.xlu1 %v3848_v18  ;;  %v3845_v57 = vsel %vm62_vm1, %v3316_v39, 0.0  ;;  %6751 = vtanh.f32 %v7975_v48 }
 0x139   :  { %v8178_v35 = vadd.f32 %v6424_v47, %v7796_v60  ;;  %v2115_v2 = vpop.f32.mrb[43].mxu1  ;;  %v6730_v16 = vpop.eup %6729  ;;  %3846 = vadd.xlane.f32.xlu0 %v3845_v57  ;;  %v3863_v36 = vsel %vm62_vm1, %v3322_v53, 0.0  ;;  %6753 = vtanh.f32 %v8000_v25 }
 0x13a   :  { %10282 = vst [vmem:[#allocation16_spill] sm:$0xff] %v8174_v62  ;;  %v8184_v4 = vadd.f32 %v7796_v60, %v2115_v2  ;;  %v3194_v62 = vmul.f32 %v6726_v8, %v7892_v46  ;;  %v3195_v2 = vmul.f32 %v6728_v20, %v7892_v46  ;;  %v3192_v56 = vmul.f32 %v6730_v16, %v7892_v46 }
 0x13b   :  { %6755 = vtanh.f32 %v7978_v49 }
 0x13c   :  { %10283 = vst [vmem:[#allocation17_spill] sm:$0xff] %v8184_v4  ;;  %v6299_v47 = vpop.f32.mrb[44].mxu0  ;;  %v6732_v4 = vpop.eup %6731  ;;  %3864 = vadd.xlane.f32.xlu1 %v3863_v36  ;;  %v3479_v57 = vsel %vm62_vm1, %v3194_v62, 0.0  ;;  %6757 = vtanh.f32 %v8005_v44 }
 0x13d   :  { %v8190_v3 = vadd.f32 %v6299_v47, %v7761_v33  ;;  %v1616_v37 = vpop.f32.mrb[45].mxu0  ;;  %v6734_v20 = vpop.eup %6733  ;;  %3480 = vadd.xlane.f32.xlu0 %v3479_v57  ;;  %6759 = vtanh.f32 %v8010_v52 }
 0x13e   :  { %v6427_v18 = vpop.f32.mrb[44].mxu1  ;;  %v8196_v39 = vadd.f32 %v7761_v33, %v1616_v37  ;;  %v6300_v8 = vpop.f32.mrb[46].mxu0  ;;  %6761 = vtanh.f32 %v8016_v9 }
 0x13f   :  { %10284 = vst [vmem:[#allocation18_spill] sm:$0xff] %v8190_v3  ;;  %v8201_v47 = vadd.f32 %v6427_v18, %v7796_v60  ;;  %v2128_v3 = vpop.f32.mrb[45].mxu1  ;;  %v8204_v22 = vadd.f32 %v6300_v8, %v7761_v33  ;;  %v1619_v53 = vpop.f32.mrb[47].mxu0  ;;  %v3482_v18 = vsel %vm62_vm1, %v3195_v2, 0.0  ;;  %v3193_v8 = vmul.f32 %v6732_v4, %v7892_v46 }
 0x140   :  { %10285 = vst [vmem:[#allocation19_spill] sm:$0xff] %v8196_v39  ;;  %v8207_v37 = vadd.f32 %v7796_v60, %v2128_v3  ;;  %v8210_v39 = vadd.f32 %v7761_v33, %v1619_v53  ;;  %v6428_v36 = vpop.f32.mrb[46].mxu1  ;;  %v6736_v3 = vpop.eup %6735  ;;  %3483 = vadd.xlane.f32.xlu1 %v3482_v18  ;;  %v3473_v53 = vsel %vm62_vm1, %v3192_v56, 0.0  ;;  %6763 = vtanh.f32 %v8013_v11 }
 0x141   :  { %v8214_v62 = vadd.f32 %v6428_v36, %v7796_v60  ;;  %v2131_v16 = vpop.f32.mrb[47].mxu1  ;;  %v6738_v28 = vpop.eup %6737  ;;  %3474 = vadd.xlane.f32.xlu0 %v3473_v53  ;;  %v3476_v4 = vsel %vm62_vm1, %v3193_v8, 0.0  ;;  %6765 = vtanh.f32 %v8026_v14 }
 0x142   :  { %10286 = vst [vmem:[#allocation20_spill] sm:$0xff] %v8210_v39  ;;  %v8220_v57 = vadd.f32 %v7796_v60, %v2131_v16  ;;  %v3320_v39 = vmul.f32 %v6734_v20, %v7892_v46  ;;  %v3323_v16 = vmul.f32 %v6736_v3, %v7892_v46  ;;  %v3198_v32 = vmul.f32 %v6738_v28, %v7892_v46 }
 0x143   :  { %6767 = vtanh.f32 %v8019_v19 }
 0x144   :  { %10287 = vst [vmem:[#allocation21_spill] sm:$0xff] %v8220_v57  ;;  %v6303_v36 = vpop.f32.mrb[48].mxu0  ;;  %v6740_v57 = vpop.eup %6739  ;;  %3477 = vadd.xlane.f32.xlu1 %v3476_v4  ;;  %v3857_v53 = vsel %vm62_vm1, %v3320_v39, 0.0  ;;  %6769 = vtanh.f32 %v8040_v17 }
 0x145   :  { %v8226_v7 = vadd.f32 %v6303_v36, %v7761_v33  ;;  %v1632_v2 = vpop.f32.mrb[49].mxu0  ;;  %v6742_v3 = vpop.eup %6741  ;;  %3858 = vadd.xlane.f32.xlu0 %v3857_v53  ;;  %6771 = vtanh.f32 %v8031_v10 }
 0x146   :  { %v6431_v18 = vpop.f32.mrb[48].mxu1  ;;  %v8232_v56 = vadd.f32 %v7761_v33, %v1632_v2  ;;  %v6304_v20 = vpop.f32.mrb[50].mxu0  ;;  %6773 = vtanh.f32 %v8045_v50 }
 0x147   :  { %10288 = vst [vmem:[#allocation22_spill] sm:$0xff] %v8226_v7  ;;  %v8237_v36 = vadd.f32 %v6431_v18, %v7796_v60  ;;  %v2144_v7 = vpop.f32.mrb[49].mxu1  ;;  %v8240_v24 = vadd.f32 %v6304_v20, %v7761_v33  ;;  %v1635_v8 = vpop.f32.mrb[51].mxu0  ;;  %v3866_v18 = vsel %vm62_vm1, %v3323_v16, 0.0  ;;  %v3321_v20 = vmul.f32 %v6740_v57, %v7892_v46 }
 0x148   :  { %10289 = vst [vmem:[#allocation23_spill] sm:$0xff] %v8232_v56  ;;  %v8243_v2 = vadd.f32 %v7796_v60, %v2144_v7  ;;  %v8246_v56 = vadd.f32 %v7761_v33, %v1635_v8  ;;  %v6432_v4 = vpop.f32.mrb[50].mxu1  ;;  %v6744_v7 = vpop.eup %6743  ;;  %3867 = vadd.xlane.f32.xlu1 %v3866_v18  ;;  %v3491_v33 = vsel %vm62_vm1, %v3198_v32, 0.0  ;;  %v3196_v8 = vmul.f32 %v6742_v3, %v7892_v46 }
 0x149   :  { %v8250_v39 = vadd.f32 %v6432_v4, %v7796_v60  ;;  %v2147_v28 = vpop.f32.mrb[51].mxu1  ;;  %v6746_v48 = vpop.eup %6745  ;;  %3492 = vadd.xlane.f32.xlu0 %v3491_v33  ;;  %v3326_v57 = vmul.f32 %v6744_v7, %v7892_v46  ;;  %6775 = vtanh.f32 %v8053_v15 }
 0x14a   :  { %v8256_v53 = vadd.f32 %v7796_v60, %v2147_v28  ;;  %v3860_v60 = vsel %vm62_vm1, %v3321_v20, 0.0  ;;  %v6748_v18 = vpop.eup %6747  ;;  %v3485_v33 = vsel %vm62_vm1, %v3196_v8, 0.0  ;;  %v3327_v49 = vmul.f32 %v6746_v48, %v7892_v46 }
 0x14b   :  { %v6750_v7 = vpop.eup %6749  ;;  %6777 = vtanh.f32 %v8050_v6 }
 0x14c   :  { %v6307_v4 = vpop.f32.mrb[52].mxu0  ;;  %3861 = vadd.xlane.f32.xlu1 %v3860_v60  ;;  %6779 = vtanh.f32 %v8059_v0 }
 0x14d   :  { %v8262_v25 = vadd.f32 %v6307_v4, %v7770_v40  ;;  %v1648_v16 = vpop.f32.mrb[53].mxu0  ;;  %3486 = vadd.xlane.f32.xlu0 %v3485_v33  ;;  %6781 = vtanh.f32 %v8056_v1 }
 0x14e   :  { %v6435_v28 = vpop.f32.mrb[52].mxu1  ;;  %v8268_v32 = vadd.f32 %v7770_v40, %v1648_v16  ;;  %v6308_v3 = vpop.f32.mrb[54].mxu0 }
 0x14f   :  { %10290 = vst [vmem:[#allocation24_spill] sm:$0xff] %v8262_v25  ;;  %v8273_v4 = vadd.f32 %v6435_v28, %v7807_v63  ;;  %v2160_v25 = vpop.f32.mrb[53].mxu1  ;;  %v8276_v44 = vadd.f32 %v6308_v3, %v7770_v40  ;;  %v1651_v20 = vpop.f32.mrb[55].mxu0  ;;  %v3875_v28 = vsel %vm62_vm1, %v3326_v57, 0.0  ;;  %v3199_v3 = vmul.f32 %v6748_v18, %v7892_v46 }
 0x150   :  { %10291 = vst [vmem:[#allocation25_spill] sm:$0xff] %v8268_v32  ;;  %v8279_v16 = vadd.f32 %v7807_v63, %v2160_v25  ;;  %v8282_v32 = vadd.f32 %v7770_v40, %v1651_v20  ;;  %v6436_v60 = vpop.f32.mrb[54].mxu1  ;;  %v6752_v25 = vpop.eup %6751  ;;  %3876 = vadd.xlane.f32.xlu1 %v3875_v28  ;;  %v3878_v20 = vsel %vm62_vm1, %v3327_v49, 0.0  ;;  %6783 = vtanh.f32 %v8066_v5 }
 0x151   :  { %v8286_v8 = vadd.f32 %v6436_v60, %v7807_v63  ;;  %v2163_v48 = vpop.f32.mrb[55].mxu1  ;;  %v6754_v52 = vpop.eup %6753  ;;  %3879 = vadd.xlane.f32.xlu0 %v3878_v20  ;;  %v3494_v18 = vsel %vm62_vm1, %v3199_v3, 0.0  ;;  %6785 = vtanh.f32 %v8080_v27 }
 0x152   :  { %10292 = vst [vmem:[#allocation26_spill] sm:$0xff] %v8282_v32  ;;  %v8292_v33 = vadd.f32 %v7807_v63, %v2163_v48  ;;  %v3325_v32 = vmul.f32 %v6750_v7, %v7892_v46  ;;  %v3324_v48 = vmul.f32 %v6752_v25, %v7892_v46  ;;  %v3202_v11 = vmul.f32 %v6754_v52, %v7892_v46 }
 0x153   :  { %10293 = vst [vmem:[#allocation27_spill] sm:$0xff] %v8286_v8 }
 0x154   :  { %10294 = vst [vmem:[#allocation28_spill] sm:$0xff] %v8292_v33  ;;  %v6311_v60 = vpop.f32.mrb[56].mxu0  ;;  %v6756_v33 = vpop.eup %6755  ;;  %3495 = vadd.xlane.f32.xlu1 %v3494_v18  ;;  %v3872_v20 = vsel %vm62_vm1, %v3325_v32, 0.0  ;;  %6787 = vtanh.f32 %v8071_v13 }
 0x155   :  { %v8298_v9 = vadd.f32 %v6311_v60, %v7770_v40  ;;  %v1664_v57 = vpop.f32.mrb[57].mxu0  ;;  %v6758_v25 = vpop.eup %6757  ;;  %3873 = vadd.xlane.f32.xlu0 %v3872_v20  ;;  %6789 = vtanh.f32 %v8085_v29 }
 0x156   :  { %v6439_v28 = vpop.f32.mrb[56].mxu1  ;;  %v8304_v49 = vadd.f32 %v7770_v40, %v1664_v57  ;;  %v6312_v7 = vpop.f32.mrb[58].mxu0 }
 0x157   :  { %v8309_v60 = vadd.f32 %v6439_v28, %v7807_v63  ;;  %v2176_v8 = vpop.f32.mrb[57].mxu1  ;;  %v8312_v14 = vadd.f32 %v6312_v7, %v7770_v40  ;;  %v1667_v3 = vpop.f32.mrb[59].mxu0  ;;  %v3869_v28 = vsel %vm62_vm1, %v3324_v48, 0.0  ;;  %v3197_v7 = vmul.f32 %v6756_v33, %v7892_v46 }
 0x158   :  { %10295 = vst [vmem:[#allocation29_spill] sm:$0xff] %v8304_v49  ;;  %v8315_v57 = vadd.f32 %v7807_v63, %v2176_v8  ;;  %v8318_v49 = vadd.f32 %v7770_v40, %v1667_v3  ;;  %v6440_v18 = vpop.f32.mrb[58].mxu1  ;;  %v6760_v8 = vpop.eup %6759  ;;  %3870 = vadd.xlane.f32.xlu1 %v3869_v28  ;;  %v3503_v3 = vsel %vm62_vm1, %v3202_v11, 0.0  ;;  %6791 = vtanh.f32 %v8093_v51 }
 0x159   :  { %v8322_v32 = vadd.f32 %v6440_v18, %v7807_v63  ;;  %v2179_v52 = vpop.f32.mrb[59].mxu1  ;;  %v6762_v19 = vpop.eup %6761  ;;  %3504 = vadd.xlane.f32.xlu0 %v3503_v3  ;;  %v3488_v33 = vsel %vm62_vm1, %v3197_v7, 0.0  ;;  %6793 = vtanh.f32 %v8090_v26 }
 0x15a   :  { %10296 = vst [vmem:[#allocation30_spill] sm:$0xff] %v8315_v57  ;;  %10297 = vst [vmem:[#allocation31_spill] sm:$0xff] %v8318_v49  ;;  %v8328_v20 = vadd.f32 %v7807_v63, %v2179_v52  ;;  %v3200_v49 = vmul.f32 %v6758_v25, %v7892_v46  ;;  %v3330_v52 = vmul.f32 %v6760_v8, %v7892_v46 }
 0x15b   :  { %10298 = vst [vmem:[#allocation32_spill] sm:$0xff] %v8322_v32  ;;  %v6764_v32 = vpop.eup %6763  ;;  %v3328_v10 = vmul.f32 %v6762_v19, %v7892_v46  ;;  %6795 = vtanh.f32 %v8099_v61 }
 0x15c   :  { %v6315_v18 = vpop.f32.mrb[60].mxu0  ;;  %3489 = vadd.xlane.f32.xlu1 %v3488_v33  ;;  %v3497_v3 = vsel %vm62_vm1, %v3200_v49, 0.0  ;;  %v6766_v8 = vpop.eup %6765  ;;  %6797 = vtanh.f32 %v8096_v23 }
 0x15d   :  { %v8334_v17 = vadd.f32 %v6315_v18, %v7770_v40  ;;  %v1680_v48 = vpop.f32.mrb[61].mxu0  ;;  %3498 = vadd.xlane.f32.xlu0 %v3497_v3 }
 0x15e   :  { %v6443_v28 = vpop.f32.mrb[60].mxu1  ;;  %v8340_v11 = vadd.f32 %v7770_v40, %v1680_v48  ;;  %v6316_v25 = vpop.f32.mrb[62].mxu0 }
 0x15f   :  { %v8345_v18 = vadd.f32 %v6443_v28, %v7807_v63  ;;  %v2192_v57 = vpop.f32.mrb[61].mxu1  ;;  %v8348_v50 = vadd.f32 %v6316_v25, %v7770_v40  ;;  %v1683_v7 = vpop.f32.mrb[63].mxu0  ;;  %v3887_v28 = vsel %vm62_vm1, %v3330_v52, 0.0  ;;  %v3203_v25 = vmul.f32 %v6764_v32, %v7892_v46 }
 0x160   :  { %10299 = vst [vmem:[#allocation33_spill] sm:$0xff] %v8340_v11  ;;  %v8351_v48 = vadd.f32 %v7807_v63, %v2192_v57  ;;  %v8354_v11 = vadd.f32 %v7770_v40, %v1683_v7  ;;  %v6444_v33 = vpop.f32.mrb[62].mxu1  ;;  %v6768_v57 = vpop.eup %6767  ;;  %3888 = vadd.xlane.f32.xlu1 %v3887_v28  ;;  %v3881_v7 = vsel %vm62_vm1, %v3328_v10, 0.0  ;;  %6799 = vtanh.f32 %v8130_v12 }
 0x161   :  { %v8358_v49 = vadd.f32 %v6444_v33, %v7807_v63  ;;  %v2195_v19 = vpop.f32.mrb[63].mxu1  ;;  %v6770_v15 = vpop.eup %6769  ;;  %3882 = vadd.xlane.f32.xlu0 %v3881_v7  ;;  %v3506_v32 = vsel %vm62_vm1, %v3203_v25, 0.0  ;;  %6801 = vtanh.f32 %v8106_v21 }
 0x162   :  { %10300 = vst [vmem:[#allocation34_spill] sm:$0xff] %v8354_v11  ;;  %v8364_v3 = vadd.f32 %v7807_v63, %v2195_v19  ;;  %v3331_v11 = vmul.f32 %v6766_v8, %v7892_v46  ;;  %v3201_v19 = vmul.f32 %v6768_v57, %v7892_v46  ;;  %v3206_v0 = vmul.f32 %v6770_v15, %v7892_v46 }
 0x164   :  { %10301 = vst [vmem:[#allocation35_spill] sm:$0xff] %v8364_v3  ;;  %v6319_v33 = vpop.f32.mrb[64].mxu0  ;;  %v6772_v3 = vpop.eup %6771  ;;  %3507 = vadd.xlane.f32.xlu1 %v3506_v32  ;;  %v3890_v7 = vsel %vm62_vm1, %v3331_v11, 0.0  ;;  %6803 = vtanh.f32 %v8133_v42 }
 0x165   :  { %v8370_v6 = vadd.f32 %v6319_v33, %v7770_v40  ;;  %v1696_v52 = vpop.f32.mrb[65].mxu0  ;;  %v6774_v57 = vpop.eup %6773  ;;  %3891 = vadd.xlane.f32.xlu0 %v3890_v7  ;;  %6805 = vtanh.f32 %v8111_v30 }
 0x166   :  { %v6447_v28 = vpop.f32.mrb[64].mxu1  ;;  %v8376_v10 = vadd.f32 %v7770_v40, %v1696_v52  ;;  %v6320_v8 = vpop.f32.mrb[66].mxu0 }
 0x167   :  { %10302 = vst [vmem:[#allocation36_spill] sm:$0xff] %v8370_v6  ;;  %v8381_v33 = vadd.f32 %v6447_v28, %v7807_v63  ;;  %v2208_v6 = vpop.f32.mrb[65].mxu1  ;;  %v8384_v1 = vadd.f32 %v6320_v8, %v7770_v40  ;;  %v1699_v25 = vpop.f32.mrb[67].mxu0  ;;  %v3500_v28 = vsel %vm62_vm1, %v3201_v19, 0.0  ;;  %v3329_v8 = vmul.f32 %v6772_v3, %v7892_v46  ;;  %v8413_v3 = vld [vmem:[%s10256_s6] ss:$0 sm:$0xff] }
 0x168   :  { %10303 = vst [vmem:[#allocation37_spill] sm:$0xff] %v8376_v10  ;;  %v8387_v52 = vadd.f32 %v7807_v63, %v2208_v6  ;;  %v8390_v10 = vadd.f32 %v7770_v40, %v1699_v25  ;;  %v6448_v32 = vpop.f32.mrb[66].mxu1  ;;  %v6776_v6 = vpop.eup %6775  ;;  %3501 = vadd.xlane.f32.xlu1 %v3500_v28  ;;  %v3515_v40 = vsel %vm62_vm1, %v3206_v0, 0.0  ;;  %v3204_v25 = vmul.f32 %v6774_v57, %v7892_v46 }
 0x169   :  { %v8394_v11 = vadd.f32 %v6448_v32, %v7807_v63  ;;  %v2211_v15 = vpop.f32.mrb[67].mxu1  ;;  %v6778_v5 = vpop.eup %6777  ;;  %3516 = vadd.xlane.f32.xlu0 %v3515_v40  ;;  %v3207_v46 = vmul.f32 %v8413_v3, %v6776_v6  ;;  %6807 = vtanh.f32 %v8139_v58 }
 0x16a   :  { %v8400_v7 = vadd.f32 %v7807_v63, %v2211_v15  ;;  %v3884_v63 = vsel %vm62_vm1, %v3329_v8, 0.0  ;;  %v6780_v15 = vpop.eup %6779  ;;  %v3509_v28 = vsel %vm62_vm1, %v3204_v25, 0.0  ;;  %v3334_v29 = vmul.f32 %v8413_v3, %v6778_v5 }
 0x16b   :  { %v6782_v6 = vpop.eup %6781  ;;  %6809 = vtanh.f32 %v8120_v59 }
 0x16c   :  { %v6323_v32 = vpop.f32.mrb[68].mxu0  ;;  %3885 = vadd.xlane.f32.xlu1 %v3884_v63  ;;  %6811 = vtanh.f32 %v8144_v55 }
 0x16d   :  { %v8406_v27 = vadd.f32 %v6323_v32, %v7764_v34  ;;  %v1712_v19 = vpop.f32.mrb[69].mxu0  ;;  %3510 = vadd.xlane.f32.xlu0 %v3509_v28 }
 0x16e   :  { %v6451_v0 = vpop.f32.mrb[68].mxu1  ;;  %v8417_v57 = vadd.f32 %v7764_v34, %v1712_v19  ;;  %v6324_v13 = vpop.f32.mrb[70].mxu0 }
 0x16f   :  { %10304 = vst [vmem:[#allocation38_spill] sm:$0xff] %v8406_v27  ;;  %v8422_v8 = vadd.f32 %v6451_v0, %v7789_v54  ;;  %v2224_v40 = vpop.f32.mrb[69].mxu1  ;;  %v8425_v32 = vadd.f32 %v6324_v13, %v7764_v34  ;;  %v1715_v27 = vpop.f32.mrb[71].mxu0  ;;  %v3518_v0 = vsel %vm62_vm1, %v3207_v46, 0.0  ;;  %v3205_v13 = vmul.f32 %v8413_v3, %v6780_v15 }
 0x170   :  { %10305 = vst [vmem:[#allocation39_spill] sm:$0xff] %v8417_v57  ;;  %v8428_v19 = vadd.f32 %v7789_v54, %v2224_v40  ;;  %v8431_v57 = vadd.f32 %v7764_v34, %v1715_v27  ;;  %v6452_v63 = vpop.f32.mrb[70].mxu1  ;;  %v6784_v40 = vpop.eup %6783  ;;  %3519 = vadd.xlane.f32.xlu1 %v3518_v0  ;;  %v3899_v27 = vsel %vm62_vm1, %v3334_v29, 0.0 }
 0x171   :  { %v8435_v25 = vadd.f32 %v6452_v63, %v7789_v54  ;;  %v2227_v5 = vpop.f32.mrb[71].mxu1  ;;  %v6786_v51 = vpop.eup %6785  ;;  %3900 = vadd.xlane.f32.xlu0 %v3899_v27  ;;  %v3512_v15 = vsel %vm62_vm1, %v3205_v13, 0.0 }
 0x172   :  { %10306 = vst [vmem:[#allocation40_spill] sm:$0xff] %v8431_v57  ;;  %v8441_v28 = vadd.f32 %v7789_v54, %v2227_v5  ;;  %v3332_v57 = vmul.f32 %v8413_v3, %v6782_v6  ;;  %v3335_v5 = vmul.f32 %v8413_v3, %v6784_v40  ;;  %v3210_v61 = vmul.f32 %v8413_v3, %v6786_v51 }
 0x173   :  { %10307 = vst [vmem:[#allocation41_spill] sm:$0xff] %v8435_v25 }
 0x174   :  { %10308 = vst [vmem:[#allocation42_spill] sm:$0xff] %v8441_v28  ;;  %v6327_v63 = vpop.f32.mrb[72].mxu0  ;;  %v6788_v28 = vpop.eup %6787  ;;  %3513 = vadd.xlane.f32.xlu1 %v3512_v15  ;;  %v3893_v27 = vsel %vm62_vm1, %v3332_v57, 0.0 }
 0x175   :  { %v8447_v26 = vadd.f32 %v6327_v63, %v7764_v34  ;;  %v1728_v46 = vpop.f32.mrb[73].mxu0  ;;  %v6790_v40 = vpop.eup %6789  ;;  %3894 = vadd.xlane.f32.xlu0 %v3893_v27 }
 0x176   :  { %v6455_v0 = vpop.f32.mrb[72].mxu1  ;;  %v8453_v29 = vadd.f32 %v7764_v34, %v1728_v46  ;;  %v6328_v6 = vpop.f32.mrb[74].mxu0 }
 0x177   :  { %10309 = vst [vmem:[#allocation43_spill] sm:$0xff] %v8447_v26  ;;  %v8458_v63 = vadd.f32 %v6455_v0, %v7789_v54  ;;  %v2240_v26 = vpop.f32.mrb[73].mxu1  ;;  %v8461_v23 = vadd.f32 %v6328_v6, %v7764_v34  ;;  %v1731_v13 = vpop.f32.mrb[75].mxu0  ;;  %v3902_v0 = vsel %vm62_vm1, %v3335_v5, 0.0  ;;  %v3333_v6 = vmul.f32 %v8413_v3, %v6788_v28 }
 0x178   :  { %10310 = vst [vmem:[#allocation44_spill] sm:$0xff] %v8453_v29  ;;  %v8464_v46 = vadd.f32 %v7789_v54, %v2240_v26  ;;  %v8467_v29 = vadd.f32 %v7764_v34, %v1731_v13  ;;  %v6456_v15 = vpop.f32.mrb[74].mxu1  ;;  %v6792_v26 = vpop.eup %6791  ;;  %3903 = vadd.xlane.f32.xlu1 %v3902_v0  ;;  %v3527_v13 = vsel %vm62_vm1, %v3210_v61, 0.0 }
 0x179   :  { %10311 = vst [vmem:[#allocation45_spill] sm:$0xff] %v8458_v63  ;;  %10312 = vst [vmem:[#allocation46_spill] sm:$0xff] %v8461_v23  ;;  %v8471_v57 = vadd.f32 %v6456_v15, %v7789_v54  ;;  %v2243_v51 = vpop.f32.mrb[75].mxu1  ;;  %v3208_v63 = vmul.f32 %v8413_v3, %v6790_v40  ;;  %v6794_v12 = vpop.eup %6793  ;;  %3528 = vadd.xlane.f32.xlu0 %v3527_v13  ;;  %v3896_v28 = vsel %vm62_vm1, %v3333_v6, 0.0 }
 0x17a   :  { %10313 = vst [vmem:[#allocation47_spill] sm:$0xff] %v8464_v46  ;;  %10314 = vst [vmem:[#allocation48_spill] sm:$0xff] %v8467_v29  ;;  %v8477_v27 = vadd.f32 %v7789_v54, %v2243_v51  ;;  %v3211_v51 = vmul.f32 %v8413_v3, %v6792_v26  ;;  %v3338_v42 = vmul.f32 %v8413_v3, %v6794_v12 }
 0x17b   :  { %10315 = vst [vmem:[#allocation49_spill] sm:$0xff] %v8471_v57  ;;  %v3521_v13 = vsel %vm62_vm1, %v3208_v63, 0.0 }
 0x17c   :  { %10316 = vst [vmem:[#allocation50_spill] sm:$0xff] %v8477_v27  ;;  %v6331_v15 = vpop.f32.mrb[76].mxu0  ;;  %v6796_v27 = vpop.eup %6795  ;;  %3897 = vadd.xlane.f32.xlu1 %v3896_v28 }
 0x17d   :  { %v8483_v21 = vadd.f32 %v6331_v15, %v7764_v34  ;;  %v1744_v5 = vpop.f32.mrb[77].mxu0  ;;  %v6798_v26 = vpop.eup %6797  ;;  %3522 = vadd.xlane.f32.xlu0 %v3521_v13 }
 0x17e   :  { %v6459_v0 = vpop.f32.mrb[76].mxu1  ;;  %v8489_v61 = vadd.f32 %v7764_v34, %v1744_v5  ;;  %v6332_v40 = vpop.f32.mrb[78].mxu0 }
 0x17f   :  { %10317 = vst [vmem:[#allocation51_spill] sm:$0xff] %v8483_v21  ;;  %v8494_v15 = vadd.f32 %v6459_v0, %v7789_v54  ;;  %v2256_v21 = vpop.f32.mrb[77].mxu1  ;;  %v8497_v30 = vadd.f32 %v6332_v40, %v7764_v34  ;;  %v1747_v6 = vpop.f32.mrb[79].mxu0  ;;  %v3530_v0 = vsel %vm62_vm1, %v3211_v51, 0.0  ;;  %v3209_v40 = vmul.f32 %v8413_v3, %v6796_v27 }
 0x180   :  { %10318 = vst [vmem:[#allocation52_spill] sm:$0xff] %v8489_v61  ;;  %v8500_v5 = vadd.f32 %v7789_v54, %v2256_v21  ;;  %v8503_v61 = vadd.f32 %v7764_v34, %v1747_v6  ;;  %v6460_v28 = vpop.f32.mrb[78].mxu1  ;;  %v6800_v21 = vpop.eup %6799  ;;  %3531 = vadd.xlane.f32.xlu1 %v3530_v0  ;;  %v3911_v6 = vsel %vm62_vm1, %v3338_v42, 0.0 }
 0x181   :  { %10319 = vst [vmem:[#allocation53_spill] sm:$0xff] %v8494_v15  ;;  %10320 = vst [vmem:[#allocation54_spill] sm:$0xff] %v8497_v30  ;;  %v8507_v63 = vadd.f32 %v6460_v28, %v7789_v54  ;;  %v2259_v12 = vpop.f32.mrb[79].mxu1  ;;  %v6802_v58 = vpop.eup %6801  ;;  %3912 = vadd.xlane.f32.xlu0 %v3911_v6  ;;  %v3524_v27 = vsel %vm62_vm1, %v3209_v40, 0.0  ;;  %v10365_v15 = vld [vmem:[#allocation23_spill] sm:$0xff] }
 0x182   :  { %10321 = vst [vmem:[#allocation55_spill] sm:$0xff] %v8500_v5  ;;  %10322 = vst [vmem:[#allocation56_spill] sm:$0xff] %v8503_v61  ;;  %v8513_v13 = vadd.f32 %v7789_v54, %v2259_v12  ;;  %v3336_v61 = vmul.f32 %v8413_v3, %v6798_v26  ;;  %v3342_v12 = vmul.f32 %v8413_v3, %v6800_v21  ;;  %v10330_v5 = vld [vmem:[#allocation14_spill] sm:$0xff] }
 0x183   :  { %10323 = vst [vmem:[#allocation57_spill] sm:$0xff] %v8507_v63  ;;  %v10326_v63 = vld [vmem:[#allocation13_spill] sm:$0xff]  ;;  %v3339_v55 = vmul.f32 %v8413_v3, %v6802_v58 }
 0x184   :  { %10324 = vst [vmem:[#allocation58_spill] sm:$0xff] %v8513_v13  ;;  %v6335_v28 = vpop.f32.mrb[80].mxu0  ;;  %6813 = vtanh.f32 %v10326_v63  ;;  %v6804_v13 = vpop.eup %6803  ;;  %3525 = vadd.xlane.f32.xlu1 %v3524_v27  ;;  %v3905_v6 = vsel %vm62_vm1, %v3336_v61, 0.0 }
 0x185   :  { %v8519_v59 = vadd.f32 %v6335_v28, %v7764_v34  ;;  %v1760_v51 = vpop.f32.mrb[81].mxu0  ;;  %v6806_v21 = vpop.eup %6805  ;;  %6815 = vtanh.f32 %v10330_v5  ;;  %3906 = vadd.xlane.f32.xlu0 %v3905_v6  ;;  %v3215_v5 = vmul.f32 %v8413_v3, %v6804_v13 }
 0x186   :  { %v6463_v0 = vpop.f32.mrb[80].mxu1  ;;  %v8525_v42 = vadd.f32 %v7764_v34, %v1760_v51  ;;  %v6336_v26 = vpop.f32.mrb[82].mxu0  ;;  %6817 = vtanh.f32 %v8149_v31  ;;  %v3337_v31 = vmul.f32 %v8413_v3, %v6806_v21 }
 0x187   :  { %10325 = vst [vmem:[#allocation59_spill] sm:$0xff] %v8519_v59  ;;  %v8530_v28 = vadd.f32 %v6463_v0, %v7789_v54  ;;  %v2272_v59 = vpop.f32.mrb[81].mxu1  ;;  %v8533_v63 = vadd.f32 %v6336_v26, %v7764_v34  ;;  %v1763_v40 = vpop.f32.mrb[83].mxu0  ;;  %6819 = vtanh.f32 %v8155_v45  ;;  %v3923_v26 = vsel %vm62_vm1, %v3342_v12, 0.0  ;;  %v10336_v12 = vld [vmem:[#allocation7_spill] sm:$0xff] }
 0x188   :  { %10327 = vst [vmem:[#allocation13_spill] sm:$0xff] %v8525_v42  ;;  %v8537_v51 = vadd.f32 %v7789_v54, %v2272_v59  ;;  %v8540_v27 = vadd.f32 %v7764_v34, %v1763_v40  ;;  %v6464_v61 = vpop.f32.mrb[82].mxu1  ;;  %v6808_v59 = vpop.eup %6807  ;;  %6821 = vtanh.f32 %v8165_v43  ;;  %3924 = vadd.xlane.f32.xlu1 %v3923_v26  ;;  %v3914_v34 = vsel %vm62_vm1, %v3339_v55, 0.0 }
 0x189   :  { %10328 = vst [vmem:[#allocation60_spill] sm:$0xff] %v8530_v28  ;;  %10329 = vst [vmem:[#allocation61_spill] sm:$0xff] %v8533_v63  ;;  %v8544_v58 = vadd.f32 %v6464_v61, %v7789_v54  ;;  %v2275_v0 = vpop.f32.mrb[83].mxu1  ;;  %v6810_v40 = vpop.eup %6809  ;;  %v10335_v61 = vld [vmem:[#allocation15_spill] sm:$0xff]  ;;  %3915 = vadd.xlane.f32.xlu0 %v3914_v34  ;;  %v3542_v43 = vsel %vm62_vm1, %v3215_v5, 0.0  ;;  %v3908_v34 = vsel %vm62_vm1, %v3337_v31, 0.0 }
 0x18a   :  { %10331 = vst [vmem:[#allocation14_spill] sm:$0xff] %v8537_v51  ;;  %10332 = vst [vmem:[#allocation62_spill] sm:$0xff] %v8540_v27  ;;  %v8550_v6 = vadd.f32 %v7789_v54, %v2275_v0  ;;  %6823 = vtanh.f32 %v10335_v61  ;;  %v3213_v0 = vmul.f32 %v8413_v3, %v6808_v59  ;;  %v6812_v61 = vpop.eup %6811  ;;  %v10342_v27 = vld [vmem:[#allocation16_spill] sm:$0xff] }
 0x18b   :  { %10333 = vst [vmem:[#allocation63_spill] sm:$0xff] %v8544_v58  ;;  %6825 = vtanh.f32 %v8171_v38  ;;  %v3214_v38 = vmul.f32 %v8413_v3, %v6810_v40  ;;  %v10345_v40 = vlaneseq }
 0x18c   :  { %10334 = vst [vmem:[#allocation64_spill] sm:$0xff] %v8550_v6  ;;  %v6339_v45 = vpop.f32.mrb[84].mxu0  ;;  %6827 = vtanh.f32 %v8168_v41  ;;  %3543 = vadd.xlane.f32.xlu1 %v3542_v43 }
 0x18d   :  { %v8558_v13 = vadd.f32 %v6339_v45, %v10336_v12  ;;  %v1776_v54 = vpop.f32.mrb[85].mxu0  ;;  %v10339_v45 = vld [vmem:[#allocation9_spill] sm:$0xff]  ;;  %6829 = vtanh.f32 %v10342_v27  ;;  %3909 = vadd.xlane.f32.xlu0 %v3908_v34  ;;  %v3536_v27 = vsel %vm62_vm1, %v3213_v0, 0.0 }
 0x18e   :  { %v6467_v55 = vpop.f32.mrb[84].mxu1  ;;  %v8564_v21 = vadd.f32 %v10336_v12, %v1776_v54  ;;  %v6340_v26 = vpop.f32.mrb[86].mxu0  ;;  %6831 = vtanh.f32 %v8178_v35  ;;  %v3539_v35 = vsel %vm62_vm1, %v3214_v38, 0.0 }
 0x18f   :  { %10337 = vst [vmem:[#allocation15_spill] sm:$0xff] %v8558_v13  ;;  %v8569_v6 = vadd.f32 %v6467_v55, %v10339_v45  ;;  %v2288_v13 = vpop.f32.mrb[85].mxu1  ;;  %v8572_v41 = vadd.f32 %v6340_v26, %v10336_v12  ;;  %v1779_v5 = vpop.f32.mrb[87].mxu0  ;;  %v8583_v55 = vand.u32 127, %v10345_v40 }
 0x190   :  { %10338 = vst [vmem:[#allocation7_spill] sm:$0xff] %v8564_v21  ;;  %v6814_v59 = vpop.eup %6813  ;;  %v8576_v54 = vadd.f32 %v10339_v45, %v2288_v13  ;;  %v6468_v43 = vpop.f32.mrb[86].mxu1  ;;  %v8579_v31 = vadd.f32 %v10336_v12, %v1779_v5  ;;  %v10348_v21 = vld [vmem:[#allocation17_spill] sm:$0xff]  ;;  %v3343_v13 = vmul.f32 %v8413_v3, %v6812_v61  ;;  %3537 = vadd.xlane.f32.xlu1 %v3536_v27  ;;  %v10351_v61 = vld [vmem:[#allocation19_spill] sm:$0xff] }
 0x191   :  { %10340 = vst [vmem:[#allocation9_spill] sm:$0xff] %v8569_v6  ;;  %10341 = vst [vmem:[#allocation65_spill] sm:$0xff] %v8572_v41  ;;  %v8586_v26 = vadd.f32 %v6468_v43, %v10339_v45  ;;  %v2291_v41 = vpop.f32.mrb[87].mxu1  ;;  %v6816_v6 = vpop.eup %6815  ;;  %6833 = vtanh.f32 %v10348_v21  ;;  %v3212_v43 = vmul.f32 %v8413_v3, %v6814_v59  ;;  %3540 = vadd.xlane.f32.xlu0 %v3539_v35 }
 0x192   :  { %10343 = vst [vmem:[#allocation16_spill] sm:$0xff] %v8576_v54  ;;  %10344 = vst [vmem:[#allocation66_spill] sm:$0xff] %v8579_v31  ;;  %v8592_v34 = vadd.f32 %v10339_v45, %v2291_v41  ;;  %v6818_v5 = vpop.eup %6817  ;;  %v10350_v31 = vld [vmem:[#allocation18_spill] sm:$0xff]  ;;  %v8598_v54 = vpop.xlane.xlu1 %3444  ;;  %v4475_v41 = vadd.s32 4294967280, %v8583_v55 }
 0x193   :  { %10346 = vst [vmem:[#allocation67_spill] sm:$0xff] %v8583_v55  ;;  %10347 = vst [vmem:[#allocation68_spill] sm:$0xff] %v8586_v26  ;;  %6835 = vtanh.f32 %v10350_v31  ;;  %v6820_v40 = vpop.eup %6819  ;;  %v3341_v59 = vmul.f32 %v8413_v3, %v6818_v5 }
 0x194   :  { %10349 = vst [vmem:[#allocation17_spill] sm:$0xff] %v8592_v34  ;;  %6837 = vtanh.f32 %v8201_v47  ;;  %v6343_v0 = vpop.f32.mrb[88].mxu0  ;;  %v6822_v21 = vpop.eup %6821  ;;  %v3926_v47 = vsel %vm62_vm1, %v3343_v13, 0.0 }
 0x195   :  { %6839 = vtanh.f32 %v10351_v61  ;;  %v8602_v34 = vpop.xlane.xlu0 %3438  ;;  %v8605_v31 = vadd.f32 %v6343_v0, %v10336_v12  ;;  %v1792_v38 = vpop.f32.mrb[89].mxu0  ;;  %3927 = vadd.xlane.f32.xlu1 %v3926_v47  ;;  %v3533_v0 = vsel %vm62_vm1, %v3212_v43, 0.0 }
 0x196   :  { %v8607_v27 = vpop.eup %6823  ;;  %6841 = vtanh.f32 %v8207_v37  ;;  %v6471_v35 = vpop.f32.mrb[88].mxu1  ;;  %v8613_v26 = vadd.f32 %v10336_v12, %v1792_v38  ;;  %v4482_v38 = vadd.s32 4294967272, %v8583_v55  ;;  %3534 = vadd.xlane.f32.xlu0 %v3533_v0  ;;  %v3920_v0 = vsel %vm62_vm1, %v3341_v59, 0.0  ;;  %v10363_v59 = vld [vmem:[#allocation22_spill] sm:$0xff] }
 0x197   :  { %10352 = vst [vmem:[#allocation18_spill] sm:$0xff] %v8605_v31  ;;  %v6344_v61 = vpop.f32.mrb[90].mxu0  ;;  %v8615_v58 = vpop.eup %6825  ;;  %v3340_v31 = vmul.f32 %v8413_v3, %v6816_v6  ;;  %v8620_v51 = vadd.f32 %v6471_v35, %v10339_v45  ;;  %6843 = vtanh.f32 %v8204_v22  ;;  %v10358_v35 = vld [vmem:[#allocation20_spill] sm:$0xff] }
 0x198   :  { %10353 = vst [vmem:[#allocation19_spill] sm:$0xff] %v8613_v26  ;;  %v2304_v37 = vpop.f32.mrb[89].mxu1  ;;  %v8623_v13 = vadd.f32 %v6344_v61, %v10336_v12  ;;  %v1795_v5 = vpop.f32.mrb[91].mxu0  ;;  %6845 = vtanh.f32 %v10358_v35  ;;  %v10361_v35 = vld [vmem:[#allocation21_spill] sm:$0xff] }
 0x199   :  { %10354 = vst [vmem:[#allocation69_spill] sm:$0xff] %v8620_v51  ;;  %v6828_v28 = vpop.eup %6827  ;;  %v8627_v26 = vpop.xlane.xlu1 %3447  ;;  %v8630_v43 = vadd.f32 %v10339_v45, %v2304_v37  ;;  %v8633_v47 = vadd.f32 %v10336_v12, %v1795_v5  ;;  %v4468_v51 = vadd.s32 4294967288, %v8583_v55  ;;  %6847 = vtanh.f32 %v8214_v62  ;;  %3921 = vadd.xlane.f32.xlu1 %v3920_v0 }
 0x19a   :  { %10355 = vst [vmem:[#allocation70_spill] sm:$0xff] %v8623_v13  ;;  %v6472_v6 = vpop.f32.mrb[90].mxu1  ;;  %v8636_v61 = vpop.xlane.xlu0 %3822  ;;  %v3346_v37 = vmul.f32 %v8413_v3, %v6822_v21  ;;  %6849 = vtanh.f32 %v10361_v35 }
 0x19b   :  { %10356 = vst [vmem:[#allocation71_spill] sm:$0xff] %v8630_v43  ;;  %10357 = vst [vmem:[#allocation72_spill] sm:$0xff] %v8633_v47  ;;  %v8640_v22 = vadd.f32 %v6472_v6, %v10339_v45  ;;  %v2307_v13 = vpop.f32.mrb[91].mxu1  ;;  %v6830_v63 = vpop.eup %6829  ;;  %v10362_v47 = vld [vmem:[#allocation6_spill] sm:$0xff]  ;;  %v3917_v6 = vsel %vm62_vm1, %v3340_v31, 0.0  ;;  %6851 = vtanh.f32 %v10363_v59 }
 0x19c   :  { %v8646_v5 = vadd.f32 %v10339_v45, %v2307_v13  ;;  %v8648_v43 = vpop.eup %6831  ;;  %v8652_v42 = vsub.s32 %v4475_v41, %v10362_v47  ;;  %v8661_v21 = vsub.s32 %v8583_v55, %v10362_v47  ;;  %v8664_v13 = vsub.s32 %v4482_v38, %v10362_v47  ;;  %3918 = vadd.xlane.f32.xlu0 %v3917_v6  ;;  %v6347_v0 = vpop.f32.mrb[92].mxu0 }
 0x19d   :  { %10359 = vst [vmem:[#allocation20_spill] sm:$0xff] %v8640_v22  ;;  %v3218_v22 = vmul.f32 %v8413_v3, %v6820_v40  ;;  %v8656_v62 = vpop.eup %6833  ;;  %v8666_v35 = vpop.xlane.xlu1 %3831  ;;  %v3219_v41 = vmul.f32 %v8413_v3, %v6828_v28  ;;  %6853 = vtanh.f32 %v8237_v36  ;;  %v8673_v59 = vsub.s32 %v4468_v51, %v10362_v47 }
 0x19e   :  { %10360 = vst [vmem:[#allocation73_spill] sm:$0xff] %v8646_v5  ;;  %v8669_v31 = vpop.eup %6835  ;;  %v3829_v40 = vpop.xlane.xlu0 %3828  ;;  %v8676_v5 = vadd.f32 %v6347_v0, %v10336_v12  ;;  %6855 = vtanh.f32 %v10365_v15  ;;  %v3935_v28 = vsel %vm62_vm1, %v3346_v37, 0.0  ;;  %v3216_v0 = vmul.f32 %v8413_v3, %v8607_v27 }
 0x19f   :  { %v1808_v38 = vpop.f32.mrb[93].mxu0  ;;  %v8678_v30 = vpop.eup %6837  ;;  %3936 = vadd.xlane.f32.xlu1 %v3935_v28  ;;  %v3551_v51 = vsel %vm62_vm1, %v3218_v22, 0.0  ;;  %v3217_v28 = vmul.f32 %v8413_v3, %v6830_v63  ;;  %6857 = vtanh.f32 %v8243_v2 }
 0x1a0   :  { %10364 = vst [vmem:[#allocation21_spill] sm:$0xff] %v8676_v5  ;;  %v6475_v6 = vpop.f32.mrb[92].mxu1  ;;  %v8683_v57 = vadd.f32 %v10336_v12, %v1808_v38  ;;  %v6348_v36 = vpop.f32.mrb[94].mxu0  ;;  %3552 = vadd.xlane.f32.xlu0 %v3551_v51  ;;  %v3344_v51 = vmul.f32 %v8413_v3, %v8615_v58  ;;  %v4479_v58 = vrot.slane %v8598_v54, %v8652_v42  ;;  %6859 = vtanh.f32 %v8240_v24 }
 0x1a1   :  { %v8685_v29 = vpop.eup %6839  ;;  %v8691_v5 = vadd.f32 %v6475_v6, %v10339_v45  ;;  %v2320_v15 = vpop.f32.mrb[93].mxu1  ;;  %v8694_v37 = vadd.f32 %v6348_v36, %v10336_v12  ;;  %v5129_v36 = vrot.slane %v8636_v61, %v8661_v21  ;;  %v3548_v2 = vsel %vm62_vm1, %v3217_v28, 0.0 }
 0x1a2   :  { %10366 = vst [vmem:[#allocation6_spill] sm:$0xff] %v8683_v57  ;;  %v1811_v46 = vpop.f32.mrb[95].mxu0  ;;  %v8696_v25 = vpop.eup %6841  ;;  %v3554_v57 = vsel %vm62_vm1, %v3219_v41, 0.0  ;;  %v8701_v22 = vadd.f32 %v10339_v45, %v2320_v15  ;;  %v4467_v15 = vrot.slane %v8602_v34, %v8661_v21  ;;  %v4486_v34 = vrot.slane %v8627_v26, %v8664_v13 }
 0x1a3   :  { %10367 = vst [vmem:[#allocation22_spill] sm:$0xff] %v8691_v5  ;;  %10368 = vst [vmem:[#allocation23_spill] sm:$0xff] %v8694_v37  ;;  %v3826_v38 = vpop.xlane.xlu1 %3825  ;;  %v6476_v27 = vpop.f32.mrb[94].mxu1  ;;  %v8704_v6 = vadd.f32 %v10336_v12, %v1811_v46  ;;  %v5138_v46 = vrot.slane %v3829_v40, %v8652_v42  ;;  %3555 = vadd.xlane.f32.xlu1 %v3554_v57  ;;  %v5143_v57 = vrot.slane %v8666_v35, %v8664_v13 }
 0x1a4   :  { %10369 = vst [vmem:[#allocation74_spill] sm:$0xff] %v8701_v22  ;;  %v5133_v5 = vrot.slane %v3826_v38, %v8673_v59  ;;  %v3442_v37 = vpop.xlane.xlu0 %3441  ;;  %v8712_v41 = vadd.f32 %v6476_v27, %v10339_v45  ;;  %v2323_v63 = vpop.f32.mrb[95].mxu1  ;;  %6861 = vtanh.f32 %v8246_v56 }
 0x1a5   :  { %10370 = vst [vmem:[#allocation75_spill] sm:$0xff] %v8704_v6  ;;  %v6844_v23 = vpop.eup %6843  ;;  %v4472_v22 = vrot.slane %v3442_v37, %v8673_v59  ;;  %v8719_v61 = vadd.f32 %v10339_v45, %v2323_v63  ;;  %v6351_v54 = vpop.f32.mrb[96].mxu0  ;;  %6863 = vtanh.f32 %v8250_v39 }
 0x1a6   :  { %10371 = vst [vmem:[#allocation76_spill] sm:$0xff] %v8712_v41  ;;  %v8721_v38 = vpop.eup %6845  ;;  %v5134_v27 = vsel %vm4473_vm3, %v5133_v5, %v5129_v36  ;;  %v3545_v41 = vsel %vm62_vm1, %v3216_v0, 0.0  ;;  %v8745_v26 = vadd.f32 %v6351_v54, %v10336_v12  ;;  %v3345_v54 = vmul.f32 %v8413_v3, %v8656_v62 }
 0x1a7   :  { %10372 = vst [vmem:[#allocation77_spill] sm:$0xff] %v8719_v61  ;;  %v8727_v6 = vpop.eup %6847  ;;  %v5139_v40 = vsel %vm4480_vm4, %v5138_v46, %v5134_v27  ;;  %v4474_v37 = vsel %vm4473_vm3, %v4472_v22, %v4467_v15  ;;  %v8734_v63 = vpop.xlane.xlu1 %3813  ;;  %3546 = vadd.xlane.f32.xlu0 %v3545_v41  ;;  %v3929_v41 = vsel %vm62_vm1, %v3344_v51, 0.0  ;;  %v3347_v15 = vmul.f32 %v8413_v3, %v8648_v43 }
 0x1a8   :  { %10373 = vst [vmem:[#allocation78_spill] sm:$0xff] %v8734_v63  ;;  %v8736_v5 = vpop.eup %6849  ;;  %v4481_v0 = vsel %vm4480_vm4, %v4479_v58, %v4474_v37  ;;  %v8741_v36 = vpop.xlane.xlu0 %3810  ;;  %10375 = vst [vmem:[#allocation80_spill] sm:$0xff] %v8745_v26  ;;  %3549 = vadd.xlane.f32.xlu1 %v3548_v2  ;;  %v3932_v56 = vsel %vm62_vm1, %v3345_v54, 0.0  ;;  %6865 = vtanh.f32 %v8256_v53  ;;  %v10386_v54 = vld [vmem:[#allocation8_spill] sm:$0xff] }
 0x1a9   :  { %10374 = vst [vmem:[#allocation79_spill] sm:$0xff] %v8741_v36  ;;  %v1824_v46 = vpop.f32.mrb[97].mxu0  ;;  %v8747_v22 = vpop.eup %6851  ;;  %v8756_v37 = vsel %vm4487_vm5, %v4486_v34, %v4481_v0 }
 0x1aa   :  { %v6479_v27 = vpop.f32.mrb[96].mxu1  ;;  %v8753_v35 = vadd.f32 %v10336_v12, %v1824_v46  ;;  %v6352_v58 = vpop.f32.mrb[98].mxu0  ;;  %v8769_v46 = vsel %vm4487_vm5, %v5143_v57, %v5139_v40  ;;  %v3223_v40 = vmul.f32 %v8413_v3, %v6844_v23  ;;  %v3222_v23 = vmul.f32 %v8413_v3, %v8669_v31 }
 0x1ab   :  { %v8758_v28 = vpop.eup %6853  ;;  %v8763_v63 = vadd.f32 %v6479_v27, %v10339_v45  ;;  %v2336_v51 = vpop.f32.mrb[97].mxu1  ;;  %v8766_v43 = vadd.f32 %v6352_v58, %v10336_v12  ;;  %3930 = vadd.xlane.f32.xlu0 %v3929_v41  ;;  %v3938_v58 = vsel %vm62_vm1, %v3347_v15, 0.0  ;;  %v4496_v41 = vadd.s32 4294967256, %v8583_v55 }
 0x1ac   :  { %10376 = vst [vmem:[#allocation81_spill] sm:$0xff] %v8753_v35  ;;  %v1827_v36 = vpop.f32.mrb[99].mxu0  ;;  %v8771_v35 = vpop.eup %6855  ;;  %v8777_v62 = vadd.f32 %v10339_v45, %v2336_v51  ;;  %v4489_v51 = vadd.s32 4294967264, %v8583_v55  ;;  %3939 = vadd.xlane.f32.xlu1 %v3938_v58  ;;  %v3566_v39 = vsel %vm62_vm1, %v3223_v40, 0.0 }
 0x1ad   :  { %10377 = vst [vmem:[#allocation82_spill] sm:$0xff] %v8763_v63  ;;  %10378 = vst [vmem:[#allocation83_spill] sm:$0xff] %v8766_v43  ;;  %v8774_v34 = vpop.xlane.xlu1 %3819  ;;  %v6480_v0 = vpop.f32.mrb[98].mxu1  ;;  %v8780_v2 = vadd.f32 %v10336_v12, %v1827_v36  ;;  %v4503_v36 = vadd.s32 4294967248, %v8583_v55  ;;  %v8814_v53 = vsub.s32 %v4496_v41, %v10362_v47 }
 0x1ae   :  { %10379 = vst [vmem:[#allocation84_spill] sm:$0xff] %v8774_v34  ;;  %10380 = vst [vmem:[#allocation85_spill] sm:$0xff] %v8777_v62  ;;  %v8783_v27 = vpop.xlane.xlu0 %3816  ;;  %v8787_v57 = vadd.f32 %v6480_v0, %v10339_v45  ;;  %v2339_v24 = vpop.f32.mrb[99].mxu1  ;;  %v10385_v0 = vld [vmem:[#allocation24_spill] sm:$0xff] }
 0x1af   :  { %10381 = vst [vmem:[#allocation86_spill] sm:$0xff] %v8780_v2  ;;  %10382 = vst [vmem:[#allocation87_spill] sm:$0xff] %v8783_v27  ;;  %v8793_v34 = vadd.f32 %v10339_v45, %v2339_v24  ;;  %3933 = vadd.xlane.f32.xlu0 %v3932_v56  ;;  %v6355_v15 = vpop.f32.mrb[100].mxu0  ;;  %6867 = vtanh.f32 %v10385_v0  ;;  %v4510_v45 = vadd.s32 4294967240, %v8583_v55  ;;  %v8811_v27 = vpop.eup %6857  ;;  %v8817_v56 = vsub.s32 %v4489_v51, %v10362_v47 }
 0x1b0   :  { %10383 = vst [vmem:[#allocation88_spill] sm:$0xff] %v8787_v57  ;;  %v8809_v58 = vadd.f32 %v6355_v15, %v10386_v54  ;;  %v1840_v31 = vpop.f32.mrb[101].mxu0  ;;  %v3221_v0 = vmul.f32 %v8413_v3, %v8721_v38  ;;  %v6483_v57 = vpop.f32.mrb[100].mxu1  ;;  %3567 = vadd.xlane.f32.xlu1 %v3566_v39  ;;  %v3563_v15 = vsel %vm62_vm1, %v3222_v23, 0.0  ;;  %6869 = vtanh.f32 %v8273_v4 }
 0x1b1   :  { %10384 = vst [vmem:[#allocation89_spill] sm:$0xff] %v8793_v34  ;;  %v8800_v12 = vpop.xlane.xlu1 %3459  ;;  %v8822_v62 = vadd.f32 %v10386_v54, %v1840_v31  ;;  %v6356_v40 = vpop.f32.mrb[102].mxu0  ;;  %v10389_v34 = vld [vmem:[#allocation10_spill] sm:$0xff]  ;;  %v8835_v38 = vsub.s32 %v4503_v36, %v10362_v47  ;;  %v3351_v4 = vmul.f32 %v8413_v3, %v8727_v6 }
 0x1b2   :  { %v8805_v24 = vpop.xlane.xlu0 %3456  ;;  %10387 = vst [vmem:[#allocation24_spill] sm:$0xff] %v8809_v58  ;;  %v3220_v58 = vmul.f32 %v8413_v3, %v8685_v29  ;;  %v8828_v41 = vadd.f32 %v6483_v57, %v10389_v34  ;;  %v2352_v26 = vpop.f32.mrb[101].mxu1  ;;  %v8831_v51 = vadd.f32 %v6356_v40, %v10386_v54  ;;  %v8844_v57 = vsub.s32 %v4510_v45, %v10362_v47 }
 0x1b3   :  { %10388 = vst [vmem:[#allocation8_spill] sm:$0xff] %v8822_v62  ;;  %v1843_v2 = vpop.f32.mrb[103].mxu0  ;;  %3564 = vadd.xlane.f32.xlu0 %v3563_v15  ;;  %v8838_v23 = vadd.f32 %v10389_v34, %v2352_v26  ;;  %v6484_v39 = vpop.f32.mrb[102].mxu1 }
 0x1b4   :  { %10390 = vst [vmem:[#allocation10_spill] sm:$0xff] %v8828_v41  ;;  %10391 = vst [vmem:[#allocation90_spill] sm:$0xff] %v8831_v51  ;;  %v8841_v29 = vadd.f32 %v10386_v54, %v1843_v2  ;;  %v8849_v36 = vadd.f32 %v6484_v39, %v10389_v34  ;;  %v2355_v62 = vpop.f32.mrb[103].mxu1  ;;  %v8851_v15 = vpop.eup %6859  ;;  %v3560_v2 = vsel %vm62_vm1, %v3221_v0, 0.0  ;;  %v3557_v6 = vsel %vm62_vm1, %v3220_v58, 0.0 }
 0x1b5   :  { %v3454_v31 = vpop.xlane.xlu1 %3453  ;;  %10392 = vst [vmem:[#allocation91_spill] sm:$0xff] %v8838_v23  ;;  %v8856_v23 = vadd.f32 %v10389_v34, %v2355_v62  ;;  %v8858_v45 = vpop.eup %6861  ;;  %3561 = vadd.xlane.f32.xlu1 %v3560_v2  ;;  %v3350_v39 = vmul.f32 %v8413_v3, %v8678_v30  ;;  %v4514_v58 = vrot.slane %v8800_v12, %v8844_v57 }
 0x1b6   :  { %10393 = vst [vmem:[#allocation92_spill] sm:$0xff] %v8841_v29  ;;  %v3451_v40 = vpop.xlane.xlu0 %3450  ;;  %10394 = vst [vmem:[#allocation93_spill] sm:$0xff] %v8849_v36  ;;  %v4500_v29 = vrot.slane %v3454_v31, %v8814_v53  ;;  %v10396_v36 = vld [vmem:[#allocation25_spill] sm:$0xff]  ;;  %v8871_v31 = vpop.eup %6863 }
 0x1b7   :  { %v4493_v26 = vrot.slane %v3451_v40, %v8817_v56  ;;  %10395 = vst [vmem:[#allocation94_spill] sm:$0xff] %v8856_v23  ;;  %6871 = vtanh.f32 %v10396_v36  ;;  %v4507_v40 = vrot.slane %v8805_v24, %v8835_v38  ;;  %3558 = vadd.xlane.f32.xlu0 %v3557_v6  ;;  %v6359_v23 = vpop.f32.mrb[104].mxu0  ;;  %v3950_v36 = vsel %vm62_vm1, %v3351_v4, 0.0  ;;  %v6487_v41 = vpop.f32.mrb[104].mxu1 }
 0x1b8   :  { %v8878_v24 = vadd.f32 %v6359_v23, %v10386_v54  ;;  %v1856_v51 = vpop.f32.mrb[105].mxu0  ;;  %v3348_v6 = vmul.f32 %v8413_v3, %v8696_v25  ;;  %v3947_v23 = vsel %vm62_vm1, %v3350_v39, 0.0  ;;  %v2368_v61 = vpop.f32.mrb[105].mxu1  ;;  %v4524_v39 = vadd.s32 4294967224, %v8583_v55 }
 0x1b9   :  { %v4495_v62 = vsel %vm4494_vm6, %v4493_v26, %v8756_v37  ;;  %v8869_v0 = vpop.xlane.xlu1 %3843  ;;  %v8880_v37 = vpop.eup %6865  ;;  %v3349_v26 = vmul.f32 %v8413_v3, %v8736_v5  ;;  %v8887_v12 = vadd.f32 %v10386_v54, %v1856_v51  ;;  %3951 = vadd.xlane.f32.xlu1 %v3950_v36  ;;  %6873 = vtanh.f32 %v8279_v16 }
 0x1ba   :  { %v4502_v30 = vsel %vm4501_vm7, %v4500_v29, %v4495_v62  ;;  %v3841_v2 = vpop.xlane.xlu0 %3840  ;;  %10397 = vst [vmem:[#allocation25_spill] sm:$0xff] %v8878_v24  ;;  %v6360_v29 = vpop.f32.mrb[106].mxu0  ;;  %v8894_v24 = vadd.f32 %v6487_v41, %v10389_v34  ;;  %6875 = vtanh.f32 %v8276_v44 }
 0x1bb   :  { %10398 = vst [vmem:[#allocation95_spill] sm:$0xff] %v8887_v12  ;;  %v4509_v62 = vsel %vm4508_vm8, %v4507_v40, %v4502_v30  ;;  %v8890_v4 = vpop.eup %6867  ;;  %v8897_v5 = vadd.f32 %v6360_v29, %v10386_v54  ;;  %v1859_v51 = vpop.f32.mrb[107].mxu0  ;;  %3948 = vadd.xlane.f32.xlu0 %v3947_v23  ;;  %v3354_v40 = vmul.f32 %v8413_v3, %v8758_v28  ;;  %6877 = vtanh.f32 %v8298_v9 }
 0x1bc   :  { %10399 = vst [vmem:[#allocation96_spill] sm:$0xff] %v8894_v24  ;;  %v8900_v25 = vsel %vm4515_vm9, %v4514_v58, %v4509_v62  ;;  %v8905_v30 = vadd.f32 %v10389_v34, %v2368_v61  ;;  %v6488_v41 = vpop.f32.mrb[106].mxu1  ;;  %v8909_v36 = vadd.f32 %v10386_v54, %v1859_v51  ;;  %v3226_v58 = vmul.f32 %v8413_v3, %v8747_v22  ;;  %v8917_v28 = vpop.eup %6869 }
 0x1bd   :  { %10400 = vst [vmem:[#allocation97_spill] sm:$0xff] %v8897_v5  ;;  %v3838_v12 = vpop.xlane.xlu1 %3837  ;;  %v8915_v62 = vadd.f32 %v6488_v41, %v10389_v34  ;;  %v2371_v23 = vpop.f32.mrb[107].mxu1  ;;  %v4517_v24 = vadd.s32 4294967232, %v8583_v55  ;;  %v4538_v22 = vadd.s32 4294967208, %v8583_v55  ;;  %v3941_v41 = vsel %vm62_vm1, %v3348_v6, 0.0 }
 0x1be   :  { %10401 = vst [vmem:[#allocation98_spill] sm:$0xff] %v8905_v30  ;;  %10402 = vst [vmem:[#allocation99_spill] sm:$0xff] %v8909_v36  ;;  %v3835_v29 = vpop.xlane.xlu0 %3834  ;;  %v3944_v30 = vsel %vm62_vm1, %v3349_v26, 0.0  ;;  %v8923_v51 = vadd.f32 %v10389_v34, %v2371_v23  ;;  %v5153_v16 = vrot.slane %v3838_v12, %v8814_v53  ;;  %v5158_v36 = vrot.slane %v3841_v2, %v8835_v38  ;;  %v6363_v12 = vpop.f32.mrb[108].mxu0 }
 0x1bf   :  { %10403 = vst [vmem:[#allocation100_spill] sm:$0xff] %v8915_v62  ;;  %v5148_v61 = vrot.slane %v3835_v29, %v8817_v56  ;;  %3945 = vadd.xlane.f32.xlu1 %v3944_v30  ;;  %v4531_v62 = vadd.s32 4294967216, %v8583_v55  ;;  %3942 = vadd.xlane.f32.xlu0 %v3941_v41  ;;  %v3959_v23 = vsel %vm62_vm1, %v3354_v40, 0.0  ;;  %v5163_v30 = vrot.slane %v8869_v0, %v8844_v57 }
 0x1c0   :  { %10404 = vst [vmem:[#allocation101_spill] sm:$0xff] %v8923_v51  ;;  %v8936_v51 = vsub.s32 %v4524_v39, %v10362_v47  ;;  %v3575_v2 = vsel %vm62_vm1, %v3226_v58, 0.0  ;;  %v8943_v43 = vadd.f32 %v6363_v12, %v10386_v54  ;;  %v8946_v41 = vsub.s32 %v4517_v24, %v10362_v47  ;;  %v6491_v39 = vpop.f32.mrb[108].mxu1 }
 0x1c1   :  { %v5149_v29 = vsel %vm4494_vm6, %v5148_v61, %v8769_v46  ;;  %v8932_v26 = vpop.xlane.xlu1 %3471  ;;  %v1872_v46 = vpop.f32.mrb[109].mxu0  ;;  %v3227_v40 = vmul.f32 %v8413_v3, %v8851_v15  ;;  %v3224_v58 = vmul.f32 %v8413_v3, %v8771_v35 }
 0x1c2   :  { %v5154_v6 = vsel %vm4501_vm7, %v5153_v16, %v5149_v29  ;;  %v3469_v5 = vpop.xlane.xlu0 %3468  ;;  %10405 = vst [vmem:[#allocation102_spill] sm:$0xff] %v8943_v43  ;;  %v6872_v61 = vpop.eup %6871  ;;  %v8951_v63 = vadd.f32 %v10386_v54, %v1872_v46  ;;  %v8957_v29 = vadd.f32 %v6491_v39, %v10389_v34  ;;  %v8966_v46 = vsub.s32 %v4538_v22, %v10362_v47 }
 0x1c3   :  { %v6364_v0 = vpop.f32.mrb[110].mxu0  ;;  %v5159_v16 = vsel %vm4508_vm8, %v5158_v36, %v5154_v6  ;;  %3960 = vadd.xlane.f32.xlu1 %v3959_v23  ;;  %v2384_v12 = vpop.f32.mrb[109].mxu1  ;;  %v8969_v36 = vsub.s32 %v4531_v62, %v10362_v47  ;;  %3576 = vadd.xlane.f32.xlu0 %v3575_v2  ;;  %v3578_v2 = vsel %vm62_vm1, %v3227_v40, 0.0 }
 0x1c4   :  { %v8960_v24 = vadd.f32 %v6364_v0, %v10386_v54  ;;  %v8963_v15 = vsel %vm4515_vm9, %v5163_v30, %v5159_v16  ;;  %v1875_v43 = vpop.f32.mrb[111].mxu0  ;;  %v8972_v35 = vadd.f32 %v10389_v34, %v2384_v12  ;;  %v6492_v6 = vpop.f32.mrb[110].mxu1  ;;  %v3352_v0 = vmul.f32 %v8413_v3, %v8811_v27 }
 0x1c5   :  { %v3466_v23 = vpop.xlane.xlu1 %3465  ;;  %v8975_v39 = vadd.f32 %v10386_v54, %v1875_v43  ;;  %v8980_v22 = vadd.f32 %v6492_v6, %v10389_v34  ;;  %v2387_v62 = vpop.f32.mrb[111].mxu1  ;;  %v3230_v12 = vmul.f32 %v8413_v3, %v8890_v4  ;;  %v3569_v6 = vsel %vm62_vm1, %v3224_v58, 0.0 }
 0x1c6   :  { %10406 = vst [vmem:[#allocation103_spill] sm:$0xff] %v8972_v35  ;;  %v3463_v30 = vpop.xlane.xlu0 %3462  ;;  %v8987_v43 = vadd.f32 %v10389_v34, %v2387_v62  ;;  %v4528_v27 = vrot.slane %v3466_v23, %v8936_v51  ;;  %v4535_v40 = vrot.slane %v3469_v5, %v8969_v36  ;;  %v6367_v62 = vpop.f32.mrb[112].mxu0  ;;  %v4542_v44 = vrot.slane %v8932_v26, %v8966_v46  ;;  %v10412_v35 = vld [vmem:[#allocation26_spill] sm:$0xff] }
 0x1c7   :  { %10407 = vst [vmem:[#allocation104_spill] sm:$0xff] %v8975_v39  ;;  %10408 = vst [vmem:[#allocation105_spill] sm:$0xff] %v8980_v22  ;;  %v4521_v16 = vrot.slane %v3463_v30, %v8946_v41  ;;  %v8989_v39 = vpop.eup %6873  ;;  %3579 = vadd.xlane.f32.xlu1 %v3578_v2  ;;  %3570 = vadd.xlane.f32.xlu0 %v3569_v6  ;;  %v3953_v58 = vsel %vm62_vm1, %v3352_v0, 0.0  ;;  %v9005_v9 = vadd.f32 %v6367_v62, %v10386_v54  ;;  %v1888_v5 = vpop.f32.mrb[113].mxu0 }
 0x1c8   :  { %10409 = vst [vmem:[#allocation106_spill] sm:$0xff] %v8987_v43  ;;  %v3587_v43 = vsel %vm62_vm1, %v3230_v12, 0.0  ;;  %v9011_v6 = vadd.f32 %v10386_v54, %v1888_v5  ;;  %v6368_v22 = vpop.f32.mrb[114].mxu0  ;;  %6879 = vtanh.f32 %v10412_v35 }
 0x1c9   :  { %v4523_v4 = vsel %vm4522_vm10, %v4521_v16, %v8900_v25  ;;  %v8998_v30 = vpop.xlane.xlu1 %3855  ;;  %v3225_v25 = vmul.f32 %v8413_v3, %v8858_v45  ;;  %v6495_v16 = vpop.f32.mrb[112].mxu1  ;;  %v9019_v62 = vadd.f32 %v6368_v22, %v10386_v54 }
 0x1ca   :  { %v4530_v23 = vsel %vm4529_vm11, %v4528_v27, %v4523_v4  ;;  %v3853_v2 = vpop.xlane.xlu0 %3852  ;;  %v3228_v27 = vmul.f32 %v8413_v3, %v6872_v61  ;;  %v9016_v0 = vadd.f32 %v6495_v16, %v10389_v34  ;;  %v2400_v4 = vpop.f32.mrb[113].mxu1  ;;  %v10414_v61 = vld [vmem:[#allocation29_spill] sm:$0xff] }
 0x1cb   :  { %v4537_v26 = vsel %vm4536_vm12, %v4535_v40, %v4530_v23  ;;  %3954 = vadd.xlane.f32.xlu1 %v3953_v58  ;;  %10411 = vst [vmem:[#allocation108_spill] sm:$0xff] %v9019_v62  ;;  %v1891_v45 = vpop.f32.mrb[115].mxu0  ;;  %3588 = vadd.xlane.f32.xlu0 %v3587_v43  ;;  %v9026_v40 = vadd.f32 %v10389_v34, %v2400_v4  ;;  %v6496_v23 = vpop.f32.mrb[114].mxu1  ;;  %6881 = vtanh.f32 %v10414_v61  ;;  %v3572_v35 = vsel %vm62_vm1, %v3225_v25, 0.0  ;;  %v9040_v43 = vld [vmem:[%s10256_s6] ss:$0 sm:$0xff] }
 0x1cc   :  { %10410 = vst [vmem:[#allocation107_spill] sm:$0xff] %v9016_v0  ;;  %v9022_v12 = vsel %vm10270_vm13, %v4542_v44, %v4537_v26  ;;  %v9029_v3 = vadd.f32 %v10386_v54, %v1891_v45  ;;  %v9033_v22 = vadd.f32 %v6496_v23, %v10389_v34  ;;  %v2403_v44 = vpop.f32.mrb[115].mxu1  ;;  %v3355_v54 = vmul.f32 %v9040_v43, %v8871_v31  ;;  %v10416_v25 = vld [vmem:[#allocation27_spill] sm:$0xff] }
 0x1cd   :  { %v3850_v5 = vpop.xlane.xlu1 %3849  ;;  %v9045_v26 = vadd.f32 %v10389_v34, %v2403_v44  ;;  %v3581_v45 = vsel %vm62_vm1, %v3228_v27, 0.0  ;;  %v3358_v23 = vmul.f32 %v9040_v43, %v8917_v28  ;;  %6883 = vtanh.f32 %v10416_v25  ;;  %v9058_v34 = vpop.f32.mrb[116].mxu0  ;;  %v10419_v62 = vld [vmem:[#allocation11_spill] sm:$0xff] }
 0x1ce   :  { %10413 = vst [vmem:[#allocation26_spill] sm:$0xff] %v9029_v3  ;;  %v3847_v58 = vpop.xlane.xlu0 %3846  ;;  %10415 = vst [vmem:[#allocation29_spill] sm:$0xff] %v9033_v22  ;;  %v5173_v4 = vrot.slane %v3850_v5, %v8936_v51  ;;  %v4545_v61 = vadd.s32 4294967200, %v8583_v55  ;;  %v6876_v5 = vpop.eup %6875  ;;  %6885 = vtanh.f32 %v8309_v60  ;;  %v4552_v27 = vadd.s32 4294967192, %v8583_v55 }
 0x1cf   :  { %v5168_v16 = vrot.slane %v3847_v58, %v8946_v41  ;;  %3573 = vadd.xlane.f32.xlu1 %v3572_v35  ;;  %v5178_v58 = vrot.slane %v3853_v2, %v8969_v36  ;;  %3582 = vadd.xlane.f32.xlu0 %v3581_v45  ;;  %10417 = vst [vmem:[#allocation27_spill] sm:$0xff] %v9058_v34  ;;  %v9067_v2 = vpop.f32.mrb[117].mxu0  ;;  %v3962_v45 = vsel %vm62_vm1, %v3355_v54, 0.0  ;;  %v6499_v0 = vpop.f32.mrb[116].mxu1 }
 0x1d0   :  { %v5183_v28 = vrot.slane %v8998_v30, %v8966_v46  ;;  %10418 = vst [vmem:[#allocation109_spill] sm:$0xff] %v9067_v2  ;;  %v3353_v25 = vmul.f32 %v9040_v43, %v8880_v37  ;;  %v9074_v3 = vpop.f32.mrb[118].mxu0  ;;  %v3971_v30 = vsel %vm62_vm1, %v3358_v23, 0.0  ;;  %v9081_v2 = vadd.f32 %v6499_v0, %v10419_v62  ;;  %v2416_v54 = vpop.f32.mrb[117].mxu1  ;;  %v10421_v37 = vld [vmem:[#allocation28_spill] sm:$0xff] }
 0x1d1   :  { %v5169_v31 = vsel %vm4522_vm10, %v5168_v16, %v8963_v15  ;;  %v9056_v22 = vpop.xlane.xlu1 %3864  ;;  %v6878_v15 = vpop.eup %6877  ;;  %v4566_v16 = vadd.s32 4294967176, %v8583_v55  ;;  %6887 = vtanh.f32 %v10421_v37  ;;  %v9091_v23 = vadd.f32 %v10419_v62, %v2416_v54 }
 0x1d2   :  { %v5174_v44 = vsel %vm4529_vm11, %v5173_v4, %v5169_v31  ;;  %v9065_v35 = vpop.xlane.xlu0 %3480  ;;  %v3356_v4 = vmul.f32 %v9040_v43, %v8989_v39  ;;  %v9083_v34 = vpop.f32.mrb[119].mxu0  ;;  %6889 = vtanh.f32 %v8328_v20  ;;  %v9095_v0 = vsub.s32 %v4552_v27, %v10362_v47 }
 0x1d3   :  { %v5179_v60 = vsel %vm4536_vm12, %v5178_v58, %v5174_v44  ;;  %3963 = vadd.xlane.f32.xlu1 %v3962_v45  ;;  %10420 = vst [vmem:[#allocation11_spill] sm:$0xff] %v9083_v34  ;;  %v9087_v58 = vsub.s32 %v4545_v61, %v10362_v47  ;;  %v4559_v44 = vadd.s32 4294967184, %v8583_v55  ;;  %3972 = vadd.xlane.f32.xlu0 %v3971_v30  ;;  %10422 = vst [vmem:[#allocation28_spill] sm:$0xff] %v9091_v23  ;;  %v6500_v39 = vpop.f32.mrb[118].mxu1  ;;  %v6880_v37 = vpop.eup %6879 }
 0x1d4   :  { %v5184_v31 = vsel %vm10270_vm13, %v5183_v28, %v5179_v60  ;;  %v9098_v60 = vadd.f32 %v6500_v39, %v10419_v62  ;;  %v2419_v61 = vpop.f32.mrb[119].mxu1  ;;  %v3956_v30 = vsel %vm62_vm1, %v3353_v25, 0.0  ;;  %v3231_v54 = vmul.f32 %v9040_v43, %v6876_v5 }
 0x1d5   :  { %v3484_v45 = vpop.xlane.xlu1 %3483  ;;  %v9104_v23 = vadd.f32 %v10419_v62, %v2419_v61  ;;  %v6882_v20 = vpop.eup %6881  ;;  %6891 = vtanh.f32 %v8312_v14  ;;  %v9108_v27 = vsub.s32 %v4566_v16, %v10362_v47  ;;  %v3965_v39 = vsel %vm62_vm1, %v3356_v4, 0.0 }
 0x1d6   :  { %v3475_v28 = vpop.xlane.xlu0 %3474  ;;  %10423 = vst [vmem:[#allocation110_spill] sm:$0xff] %v9098_v60  ;;  %v3234_v60 = vmul.f32 %v9040_v43, %v6878_v15  ;;  %6893 = vtanh.f32 %v8334_v17  ;;  %v9114_v25 = vsub.s32 %v4559_v44, %v10362_v47  ;;  %v9118_v14 = vpop.f32.mrb[120].mxu0  ;;  %v3229_v15 = vmul.f32 %v9040_v43, %v6880_v37 }
 0x1d7   :  { %v4549_v55 = vrot.slane %v3475_v28, %v9087_v58  ;;  %10424 = vst [vmem:[#allocation111_spill] sm:$0xff] %v9104_v23  ;;  %3957 = vadd.xlane.f32.xlu1 %v3956_v30  ;;  %3966 = vadd.xlane.f32.xlu0 %v3965_v39  ;;  %10425 = vst [vmem:[#allocation112_spill] sm:$0xff] %v9118_v14  ;;  %v9122_v61 = vpop.f32.mrb[121].mxu0  ;;  %v6884_v17 = vpop.eup %6883  ;;  %v3232_v44 = vmul.f32 %v9040_v43, %v6882_v20 }
 0x1d8   :  { %10426 = vst [vmem:[#allocation113_spill] sm:$0xff] %v9122_v61  ;;  %v4563_v47 = vrot.slane %v9065_v35, %v9114_v25  ;;  %v6503_v30 = vpop.f32.mrb[120].mxu1  ;;  %v9129_v39 = vpop.f32.mrb[122].mxu0  ;;  %v3599_v61 = vsel %vm62_vm1, %v3234_v60, 0.0 }
 0x1d9   :  { %v4551_v5 = vsel %vm4550_vm14, %v4549_v55, %v9022_v12  ;;  %v3478_v28 = vpop.xlane.xlu1 %3477  ;;  %v3590_v12 = vsel %vm62_vm1, %v3231_v54, 0.0  ;;  %10427 = vst [vmem:[#allocation114_spill] sm:$0xff] %v9129_v39  ;;  %v6886_v23 = vpop.eup %6885  ;;  %v9135_v14 = vadd.f32 %v6503_v30, %v10419_v62  ;;  %v10429_v54 = vld [vmem:[#allocation30_spill] sm:$0xff] }
 0x1da   :  { %v4556_v16 = vrot.slane %v3478_v28, %v9095_v0  ;;  %v3859_v4 = vpop.xlane.xlu0 %3858  ;;  %v4570_v28 = vrot.slane %v3484_v45, %v9108_v27  ;;  %v2432_v35 = vpop.f32.mrb[121].mxu1  ;;  %6895 = vtanh.f32 %v10429_v54 }
 0x1db   :  { %v5188_v55 = vrot.slane %v3859_v4, %v9087_v58  ;;  %3591 = vadd.xlane.f32.xlu1 %v3590_v12  ;;  %v9137_v4 = vpop.f32.mrb[123].mxu0  ;;  %3600 = vadd.xlane.f32.xlu0 %v3599_v61  ;;  %v9143_v45 = vadd.f32 %v10419_v62, %v2432_v35  ;;  %v3359_v61 = vmul.f32 %v9040_v43, %v6884_v17 }
 0x1dc   :  { %v4558_v37 = vsel %vm4557_vm15, %v4556_v16, %v4551_v5  ;;  %10428 = vst [vmem:[#allocation115_spill] sm:$0xff] %v9137_v4  ;;  %v6504_v5 = vpop.f32.mrb[122].mxu1  ;;  %v10431_v16 = vld [vmem:[#allocation33_spill] sm:$0xff] }
 0x1dd   :  { %v4565_v20 = vsel %vm4564_vm0, %v4563_v47, %v4558_v37  ;;  %v5189_v39 = vsel %vm4550_vm14, %v5188_v55, %v5184_v31  ;;  %v3868_v34 = vpop.xlane.xlu1 %3867  ;;  %10430 = vst [vmem:[#allocation30_spill] sm:$0xff] %v9143_v45  ;;  %6897 = vtanh.f32 %v10431_v16  ;;  %v9152_v30 = vadd.f32 %v6504_v5, %v10419_v62  ;;  %v2435_v54 = vpop.f32.mrb[123].mxu1 }
 0x1de   :  { %v9147_v60 = vsel %vm4571_vm2, %v4570_v28, %v4565_v20  ;;  %v9149_v12 = vpop.xlane.xlu0 %3492  ;;  %v6888_v47 = vpop.eup %6887  ;;  %v3584_v31 = vsel %vm62_vm1, %v3229_v15, 0.0  ;;  %v3362_v55 = vmul.f32 %v9040_v43, %v6886_v23  ;;  %v9158_v37 = vadd.f32 %v10419_v62, %v2435_v54  ;;  %v10434_v20 = vld [vmem:[#allocation31_spill] sm:$0xff] }
 0x1df   :  { %10432 = vst [vmem:[#allocation33_spill] sm:$0xff] %v9152_v30  ;;  %v6890_v35 = vpop.eup %6889  ;;  %3585 = vadd.xlane.f32.xlu1 %v3584_v31  ;;  %v3593_v28 = vsel %vm62_vm1, %v3232_v44, 0.0  ;;  %6899 = vtanh.f32 %v10434_v20  ;;  %v9162_v5 = vpop.f32.mrb[124].mxu0  ;;  %v5198_v31 = vrot.slane %v9056_v22, %v9114_v25  ;;  %v3974_v44 = vsel %vm62_vm1, %v3359_v61, 0.0 }
 0x1e0   :  { %10433 = vst [vmem:[#allocation116_spill] sm:$0xff] %v9158_v37  ;;  %3594 = vadd.xlane.f32.xlu0 %v3593_v28  ;;  %10435 = vst [vmem:[#allocation31_spill] sm:$0xff] %v9162_v5  ;;  %v6892_v30 = vpop.eup %6891  ;;  %6901 = vtanh.f32 %v8345_v18  ;;  %v9168_v23 = vpop.f32.mrb[125].mxu0  ;;  %v3983_v20 = vsel %vm62_vm1, %v3362_v55, 0.0  ;;  %v3357_v28 = vmul.f32 %v9040_v43, %v6888_v47  ;;  %v5203_v18 = vrot.slane %v3868_v34, %v9108_v27  ;;  %v10440_v34 = vld [vmem:[#allocation32_spill] sm:$0xff] }
 0x1e1   :  { %v3862_v16 = vpop.xlane.xlu1 %3861  ;;  %10436 = vst [vmem:[#allocation117_spill] sm:$0xff] %v9168_v23  ;;  %v6894_v54 = vpop.eup %6893  ;;  %v3361_v23 = vmul.f32 %v9040_v43, %v6890_v35  ;;  %6903 = vtanh.f32 %v10440_v34 }
 0x1e2   :  { %v5193_v15 = vrot.slane %v3862_v16, %v9095_v0  ;;  %v9166_v17 = vpop.xlane.xlu0 %3486  ;;  %v6507_v37 = vpop.f32.mrb[124].mxu1  ;;  %6905 = vtanh.f32 %v8351_v48 }
 0x1e3   :  { %v9175_v5 = vpop.f32.mrb[126].mxu0  ;;  %3975 = vadd.xlane.f32.xlu1 %v3974_v44  ;;  %v9181_v4 = vadd.f32 %v6507_v37, %v10419_v62  ;;  %v2448_v22 = vpop.f32.mrb[125].mxu1  ;;  %6907 = vtanh.f32 %v8348_v50  ;;  %v10444_v50 = vld [vmem:[#allocation34_spill] sm:$0xff] }
 0x1e4   :  { %10437 = vst [vmem:[#allocation118_spill] sm:$0xff] %v9175_v5  ;;  %v5194_v16 = vsel %vm4557_vm15, %v5193_v15, %v5189_v39  ;;  %v9183_v45 = vpop.f32.mrb[127].mxu0  ;;  %3984 = vadd.xlane.f32.xlu0 %v3983_v20  ;;  %v9187_v47 = vadd.f32 %v10419_v62, %v2448_v22  ;;  %v6508_v5 = vpop.f32.mrb[126].mxu1  ;;  %v3235_v20 = vmul.f32 %v9040_v43, %v6892_v30  ;;  %6909 = vtanh.f32 %v8358_v49 }
 0x1e5   :  { %10438 = vst [vmem:[#allocation119_spill] sm:$0xff] %v9181_v4  ;;  %v5199_v61 = vsel %vm4564_vm0, %v5198_v31, %v5194_v16  ;;  %v3877_v55 = vpop.xlane.xlu1 %3876  ;;  %v9194_v37 = vadd.f32 %v6508_v5, %v10419_v62  ;;  %v2451_v15 = vpop.f32.mrb[127].mxu1  ;;  %v3968_v31 = vsel %vm62_vm1, %v3357_v28, 0.0  ;;  %6911 = vtanh.f32 %v10444_v50 }
 0x1e6   :  { %10439 = vst [vmem:[#allocation120_spill] sm:$0xff] %v9187_v47  ;;  %v9191_v39 = vsel %vm4571_vm2, %v5203_v18, %v5199_v61  ;;  %v3880_v35 = vpop.xlane.xlu0 %3879  ;;  %v6896_v44 = vpop.eup %6895  ;;  %v9200_v16 = vadd.f32 %v10419_v62, %v2451_v15  ;;  %v3980_v18 = vsel %vm62_vm1, %v3361_v23, 0.0  ;;  %v3238_v61 = vmul.f32 %v9040_v43, %v6894_v54 }
 0x1e7   :  { %10441 = vst [vmem:[#allocation32_spill] sm:$0xff] %v9194_v37  ;;  %v6898_v22 = vpop.eup %6897  ;;  %3969 = vadd.xlane.f32.xlu1 %v3968_v31  ;;  %v3602_v30 = vsel %vm62_vm1, %v3235_v20, 0.0  ;;  %v3360_v28 = vmul.f32 %v9040_v43, %v6896_v44  ;;  %v6511_v15 = vpop.f32.mrb[128].mxu1  ;;  %v10446_v44 = vld [vmem:[#allocation36_spill] sm:$0xff]  ;;  %v5217_v50 = vrot.slane %v3877_v55, %v8652_v42 }
 0x1e8   :  { %10442 = vst [vmem:[#allocation121_spill] sm:$0xff] %v9200_v16  ;;  %3981 = vadd.xlane.f32.xlu0 %v3980_v18  ;;  %v3611_v23 = vsel %vm62_vm1, %v3238_v61, 0.0  ;;  %v3236_v54 = vmul.f32 %v9040_v43, %v6898_v22  ;;  %v9213_v31 = vadd.f32 %v6511_v15, %v10419_v62  ;;  %v2464_v18 = vpop.f32.mrb[129].mxu1  ;;  %6913 = vtanh.f32 %v10446_v44 }
 0x1e9   :  { %v9204_v34 = vpop.xlane.xlu1 %3495  ;;  %v6900_v48 = vpop.eup %6899  ;;  %v9217_v49 = vadd.f32 %v10419_v62, %v2464_v18 }
 0x1ea   :  { %v3874_v5 = vpop.xlane.xlu0 %3873  ;;  %v6902_v16 = vpop.eup %6901  ;;  %10443 = vst [vmem:[#allocation122_spill] sm:$0xff] %v9213_v31  ;;  %v3233_v18 = vmul.f32 %v9040_v43, %v6900_v48 }
 0x1eb   :  { %3603 = vadd.xlane.f32.xlu1 %v3602_v30  ;;  %10445 = vst [vmem:[#allocation34_spill] sm:$0xff] %v9217_v49  ;;  %v6512_v20 = vpop.f32.mrb[130].mxu1  ;;  %v5212_v30 = vrot.slane %v3874_v5, %v8673_v59  ;;  %v6904_v44 = vpop.eup %6903  ;;  %v5222_v5 = vrot.slane %v3880_v35, %v8664_v13  ;;  %v3605_v49 = vsel %vm62_vm1, %v3236_v54, 0.0 }
 0x1ec   :  { %3612 = vadd.xlane.f32.xlu0 %v3611_v23  ;;  %v9225_v22 = vadd.f32 %v6512_v20, %v10419_v62  ;;  %v2467_v15 = vpop.f32.mrb[131].mxu1  ;;  %v3977_v23 = vsel %vm62_vm1, %v3360_v28, 0.0  ;;  %v3366_v20 = vmul.f32 %v9040_v43, %v6902_v16  ;;  %v10448_v28 = vld [vmem:[#allocation35_spill] sm:$0xff]  ;;  %v4585_v16 = vrot.slane %v9149_v12, %v8652_v42 }
 0x1ed   :  { %v3871_v47 = vpop.xlane.xlu1 %3870  ;;  %v9231_v31 = vadd.f32 %v10419_v62, %v2467_v15  ;;  %6915 = vtanh.f32 %v10448_v28  ;;  %v4576_v62 = vrot.slane %v9166_v17, %v8661_v21  ;;  %v3596_v54 = vsel %vm62_vm1, %v3233_v18, 0.0 }
 0x1ee   :  { %v5208_v61 = vrot.slane %v3871_v47, %v8661_v21  ;;  %v9222_v37 = vpop.xlane.xlu0 %3504  ;;  %10447 = vst [vmem:[#allocation36_spill] sm:$0xff] %v9225_v22  ;;  %v6906_v22 = vpop.eup %6905  ;;  %v3363_v15 = vmul.f32 %v9040_v43, %v6904_v44 }
 0x1ef   :  { %3978 = vadd.xlane.f32.xlu1 %v3977_v23  ;;  %v3364_v23 = vmul.f32 %v9040_v43, %v6906_v22 }
 0x1f0   :  { %v5213_v47 = vsel %vm4473_vm3, %v5212_v30, %v5208_v61  ;;  %3606 = vadd.xlane.f32.xlu0 %v3605_v49  ;;  %v10449_v61 = vld [vmem:[#allocation37_spill] sm:$0xff]  ;;  %v6908_v49 = vpop.eup %6907  ;;  %v3986_v28 = vsel %vm62_vm1, %v3363_v15, 0.0 }
 0x1f1   :  { %v5218_v55 = vsel %vm4480_vm4, %v5217_v50, %v5213_v47  ;;  %v3490_v4 = vpop.xlane.xlu1 %3489  ;;  %6917 = vtanh.f32 %v10449_v61  ;;  %v4590_v50 = vrot.slane %v9204_v34, %v8664_v13 }
 0x1f2   :  { %v4580_v48 = vrot.slane %v3490_v4, %v8673_v59  ;;  %v3499_v35 = vpop.xlane.xlu0 %3498  ;;  %v5223_v30 = vsel %vm4487_vm5, %v5222_v5, %v5218_v55  ;;  %v3995_v4 = vsel %vm62_vm1, %v3366_v20, 0.0  ;;  %v6910_v5 = vpop.eup %6909  ;;  %6919 = vtanh.f32 %v8381_v33 }
 0x1f3   :  { %3597 = vadd.xlane.f32.xlu1 %v3596_v54  ;;  %v4595_v18 = vrot.slane %v3499_v35, %v8817_v56  ;;  %6921 = vtanh.f32 %v8384_v1  ;;  %v6912_v55 = vpop.eup %6911  ;;  %v3239_v33 = vmul.f32 %v9040_v43, %v6908_v49  ;;  %v3367_v35 = vmul.f32 %v9040_v43, %v6910_v5 }
 0x1f4   :  { %v4581_v17 = vsel %vm4473_vm3, %v4580_v48, %v4576_v62  ;;  %3996 = vadd.xlane.f32.xlu0 %v3995_v4  ;;  %v6914_v62 = vpop.eup %6913  ;;  %v3989_v48 = vsel %vm62_vm1, %v3364_v23, 0.0  ;;  %6923 = vtanh.f32 %v8390_v10  ;;  %v3237_v15 = vmul.f32 %v9040_v43, %v6912_v55 }
 0x1f5   :  { %v4586_v12 = vsel %vm4480_vm4, %v4585_v16, %v4581_v17  ;;  %v9256_v47 = vpop.xlane.xlu1 %3888  ;;  %6925 = vtanh.f32 %v8387_v52  ;;  %v3614_v54 = vsel %vm62_vm1, %v3239_v33, 0.0  ;;  %v3242_v17 = vmul.f32 %v9040_v43, %v6914_v62 }
 0x1f6   :  { %v4591_v34 = vsel %vm4487_vm5, %v4590_v50, %v4586_v12  ;;  %v3883_v44 = vpop.xlane.xlu0 %3882  ;;  %v3998_v50 = vsel %vm62_vm1, %v3367_v35, 0.0  ;;  %6927 = vtanh.f32 %v8394_v11  ;;  %v4605_v5 = vrot.slane %v9222_v37, %v8835_v38 }
 0x1f7   :  { %v4596_v20 = vsel %vm4494_vm6, %v4595_v18, %v4591_v34  ;;  %v5227_v22 = vrot.slane %v3883_v44, %v8817_v56  ;;  %3987 = vadd.xlane.f32.xlu1 %v3986_v28  ;;  %v6916_v49 = vpop.eup %6915  ;;  %6929 = vtanh.f32 %v8400_v7  ;;  %v3608_v12 = vsel %vm62_vm1, %v3237_v15, 0.0  ;;  %v10450_v28 = vld [vmem:[#allocation38_spill] sm:$0xff] }
 0x1f8   :  { %3990 = vadd.xlane.f32.xlu0 %v3989_v48  ;;  %v3365_v18 = vmul.f32 %v9040_v43, %v6916_v49  ;;  %v3623_v11 = vsel %vm62_vm1, %v3242_v17, 0.0  ;;  %6931 = vtanh.f32 %v10450_v28 }
 0x1f9   :  { %v5228_v1 = vsel %vm4494_vm6, %v5227_v22, %v5223_v30  ;;  %v3508_v61 = vpop.xlane.xlu1 %3507  ;;  %6933 = vtanh.f32 %v8425_v32 }
 0x1fa   :  { %v3892_v16 = vpop.xlane.xlu0 %3891  ;;  %v4610_v44 = vrot.slane %v3508_v61, %v8844_v57  ;;  %v3992_v61 = vsel %vm62_vm1, %v3365_v18, 0.0  ;;  %6935 = vtanh.f32 %v8428_v19  ;;  %v10452_v19 = vld [vmem:[#allocation40_spill] sm:$0xff] }
 0x1fb   :  { %3615 = vadd.xlane.f32.xlu1 %v3614_v54  ;;  %v6918_v4 = vpop.eup %6917  ;;  %v5242_v49 = vrot.slane %v3892_v16, %v8844_v57  ;;  %v10451_v16 = vld [vmem:[#allocation39_spill] sm:$0xff] }
 0x1fc   :  { %3999 = vadd.xlane.f32.xlu0 %v3998_v50  ;;  %v6920_v52 = vpop.eup %6919  ;;  %v3240_v22 = vmul.f32 %v9040_v43, %v6918_v4  ;;  %6937 = vtanh.f32 %v10451_v16 }
 0x1fd   :  { %v3502_v23 = vpop.xlane.xlu1 %3501  ;;  %v6922_v34 = vpop.eup %6921  ;;  %v3370_v17 = vmul.f32 %v9040_v43, %v6920_v52  ;;  %6939 = vtanh.f32 %v8422_v8 }
 0x1fe   :  { %v4600_v10 = vrot.slane %v3502_v23, %v8814_v53  ;;  %v9275_v30 = vpop.xlane.xlu0 %3516  ;;  %v3243_v54 = vmul.f32 %v9040_v43, %v6922_v34  ;;  %v6924_v15 = vpop.eup %6923  ;;  %v3617_v32 = vsel %vm62_vm1, %v3240_v22, 0.0  ;;  %6941 = vtanh.f32 %v10452_v19 }
 0x1ff   :  { %3609 = vadd.xlane.f32.xlu1 %v3608_v12  ;;  %v6926_v4 = vpop.eup %6925  ;;  %v3241_v18 = vmul.f32 %v9040_v43, %v6924_v15  ;;  %v4007_v52 = vsel %vm62_vm1, %v3370_v17, 0.0 }
 0x200   :  { %v4601_v55 = vsel %vm4501_vm7, %v4600_v10, %v4596_v20  ;;  %3624 = vadd.xlane.f32.xlu0 %v3623_v11  ;;  %v5237_v20 = vrot.slane %v9256_v47, %v8835_v38  ;;  %v6928_v34 = vpop.eup %6927 }
 0x201   :  { %v4606_v7 = vsel %vm4508_vm8, %v4605_v5, %v4601_v55  ;;  %v3886_v33 = vpop.xlane.xlu1 %3885  ;;  %v6930_v55 = vpop.eup %6929 }
 0x202   :  { %v5232_v37 = vrot.slane %v3886_v33, %v8814_v53  ;;  %v4611_v62 = vsel %vm4515_vm9, %v4610_v44, %v4606_v7  ;;  %v3511_v48 = vpop.xlane.xlu0 %3510  ;;  %v3368_v44 = vmul.f32 %v9040_v43, %v6926_v4  ;;  %v6932_v7 = vpop.eup %6931  ;;  %v4625_v33 = vrot.slane %v9275_v30, %v8969_v36  ;;  %v10454_v4 = vld [vmem:[#allocation41_spill] sm:$0xff] }
 0x203   :  { %v4615_v35 = vrot.slane %v3511_v48, %v8946_v41  ;;  %3993 = vadd.xlane.f32.xlu1 %v3992_v61  ;;  %v3371_v48 = vmul.f32 %v9040_v43, %v6928_v34 }
 0x204   :  { %v5233_v50 = vsel %vm4501_vm7, %v5232_v37, %v5228_v1  ;;  %3618 = vadd.xlane.f32.xlu0 %v3617_v32  ;;  %v3626_v1 = vsel %vm62_vm1, %v3243_v54, 0.0  ;;  %v4001_v61 = vsel %vm62_vm1, %v3368_v44, 0.0  ;;  %v3369_v54 = vmul.f32 %v9040_v43, %v6930_v55 }
 0x205   :  { %v5238_v23 = vsel %vm4508_vm8, %v5237_v20, %v5233_v50  ;;  %v4616_v47 = vsel %vm4522_vm10, %v4615_v35, %v4611_v62  ;;  %v3520_v10 = vpop.xlane.xlu1 %3519  ;;  %v3620_v62 = vsel %vm62_vm1, %v3241_v18, 0.0  ;;  %v6934_v20 = vpop.eup %6933  ;;  %v10453_v50 = vld [vmem:[#allocation46_spill] sm:$0xff] }
 0x206   :  { %v3901_v5 = vpop.xlane.xlu0 %3900  ;;  %v5243_v12 = vsel %vm4515_vm9, %v5242_v49, %v5238_v23  ;;  %v4630_v8 = vrot.slane %v3520_v10, %v8966_v46  ;;  %6943 = vtanh.f32 %v10453_v50  ;;  %v4010_v23 = vsel %vm62_vm1, %v3371_v48, 0.0  ;;  %v6936_v10 = vpop.eup %6935  ;;  %v10455_v18 = vld [vmem:[#allocation42_spill] sm:$0xff] }
 0x207   :  { %3627 = vadd.xlane.f32.xlu1 %v3626_v1  ;;  %6945 = vtanh.f32 %v10454_v4  ;;  %v4004_v16 = vsel %vm62_vm1, %v3369_v54, 0.0  ;;  %v3246_v1 = vmul.f32 %v9040_v43, %v6932_v7  ;;  %v5257_v19 = vrot.slane %v3901_v5, %v8969_v36 }
 0x208   :  { %4008 = vadd.xlane.f32.xlu0 %v4007_v52  ;;  %6947 = vtanh.f32 %v10455_v18  ;;  %v10456_v52 = vld [vmem:[#allocation47_spill] sm:$0xff] }
 0x209   :  { %v3514_v11 = vpop.xlane.xlu1 %3513  ;;  %6949 = vtanh.f32 %v10456_v52  ;;  %v3635_v48 = vsel %vm62_vm1, %v3246_v1, 0.0  ;;  %v10460_v1 = vld [vmem:[#allocation49_spill] sm:$0xff] }
 0x20a   :  { %v4620_v22 = vrot.slane %v3514_v11, %v8936_v51  ;;  %v3895_v28 = vpop.xlane.xlu0 %3894 }
 0x20b   :  { %v5247_v37 = vrot.slane %v3895_v28, %v8946_v41  ;;  %3621 = vadd.xlane.f32.xlu1 %v3620_v62 }
 0x20c   :  { %v4621_v35 = vsel %vm4529_vm11, %v4620_v22, %v4616_v47  ;;  %4002 = vadd.xlane.f32.xlu0 %v4001_v61  ;;  %v3247_v47 = vmul.f32 %v9040_v43, %v6934_v20  ;;  %v10457_v61 = vld [vmem:[#allocation48_spill] sm:$0xff] }
 0x20d   :  { %v4626_v15 = vsel %vm4536_vm12, %v4625_v33, %v4621_v35  ;;  %v5248_v30 = vsel %vm4522_vm10, %v5247_v37, %v5243_v12  ;;  %v3904_v49 = vpop.xlane.xlu1 %3903  ;;  %v6938_v12 = vpop.eup %6937  ;;  %v3372_v33 = vmul.f32 %v9040_v43, %v6936_v10  ;;  %6951 = vtanh.f32 %v10457_v61  ;;  %v10459_v10 = vld [vmem:[#allocation44_spill] sm:$0xff] }
 0x20e   :  { %v3529_v32 = vpop.xlane.xlu0 %3528  ;;  %v4631_v17 = vsel %vm10270_vm13, %v4630_v8, %v4626_v15  ;;  %v6940_v11 = vpop.eup %6939  ;;  %v3638_v28 = vsel %vm62_vm1, %v3247_v47, 0.0  ;;  %v5262_v37 = vrot.slane %v3904_v49, %v8966_v46  ;;  %v3244_v20 = vmul.f32 %v9040_v43, %v6938_v12  ;;  %v10458_v49 = vld [vmem:[#allocation43_spill] sm:$0xff] }
 0x20f   :  { %4011 = vadd.xlane.f32.xlu1 %v4010_v23  ;;  %v6942_v7 = vpop.eup %6941  ;;  %6953 = vtanh.f32 %v10458_v49  ;;  %v4645_v52 = vrot.slane %v3529_v32, %v9114_v25 }
 0x210   :  { %4005 = vadd.xlane.f32.xlu0 %v4004_v16  ;;  %v3245_v50 = vmul.f32 %v9040_v43, %v6942_v7  ;;  %v6944_v4 = vpop.eup %6943  ;;  %v3629_v23 = vsel %vm62_vm1, %v3244_v20, 0.0  ;;  %6955 = vtanh.f32 %v10459_v10 }
 0x211   :  { %v3898_v34 = vpop.xlane.xlu1 %3897  ;;  %v6946_v47 = vpop.eup %6945  ;;  %6957 = vtanh.f32 %v10460_v1 }
 0x212   :  { %v5252_v44 = vrot.slane %v3898_v34, %v8936_v51  ;;  %v3523_v55 = vpop.xlane.xlu0 %3522  ;;  %v6948_v34 = vpop.eup %6947  ;;  %v3375_v7 = vmul.f32 %v9040_v43, %v6946_v47 }
 0x213   :  { %v4635_v22 = vrot.slane %v3523_v55, %v9087_v58  ;;  %3639 = vadd.xlane.f32.xlu1 %v3638_v28  ;;  %v3632_v55 = vsel %vm62_vm1, %v3245_v50, 0.0  ;;  %v3373_v50 = vmul.f32 %v9040_v43, %v6948_v34 }
 0x214   :  { %v5253_v62 = vsel %vm4529_vm11, %v5252_v44, %v5248_v30  ;;  %3636 = vadd.xlane.f32.xlu0 %v3635_v48  ;;  %v4013_v30 = vsel %vm62_vm1, %v3372_v33, 0.0  ;;  %v10461_v48 = vld [vmem:[#allocation50_spill] sm:$0xff] }
 0x215   :  { %v5258_v8 = vsel %vm4536_vm12, %v5257_v19, %v5253_v62  ;;  %v4636_v5 = vsel %vm4550_vm14, %v4635_v22, %v4631_v17  ;;  %v3532_v35 = vpop.xlane.xlu1 %3531  ;;  %v3374_v17 = vmul.f32 %v9040_v43, %v6940_v11  ;;  %v3251_v11 = vmul.f32 %v9040_v43, %v6944_v4  ;;  %v6950_v19 = vpop.eup %6949 }
 0x216   :  { %v9344_v54 = vpop.xlane.xlu0 %3912  ;;  %v5263_v15 = vsel %vm10270_vm13, %v5262_v37, %v5258_v8  ;;  %vm5758_vm13 = vcmask 1041409   ;;  %v4650_v22 = vrot.slane %v3532_v35, %v9108_v27  ;;  %6959 = vtanh.f32 %v10461_v48  ;;  %v10462_v35 = vld [vmem:[#allocation45_spill] sm:$0xff] }
 0x217   :  { %4014 = vadd.xlane.f32.xlu1 %v4013_v30  ;;  %v4019_v33 = vsel %vm62_vm1, %v3374_v17, 0.0  ;;  %6961 = vtanh.f32 %v10462_v35  ;;  %v3650_v61 = vsel %vm62_vm1, %v3251_v11, 0.0  ;;  %v3376_v49 = vmul.f32 %v9040_v43, %v6950_v19  ;;  %v6952_v30 = vpop.eup %6951  ;;  %v10463_v17 = vld [vmem:[#allocation53_spill] sm:$0xff] }
 0x218   :  { %3630 = vadd.xlane.f32.xlu0 %v3629_v23  ;;  %6963 = vtanh.f32 %v10463_v17  ;;  %v4016_v34 = vsel %vm62_vm1, %v3373_v50, 0.0 }
 0x219   :  { %v3526_v16 = vpop.xlane.xlu1 %3525  ;;  %v6954_v4 = vpop.eup %6953  ;;  %v4025_v1 = vsel %vm62_vm1, %v3376_v49, 0.0  ;;  %v10467_v49 = vld [vmem:[#allocation55_spill] sm:$0xff] }
 0x21a   :  { %v4640_v12 = vrot.slane %v3526_v16, %v9095_v0  ;;  %v3907_v18 = vpop.xlane.xlu0 %3906  ;;  %v6956_v10 = vpop.eup %6955  ;;  %v10464_v16 = vld [vmem:[#allocation51_spill] sm:$0xff] }
 0x21b   :  { %v5267_v44 = vrot.slane %v3907_v18, %v9087_v58  ;;  %3633 = vadd.xlane.f32.xlu1 %v3632_v55  ;;  %6965 = vtanh.f32 %v10464_v16  ;;  %v6958_v18 = vpop.eup %6957  ;;  %v3248_v35 = vmul.f32 %v9040_v43, %v6956_v10 }
 0x21c   :  { %v4641_v28 = vsel %vm4557_vm15, %v4640_v12, %v4636_v5  ;;  %4020 = vadd.xlane.f32.xlu0 %v4019_v33  ;;  %v3249_v12 = vmul.f32 %v9040_v43, %v6952_v30  ;;  %v3379_v48 = vmul.f32 %v9040_v43, %v6958_v18  ;;  %v10469_v18 = vld [vmem:[#allocation57_spill] sm:$0xff] }
 0x21d   :  { %v4646_v37 = vsel %vm4564_vm0, %v4645_v52, %v4641_v28  ;;  %v5268_v32 = vsel %vm4550_vm14, %v5267_v44, %v5263_v15  ;;  %v9365_v62 = vpop.xlane.xlu1 %3924  ;;  %v4022_v15 = vsel %vm62_vm1, %v3375_v7, 0.0  ;;  %v5277_v52 = vrot.slane %v9344_v54, %v9114_v25  ;;  %v10466_v7 = vld [vmem:[#allocation52_spill] sm:$0xff] }
 0x21e   :  { %v4651_v20 = vsel %vm4571_vm2, %v4650_v22, %v4646_v37  ;;  %v3916_v8 = vpop.xlane.xlu0 %3915  ;;  %v3250_v44 = vmul.f32 %v9040_v43, %v6954_v4  ;;  %v10465_v22 = vld [vmem:[#allocation54_spill] sm:$0xff]  ;;  %v3644_v37 = vsel %vm62_vm1, %v3249_v12, 0.0  ;;  %v3641_v10 = vsel %vm62_vm1, %v3248_v35, 0.0 }
 0x21f   :  { %v9372_v5 = vsel %vm5758_vm13, %v4651_v20, %v9147_v60  ;;  %3651 = vadd.xlane.f32.xlu1 %v3650_v61  ;;  %v5282_v55 = vrot.slane %v3916_v8, %v9108_v27  ;;  %6967 = vtanh.f32 %v10465_v22 }
 0x220   :  { %4023 = vadd.xlane.f32.xlu0 %v4022_v15  ;;  %6969 = vtanh.f32 %v10466_v7  ;;  %v6960_v20 = vpop.eup %6959  ;;  %v10468_v15 = vld [vmem:[#allocation56_spill] sm:$0xff] }
 0x221   :  { %v3544_v23 = vpop.xlane.xlu1 %3543  ;;  %v6962_v61 = vpop.eup %6961  ;;  %6971 = vtanh.f32 %v10467_v49 }
 0x222   :  { %v3910_v47 = vpop.xlane.xlu0 %3909  ;;  %6973 = vtanh.f32 %v10468_v15  ;;  %v6964_v16 = vpop.eup %6963  ;;  %v10471_v15 = vld [vmem:[#allocation58_spill] sm:$0xff] }
 0x223   :  { %v5272_v60 = vrot.slane %v3910_v47, %v9095_v0  ;;  %4026 = vadd.xlane.f32.xlu1 %v4025_v1  ;;  %v3377_v47 = vmul.f32 %v9040_v43, %v6960_v20  ;;  %v3378_v1 = vmul.f32 %v9040_v43, %v6962_v61  ;;  %6975 = vtanh.f32 %v10469_v18 }
 0x224   :  { %4017 = vadd.xlane.f32.xlu0 %v4016_v34  ;;  %v3382_v7 = vmul.f32 %v9040_v43, %v6964_v16 }
 0x225   :  { %v5273_v11 = vsel %vm4557_vm15, %v5272_v60, %v5268_v32  ;;  %v3538_v19 = vpop.xlane.xlu1 %3537  ;;  %v3647_v32 = vsel %vm62_vm1, %v3250_v44, 0.0  ;;  %v6966_v12 = vpop.eup %6965 }
 0x226   :  { %v5278_v28 = vsel %vm4564_vm0, %v5277_v52, %v5273_v11  ;;  %v3541_v33 = vpop.xlane.xlu0 %3540  ;;  %v4659_v4 = vrot.slane %v3538_v19, %v8673_v59  ;;  %v4669_v52 = vrot.slane %v3544_v23, %v8664_v13  ;;  %v3254_v20 = vmul.f32 %v9040_v43, %v6966_v12  ;;  %v10473_v12 = vld [vmem:[#allocation61_spill] sm:$0xff] }
 0x227   :  { %v5283_v54 = vsel %vm4571_vm2, %v5282_v55, %v5278_v28  ;;  %3645 = vadd.xlane.f32.xlu1 %v3644_v37  ;;  %v4664_v60 = vrot.slane %v3541_v33, %v8652_v42  ;;  %v10470_v55 = vld [vmem:[#allocation59_spill] sm:$0xff]  ;;  %v4028_v33 = vsel %vm62_vm1, %v3377_v47, 0.0  ;;  %v5296_v37 = vrot.slane %v9365_v62, %v8652_v42  ;;  %v10472_v62 = vld [vmem:[#allocation13_spill] sm:$0xff] }
 0x228   :  { %v9397_v8 = vsel %vm5758_vm13, %v5283_v54, %v9191_v39  ;;  %3648 = vadd.xlane.f32.xlu0 %v3647_v32  ;;  %v4034_v39 = vsel %vm62_vm1, %v3379_v48, 0.0  ;;  %6977 = vtanh.f32 %v10470_v55  ;;  %v4031_v48 = vsel %vm62_vm1, %v3378_v1, 0.0 }
 0x229   :  { %v3928_v30 = vpop.xlane.xlu1 %3927  ;;  %v6968_v23 = vpop.eup %6967  ;;  %6979 = vtanh.f32 %v10471_v15  ;;  %vm10485_vm13 = vcmask 786112  }
 0x22a   :  { %v3535_v50 = vpop.xlane.xlu0 %3534  ;;  %v6970_v32 = vpop.eup %6969  ;;  %v5301_v35 = vrot.slane %v3928_v30, %v8664_v13  ;;  %6981 = vtanh.f32 %v10472_v62  ;;  %v3255_v47 = vmul.f32 %v9040_v43, %v6968_v23 }
 0x22b   :  { %v4655_v17 = vrot.slane %v3535_v50, %v8661_v21  ;;  %4035 = vadd.xlane.f32.xlu1 %v4034_v39  ;;  %v4043_v39 = vsel %vm62_vm1, %v3382_v7, 0.0  ;;  %6983 = vtanh.f32 %v10473_v12 }
 0x22c   :  { %3642 = vadd.xlane.f32.xlu0 %v3641_v10  ;;  %v3252_v10 = vmul.f32 %v9040_v43, %v6970_v32  ;;  %v3662_v55 = vsel %vm62_vm1, %v3255_v47, 0.0 }
 0x22d   :  { %v4660_v34 = vsel %vm4473_vm3, %v4659_v4, %v4655_v17  ;;  %v3922_v44 = vpop.xlane.xlu1 %3921  ;;  %v6972_v17 = vpop.eup %6971 }
 0x22e   :  { %v4665_v11 = vsel %vm4480_vm4, %v4664_v60, %v4660_v34  ;;  %v5291_v19 = vrot.slane %v3922_v44, %v8673_v59  ;;  %v3919_v22 = vpop.xlane.xlu0 %3918  ;;  %v6974_v30 = vpop.eup %6973  ;;  %v3659_v60 = vsel %vm62_vm1, %v3254_v20, 0.0  ;;  %v10474_v34 = vld [vmem:[#allocation60_spill] sm:$0xff] }
 0x22f   :  { %v5287_v28 = vrot.slane %v3919_v22, %v8661_v21  ;;  %v4670_v54 = vsel %vm4487_vm5, %v4669_v52, %v4665_v11  ;;  %4029 = vadd.xlane.f32.xlu1 %v4028_v33  ;;  %v6976_v52 = vpop.eup %6975  ;;  %6985 = vtanh.f32 %v10474_v34  ;;  %v3253_v11 = vmul.f32 %v9040_v43, %v6974_v30  ;;  %v10475_v33 = vld [vmem:[#allocation14_spill] sm:$0xff] }
 0x230   :  { %4032 = vadd.xlane.f32.xlu0 %v4031_v48  ;;  %v3653_v22 = vsel %vm62_vm1, %v3252_v10, 0.0  ;;  %6987 = vtanh.f32 %v10475_v33  ;;  %v3383_v15 = vmul.f32 %v9040_v43, %v6976_v52  ;;  %v10477_v10 = vld [vmem:[#allocation62_spill] sm:$0xff] }
 0x231   :  { %v5292_v61 = vsel %vm4473_vm3, %v5291_v19, %v5287_v28  ;;  %v9426_v49 = vpop.xlane.xlu1 %3936  ;;  %v3380_v28 = vmul.f32 %v9040_v43, %v6972_v17 }
 0x232   :  { %v5297_v50 = vsel %vm4480_vm4, %v5296_v37, %v5292_v61  ;;  %v3553_v4 = vpop.xlane.xlu0 %3552  ;;  %v6978_v19 = vpop.eup %6977  ;;  %v10476_v37 = vld [vmem:[#allocation63_spill] sm:$0xff]  ;;  %v3656_v61 = vsel %vm62_vm1, %v3253_v11, 0.0  ;;  %v4046_v34 = vsel %vm62_vm1, %v3383_v15, 0.0  ;;  %v5316_v11 = vrot.slane %v9426_v49, %v8835_v38 }
 0x233   :  { %v5302_v16 = vsel %vm4487_vm5, %v5301_v35, %v5297_v50  ;;  %4044 = vadd.xlane.f32.xlu1 %v4043_v39  ;;  %6989 = vtanh.f32 %v10476_v37  ;;  %v4684_v32 = vrot.slane %v3553_v4, %v8835_v38  ;;  %v6980_v50 = vpop.eup %6979  ;;  %v4037_v62 = vsel %vm62_vm1, %v3380_v28, 0.0 }
 0x234   :  { %3660 = vadd.xlane.f32.xlu0 %v3659_v60  ;;  %v3258_v39 = vmul.f32 %v9040_v43, %v6978_v19  ;;  %v6982_v47 = vpop.eup %6981  ;;  %6991 = vtanh.f32 %v10477_v10 }
 0x235   :  { %v3556_v1 = vpop.xlane.xlu1 %3555  ;;  %v3256_v19 = vmul.f32 %v9040_v43, %v6982_v47  ;;  %v10482_v47 = vld [vmem:[#allocation68_spill] sm:$0xff] }
 0x236   :  { %v3547_v18 = vpop.xlane.xlu0 %3546  ;;  %v4689_v17 = vrot.slane %v3556_v1, %v8844_v57  ;;  %v10478_v1 = vld [vmem:[#allocation15_spill] sm:$0xff] }
 0x237   :  { %v4674_v44 = vrot.slane %v3547_v18, %v8817_v56  ;;  %3663 = vadd.xlane.f32.xlu1 %v3662_v55  ;;  %6993 = vtanh.f32 %v10478_v1  ;;  %v6984_v55 = vpop.eup %6983 }
 0x238   :  { %3654 = vadd.xlane.f32.xlu0 %v3653_v22 }
 0x239   :  { %v4675_v7 = vsel %vm4494_vm6, %v4674_v44, %v4670_v54  ;;  %v3550_v23 = vpop.xlane.xlu1 %3549  ;;  %v3381_v44 = vmul.f32 %v9040_v43, %v6980_v50  ;;  %v6986_v22 = vpop.eup %6985  ;;  %v9476_v43 = vld [vmem:[%s10256_s6] ss:$0 sm:$0xff]  ;;  %v3665_v50 = vsel %vm62_vm1, %v3256_v19, 0.0 }
 0x23a   :  { %v4679_v48 = vrot.slane %v3550_v23, %v8814_v53  ;;  %v3931_v20 = vpop.xlane.xlu0 %3930  ;;  %v10479_v23 = vld [vmem:[#allocation64_spill] sm:$0xff] }
 0x23b   :  { %v5306_v35 = vrot.slane %v3931_v20, %v8817_v56  ;;  %3657 = vadd.xlane.f32.xlu1 %v3656_v61  ;;  %6995 = vtanh.f32 %v10479_v23  ;;  %v6988_v20 = vpop.eup %6987  ;;  %v4040_v49 = vsel %vm62_vm1, %v3381_v44, 0.0 }
 0x23c   :  { %v4680_v54 = vsel %vm4501_vm7, %v4679_v48, %v4675_v7  ;;  %4038 = vadd.xlane.f32.xlu0 %v4037_v62  ;;  %v10481_v62 = vld [vmem:[#allocation9_spill] sm:$0xff] }
 0x23d   :  { %v4685_v30 = vsel %vm4508_vm8, %v4684_v32, %v4680_v54  ;;  %v5307_v4 = vsel %vm4494_vm6, %v5306_v35, %v5302_v16  ;;  %v3940_v60 = vpop.xlane.xlu1 %3939  ;;  %v3671_v16 = vsel %vm62_vm1, %v3258_v39, 0.0  ;;  %v10480_v32 = vld [vmem:[#allocation7_spill] sm:$0xff]  ;;  %v3259_v35 = vmul.f32 %v9476_v43, %v6984_v55  ;;  %v6990_v15 = vpop.eup %6989 }
 0x23e   :  { %v3934_v12 = vpop.xlane.xlu0 %3933  ;;  %v4690_v18 = vsel %vm4515_vm9, %v4689_v17, %v4685_v30  ;;  %v5321_v28 = vrot.slane %v3940_v60, %v8844_v57  ;;  %6997 = vtanh.f32 %v10480_v32  ;;  %v3386_v17 = vmul.f32 %v9476_v43, %v6986_v22  ;;  %v6992_v10 = vpop.eup %6991 }
 0x23f   :  { %v5311_v52 = vrot.slane %v3934_v12, %v8814_v53  ;;  %4047 = vadd.xlane.f32.xlu1 %v4046_v34  ;;  %6999 = vtanh.f32 %v10481_v62  ;;  %v3384_v60 = vmul.f32 %v9476_v43, %v6988_v20 }
 0x240   :  { %3672 = vadd.xlane.f32.xlu0 %v3671_v16  ;;  %7001 = vtanh.f32 %v10482_v47  ;;  %v4055_v1 = vsel %vm62_vm1, %v3386_v17, 0.0  ;;  %v10483_v16 = vld [vmem:[#allocation65_spill] sm:$0xff]  ;;  %v10487_v17 = vld [vmem:[#allocation18_spill] sm:$0xff] }
 0x241   :  { %v5312_v33 = vsel %vm4501_vm7, %v5311_v52, %v5307_v4  ;;  %v3568_v7 = vpop.xlane.xlu1 %3567  ;;  %v3674_v4 = vsel %vm62_vm1, %v3259_v35, 0.0  ;;  %v3387_v52 = vmul.f32 %v9476_v43, %v6990_v15  ;;  %v6994_v34 = vpop.eup %6993  ;;  %7003 = vtanh.f32 %v10483_v16  ;;  %v10486_v15 = vld [vmem:[#allocation16_spill] sm:$0xff] }
 0x242   :  { %v5317_v37 = vsel %vm4508_vm8, %v5316_v11, %v5312_v33  ;;  %v3565_v48 = vpop.xlane.xlu0 %3564  ;;  %v4709_v19 = vrot.slane %v3568_v7, %v8966_v46  ;;  %v10484_v33 = vld [vmem:[#allocation17_spill] sm:$0xff]  ;;  %v4049_v23 = vsel %vm62_vm1, %v3384_v60, 0.0  ;;  %v3262_v32 = vmul.f32 %v9476_v43, %v6994_v34  ;;  %v10488_v34 = vld [vmem:[#allocation66_spill] sm:$0xff] }
 0x243   :  { %v5322_v61 = vsel %vm4515_vm9, %v5321_v28, %v5317_v37  ;;  %4041 = vadd.xlane.f32.xlu1 %v4040_v49  ;;  %v4704_v44 = vrot.slane %v3565_v48, %v8969_v36  ;;  %7005 = vtanh.f32 %v10484_v33  ;;  %v3257_v37 = vmul.f32 %v9476_v43, %v6992_v10 }
 0x244   :  { %3666 = vadd.xlane.f32.xlu0 %v3665_v50  ;;  %7007 = vtanh.f32 %v10486_v15 }
 0x245   :  { %v3562_v54 = vpop.xlane.xlu1 %3561  ;;  %v6996_v48 = vpop.eup %6995  ;;  %7009 = vtanh.f32 %v10487_v17  ;;  %v3668_v62 = vsel %vm62_vm1, %v3257_v37, 0.0 }
 0x246   :  { %v3559_v39 = vpop.xlane.xlu0 %3558  ;;  %v4699_v12 = vrot.slane %v3562_v54, %v8936_v51  ;;  %7011 = vtanh.f32 %v10488_v34 }
 0x247   :  { %v4694_v30 = vrot.slane %v3559_v39, %v8946_v41  ;;  %3675 = vadd.xlane.f32.xlu1 %v3674_v4  ;;  %v3385_v39 = vmul.f32 %v9476_v43, %v6996_v48  ;;  %v3683_v4 = vsel %vm62_vm1, %v3262_v32, 0.0 }
 0x248   :  { %4056 = vadd.xlane.f32.xlu0 %v4055_v1  ;;  %v6998_v7 = vpop.eup %6997 }
 0x249   :  { %v4695_v55 = vsel %vm4522_vm10, %v4694_v30, %v4690_v18  ;;  %v3952_v11 = vpop.xlane.xlu1 %3951  ;;  %v4058_v18 = vsel %vm62_vm1, %v3387_v52, 0.0  ;;  %v7000_v47 = vpop.eup %6999  ;;  %v3260_v60 = vmul.f32 %v9476_v43, %v6998_v7  ;;  %v10491_v7 = vld [vmem:[#allocation69_spill] sm:$0xff] }
 0x24a   :  { %v4700_v22 = vsel %vm4529_vm11, %v4699_v12, %v4695_v55  ;;  %v3949_v28 = vpop.xlane.xlu0 %3948  ;;  %v7002_v10 = vpop.eup %7001  ;;  %v3390_v33 = vmul.f32 %v9476_v43, %v7000_v47 }
 0x24b   :  { %v4705_v20 = vsel %vm4536_vm12, %v4704_v44, %v4700_v22  ;;  %4050 = vadd.xlane.f32.xlu1 %v4049_v23  ;;  %v5336_v12 = vrot.slane %v3949_v28, %v8969_v36  ;;  %v5341_v44 = vrot.slane %v3952_v11, %v8966_v46  ;;  %v4052_v22 = vsel %vm62_vm1, %v3385_v39, 0.0  ;;  %v7004_v23 = vpop.eup %7003 }
 0x24c   :  { %v4710_v49 = vsel %vm10485_vm13, %v4709_v19, %v4705_v20  ;;  %4059 = vadd.xlane.f32.xlu0 %v4058_v18  ;;  %v10489_v19 = vld [vmem:[#allocation19_spill] sm:$0xff]  ;;  %v3391_v20 = vmul.f32 %v9476_v43, %v7002_v10  ;;  %v10490_v18 = vld [vmem:[#allocation70_spill] sm:$0xff]  ;;  %v4067_v15 = vsel %vm62_vm1, %v3390_v33, 0.0  ;;  %v10494_v33 = vld [vmem:[#allocation20_spill] sm:$0xff] }
 0x24d   :  { %v3946_v35 = vpop.xlane.xlu1 %3945  ;;  %7013 = vtanh.f32 %v10489_v19  ;;  %v7006_v11 = vpop.eup %7005 }
 0x24e   :  { %v3943_v50 = vpop.xlane.xlu0 %3942  ;;  %v5331_v30 = vrot.slane %v3946_v35, %v8936_v51  ;;  %7015 = vtanh.f32 %v10490_v18  ;;  %v7008_v17 = vpop.eup %7007 }
 0x24f   :  { %v5326_v54 = vrot.slane %v3943_v50, %v8946_v41  ;;  %3669 = vadd.xlane.f32.xlu1 %v3668_v62  ;;  %7017 = vtanh.f32 %v10491_v7  ;;  %v3263_v50 = vmul.f32 %v9476_v43, %v7004_v23  ;;  %v3389_v62 = vmul.f32 %v9476_v43, %v7006_v11  ;;  %v7010_v39 = vpop.eup %7009  ;;  %v10495_v23 = vld [vmem:[#allocation21_spill] sm:$0xff] }
 0x250   :  { %3684 = vadd.xlane.f32.xlu0 %v3683_v4  ;;  %v10492_v4 = vld [vmem:[#allocation72_spill] sm:$0xff]  ;;  %v3388_v34 = vmul.f32 %v9476_v43, %v7008_v17  ;;  %v3266_v19 = vmul.f32 %v9476_v43, %v7010_v39 }
 0x251   :  { %v5327_v1 = vsel %vm4522_vm10, %v5326_v54, %v5322_v61  ;;  %v9512_v52 = vpop.xlane.xlu1 %3960  ;;  %v3677_v61 = vsel %vm62_vm1, %v3260_v60, 0.0  ;;  %v4070_v54 = vsel %vm62_vm1, %v3391_v20, 0.0  ;;  %7019 = vtanh.f32 %v10492_v4  ;;  %v10497_v4 = vld [vmem:[#allocation6_spill] sm:$0xff] }
 0x252   :  { %v5332_v55 = vsel %vm4529_vm11, %v5331_v30, %v5327_v1  ;;  %v3577_v16 = vpop.xlane.xlu0 %3576  ;;  %v3686_v1 = vsel %vm62_vm1, %v3263_v50, 0.0 }
 0x253   :  { %v5337_v28 = vsel %vm4536_vm12, %v5336_v12, %v5332_v55  ;;  %4053 = vadd.xlane.f32.xlu1 %v4052_v22  ;;  %v10493_v12 = vld [vmem:[#allocation71_spill] sm:$0xff]  ;;  %v4724_v11 = vrot.slane %v3577_v16, %v9114_v25  ;;  %v10496_v16 = vld [vmem:[#allocation73_spill] sm:$0xff] }
 0x254   :  { %v5342_v37 = vsel %vm10485_vm13, %v5341_v44, %v5337_v28  ;;  %3678 = vadd.xlane.f32.xlu0 %v3677_v61  ;;  %7021 = vtanh.f32 %v10493_v12  ;;  %v7012_v44 = vpop.eup %7011  ;;  %vm5760_vm13 = vcmask 1042434  }
 0x255   :  { %v3580_v48 = vpop.xlane.xlu1 %3579  ;;  %7023 = vtanh.f32 %v10494_v33  ;;  %v3261_v18 = vmul.f32 %v9476_v43, %v7012_v44 }
 0x256   :  { %v3571_v32 = vpop.xlane.xlu0 %3570  ;;  %7025 = vtanh.f32 %v10495_v23  ;;  %v4729_v7 = vrot.slane %v3580_v48, %v9108_v27  ;;  %v5356_v23 = vrot.slane %v9512_v52, %v9114_v25 }
 0x257   :  { %v4714_v35 = vrot.slane %v3571_v32, %v9087_v58  ;;  %4068 = vadd.xlane.f32.xlu1 %v4067_v15  ;;  %v7014_v22 = vpop.eup %7013  ;;  %v3695_v15 = vsel %vm62_vm1, %v3266_v19, 0.0  ;;  %7027 = vtanh.f32 %v10496_v16  ;;  %v10498_v19 = vld [vmem:[#allocation23_spill] sm:$0xff]  ;;  %v10501_v16 = vld [vmem:[#allocation74_spill] sm:$0xff] }
 0x258   :  { %4071 = vadd.xlane.f32.xlu0 %v4070_v54  ;;  %v7016_v32 = vpop.eup %7015  ;;  %v3264_v50 = vmul.f32 %v9476_v43, %v7014_v22  ;;  %7029 = vtanh.f32 %v10497_v4 }
 0x259   :  { %v4715_v47 = vsel %vm4550_vm14, %v4714_v35, %v4710_v49  ;;  %v3955_v30 = vpop.xlane.xlu1 %3954  ;;  %v4064_v49 = vsel %vm62_vm1, %v3389_v62, 0.0  ;;  %v7018_v17 = vpop.eup %7017  ;;  %7031 = vtanh.f32 %v10498_v19  ;;  %v10503_v19 = vld [vmem:[#allocation76_spill] sm:$0xff] }
 0x25a   :  { %v5346_v60 = vrot.slane %v3955_v30, %v9087_v58  ;;  %v9534_v10 = vpop.xlane.xlu0 %3588 }
 0x25b   :  { %3687 = vadd.xlane.f32.xlu1 %v3686_v1  ;;  %v7020_v12 = vpop.eup %7019  ;;  %v3689_v1 = vsel %vm62_vm1, %v3264_v50, 0.0 }
 0x25c   :  { %v5347_v55 = vsel %vm4550_vm14, %v5346_v60, %v5342_v37  ;;  %4065 = vadd.xlane.f32.xlu0 %v4064_v49  ;;  %v4061_v37 = vsel %vm62_vm1, %v3388_v34, 0.0  ;;  %v3267_v60 = vmul.f32 %v9476_v43, %v7016_v32  ;;  %v3394_v34 = vmul.f32 %v9476_v43, %v7018_v17  ;;  %v10500_v17 = vld [vmem:[#allocation75_spill] sm:$0xff] }
 0x25d   :  { %v3574_v28 = vpop.xlane.xlu1 %3573 }
 0x25e   :  { %v4719_v61 = vrot.slane %v3574_v28, %v9095_v0  ;;  %v9545_v20 = vpop.xlane.xlu0 %3582  ;;  %v7022_v44 = vpop.eup %7021  ;;  %v10499_v28 = vld [vmem:[#allocation22_spill] sm:$0xff] }
 0x25f   :  { %4062 = vadd.xlane.f32.xlu1 %v4061_v37  ;;  %7033 = vtanh.f32 %v10499_v28 }
 0x260   :  { %v4720_v35 = vsel %vm4557_vm15, %v4719_v61, %v4715_v47  ;;  %3696 = vadd.xlane.f32.xlu0 %v3695_v15  ;;  %v3680_v47 = vsel %vm62_vm1, %v3261_v18, 0.0  ;;  %v3698_v61 = vsel %vm62_vm1, %v3267_v60, 0.0  ;;  %7035 = vtanh.f32 %v10500_v17 }
 0x261   :  { %v4725_v54 = vsel %vm4564_vm0, %v4724_v11, %v4720_v35  ;;  %v3964_v62 = vpop.xlane.xlu1 %3963  ;;  %v3265_v11 = vmul.f32 %v9476_v43, %v7020_v12  ;;  %v3392_v35 = vmul.f32 %v9476_v43, %v7022_v44  ;;  %7037 = vtanh.f32 %v10501_v16 }
 0x262   :  { %v4730_v39 = vsel %vm4571_vm2, %v4729_v7, %v4725_v54  ;;  %v9557_v30 = vpop.xlane.xlu0 %3972  ;;  %v5361_v18 = vrot.slane %v3964_v62, %v9108_v27  ;;  %v4079_v7 = vsel %vm62_vm1, %v3394_v34, 0.0  ;;  %v10502_v34 = vld [vmem:[#allocation82_spill] sm:$0xff]  ;;  %v4734_v44 = vrot.slane %v9545_v20, %v8661_v21 }
 0x263   :  { %v9562_v48 = vsel %vm5760_vm13, %v4730_v39, %v9372_v5  ;;  %3681 = vadd.xlane.f32.xlu1 %v3680_v47  ;;  %v7024_v5 = vpop.eup %7023  ;;  %v3692_v62 = vsel %vm62_vm1, %v3265_v11, 0.0  ;;  %v4073_v47 = vsel %vm62_vm1, %v3392_v35, 0.0  ;;  %7039 = vtanh.f32 %v10502_v34  ;;  %v10504_v35 = vld [vmem:[#allocation83_spill] sm:$0xff] }
 0x264   :  { %3690 = vadd.xlane.f32.xlu0 %v3689_v1  ;;  %v7026_v37 = vpop.eup %7025  ;;  %v3395_v39 = vmul.f32 %v9476_v43, %v7024_v5  ;;  %7041 = vtanh.f32 %v10503_v19  ;;  %v5375_v19 = vrot.slane %v9557_v30, %v8652_v42  ;;  %v10508_v30 = vld [vmem:[#allocation89_spill] sm:$0xff] }
 0x265   :  { %v3958_v49 = vpop.xlane.xlu1 %3957  ;;  %v7028_v4 = vpop.eup %7027  ;;  %v3270_v60 = vmul.f32 %v9476_v43, %v7026_v37  ;;  %7043 = vtanh.f32 %v10504_v35  ;;  %v10509_v35 = vld [vmem:[#allocation81_spill] sm:$0xff] }
 0x266   :  { %v5351_v22 = vrot.slane %v3958_v49, %v9095_v0  ;;  %v9570_v33 = vpop.xlane.xlu0 %3966  ;;  %v7030_v12 = vpop.eup %7029  ;;  %v4082_v5 = vsel %vm62_vm1, %v3395_v39, 0.0  ;;  %v3393_v28 = vmul.f32 %v9476_v43, %v7028_v4 }
 0x267   :  { %3699 = vadd.xlane.f32.xlu1 %v3698_v61  ;;  %v3707_v20 = vsel %vm62_vm1, %v3270_v60, 0.0  ;;  %v3268_v37 = vmul.f32 %v9476_v43, %v7030_v12  ;;  %v5366_v34 = vrot.slane %v9570_v33, %v8661_v21 }
 0x268   :  { %v5352_v32 = vsel %vm4557_vm15, %v5351_v22, %v5347_v55  ;;  %4080 = vadd.xlane.f32.xlu0 %v4079_v7  ;;  %v4743_v22 = vrot.slane %v9534_v10, %v8652_v42  ;;  %v4076_v16 = vsel %vm62_vm1, %v3393_v28, 0.0 }
 0x269   :  { %v5357_v15 = vsel %vm4564_vm0, %v5356_v23, %v5352_v32  ;;  %v3592_v50 = vpop.xlane.xlu1 %3591  ;;  %v7032_v23 = vpop.eup %7031  ;;  %v3701_v4 = vsel %vm62_vm1, %v3268_v37, 0.0 }
 0x26a   :  { %v5362_v52 = vsel %vm4571_vm2, %v5361_v18, %v5357_v15  ;;  %v9584_v54 = vpop.xlane.xlu0 %3600  ;;  %v4748_v61 = vrot.slane %v3592_v50, %v8664_v13  ;;  %v7034_v18 = vpop.eup %7033  ;;  %v10505_v50 = vld [vmem:[#allocation77_spill] sm:$0xff] }
 0x26b   :  { %v9589_v55 = vsel %vm5760_vm13, %v5362_v52, %v9397_v8  ;;  %3693 = vadd.xlane.f32.xlu1 %v3692_v62  ;;  %7045 = vtanh.f32 %v10505_v50  ;;  %v3271_v62 = vmul.f32 %v9476_v43, %v7032_v23  ;;  %v7036_v39 = vpop.eup %7035  ;;  %vm10522_vm13 = vcmask 786112  }
 0x26c   :  { %4074 = vadd.xlane.f32.xlu0 %v4073_v47  ;;  %v3398_v47 = vmul.f32 %v9476_v43, %v7034_v18  ;;  %v7038_v60 = vpop.eup %7037 }
 0x26d   :  { %v3586_v1 = vpop.xlane.xlu1 %3585  ;;  %v7040_v28 = vpop.eup %7039 }
 0x26e   :  { %v4738_v8 = vrot.slane %v3586_v1, %v8673_v59  ;;  %v3595_v49 = vpop.xlane.xlu0 %3594  ;;  %v10506_v1 = vld [vmem:[#allocation86_spill] sm:$0xff]  ;;  %v4091_v33 = vsel %vm62_vm1, %v3398_v47, 0.0 }
 0x26f   :  { %4083 = vadd.xlane.f32.xlu1 %v4082_v5  ;;  %v4753_v7 = vrot.slane %v3595_v49, %v8817_v56  ;;  %7047 = vtanh.f32 %v10506_v1  ;;  %v10507_v49 = vld [vmem:[#allocation80_spill] sm:$0xff]  ;;  %v3269_v5 = vmul.f32 %v9476_v43, %v7036_v39  ;;  %v10510_v47 = vld [vmem:[#allocation10_spill] sm:$0xff]  ;;  %v10511_v1 = vld [vmem:[#allocation85_spill] sm:$0xff] }
 0x270   :  { %v4739_v11 = vsel %vm4473_vm3, %v4738_v8, %v4734_v44  ;;  %3708 = vadd.xlane.f32.xlu0 %v3707_v20  ;;  %7049 = vtanh.f32 %v10507_v49  ;;  %v7042_v20 = vpop.eup %7041 }
 0x271   :  { %v4744_v32 = vsel %vm4480_vm4, %v4743_v22, %v4739_v11  ;;  %v3976_v10 = vpop.xlane.xlu1 %3975  ;;  %v3710_v22 = vsel %vm62_vm1, %v3271_v62, 0.0  ;;  %v3396_v11 = vmul.f32 %v9476_v43, %v7038_v60  ;;  %7051 = vtanh.f32 %v10508_v30  ;;  %v7044_v50 = vpop.eup %7043  ;;  %v10513_v30 = vld [vmem:[#allocation24_spill] sm:$0xff] }
 0x272   :  { %v4749_v15 = vsel %vm4487_vm5, %v4748_v61, %v4744_v32  ;;  %v9612_v17 = vpop.xlane.xlu0 %3984  ;;  %v5380_v23 = vrot.slane %v3976_v10, %v8664_v13  ;;  %7053 = vtanh.f32 %v10509_v35  ;;  %v3704_v10 = vsel %vm62_vm1, %v3269_v5, 0.0 }
 0x273   :  { %v9616_v52 = vsel %vm4494_vm6, %v4753_v7, %v4749_v15  ;;  %4077 = vadd.xlane.f32.xlu1 %v4076_v16  ;;  %v3402_v15 = vmul.f32 %v9476_v43, %v7040_v28  ;;  %v4085_v16 = vsel %vm62_vm1, %v3396_v11, 0.0  ;;  %v3399_v62 = vmul.f32 %v9476_v43, %v7042_v20 }
 0x274   :  { %3702 = vadd.xlane.f32.xlu0 %v3701_v4  ;;  %7055 = vtanh.f32 %v10510_v47  ;;  %v3275_v49 = vmul.f32 %v9476_v43, %v7044_v50  ;;  %v10514_v47 = vld [vmem:[#allocation8_spill] sm:$0xff] }
 0x275   :  { %v3970_v12 = vpop.xlane.xlu1 %3969  ;;  %v7046_v39 = vpop.eup %7045  ;;  %7057 = vtanh.f32 %v10511_v1  ;;  %v4094_v28 = vsel %vm62_vm1, %v3399_v62, 0.0 }
 0x276   :  { %v5370_v44 = vrot.slane %v3970_v12, %v8673_v59  ;;  %v3982_v8 = vpop.xlane.xlu0 %3981  ;;  %v3722_v35 = vsel %vm62_vm1, %v3275_v49, 0.0 }
 0x277   :  { %3711 = vadd.xlane.f32.xlu1 %v3710_v22  ;;  %v5395_v22 = vrot.slane %v9612_v17, %v8835_v38 }
 0x278   :  { %v5371_v61 = vsel %vm4473_vm3, %v5370_v44, %v5366_v34  ;;  %4092 = vadd.xlane.f32.xlu0 %v4091_v33  ;;  %v5390_v34 = vrot.slane %v3982_v8, %v8814_v53  ;;  %v4103_v44 = vsel %vm62_vm1, %v3402_v15, 0.0  ;;  %v10512_v8 = vld [vmem:[#allocation90_spill] sm:$0xff] }
 0x279   :  { %v5376_v37 = vsel %vm4480_vm4, %v5375_v19, %v5371_v61  ;;  %v3604_v18 = vpop.xlane.xlu1 %3603  ;;  %v7048_v19 = vpop.eup %7047  ;;  %7059 = vtanh.f32 %v10512_v8 }
 0x27a   :  { %v9637_v32 = vpop.xlane.xlu0 %3612  ;;  %v5381_v7 = vsel %vm4487_vm5, %v5380_v23, %v5376_v37  ;;  %v3397_v23 = vmul.f32 %v9476_v43, %v7046_v39  ;;  %v7050_v61 = vpop.eup %7049  ;;  %7061 = vtanh.f32 %v10513_v30  ;;  %v4768_v50 = vrot.slane %v3604_v18, %v8844_v57  ;;  %v10517_v30 = vld [vmem:[#allocation91_spill] sm:$0xff] }
 0x27b   :  { %3705 = vadd.xlane.f32.xlu1 %v3704_v10  ;;  %v3273_v10 = vmul.f32 %v9476_v43, %v7048_v19  ;;  %v7052_v15 = vpop.eup %7051  ;;  %v3274_v39 = vmul.f32 %v9476_v43, %v7050_v61  ;;  %7063 = vtanh.f32 %v10514_v47 }
 0x27c   :  { %4086 = vadd.xlane.f32.xlu0 %v4085_v16  ;;  %v4088_v62 = vsel %vm62_vm1, %v3397_v23, 0.0 }
 0x27d   :  { %v3979_v4 = vpop.xlane.xlu1 %3978  ;;  %v3716_v19 = vsel %vm62_vm1, %v3273_v10, 0.0  ;;  %v3719_v23 = vsel %vm62_vm1, %v3274_v39, 0.0  ;;  %v10518_v39 = vld [vmem:[#allocation94_spill] sm:$0xff] }
 0x27e   :  { %v5385_v60 = vrot.slane %v3979_v4, %v8817_v56  ;;  %v3607_v12 = vpop.xlane.xlu0 %3606  ;;  %v7054_v4 = vpop.eup %7053 }
 0x27f   :  { %4104 = vadd.xlane.f32.xlu1 %v4103_v44  ;;  %v3272_v61 = vmul.f32 %v9476_v43, %v7054_v4 }
 0x280   :  { %v5386_v5 = vsel %vm4494_vm6, %v5385_v60, %v5381_v7  ;;  %4095 = vadd.xlane.f32.xlu0 %v4094_v28  ;;  %v4763_v7 = vrot.slane %v9584_v54, %v8835_v38  ;;  %v4773_v54 = vrot.slane %v3607_v12, %v8946_v41  ;;  %v7056_v12 = vpop.eup %7055 }
 0x281   :  { %v5391_v33 = vsel %vm4501_vm7, %v5390_v34, %v5386_v5  ;;  %v3598_v11 = vpop.xlane.xlu1 %3597  ;;  %v10515_v34 = vld [vmem:[#allocation92_spill] sm:$0xff]  ;;  %v3406_v10 = vmul.f32 %v9476_v43, %v7056_v12  ;;  %v10520_v12 = vld [vmem:[#allocation95_spill] sm:$0xff] }
 0x282   :  { %v4758_v20 = vrot.slane %v3598_v11, %v8814_v53  ;;  %v9659_v37 = vpop.xlane.xlu0 %3996  ;;  %v5396_v17 = vsel %vm4508_vm8, %v5395_v22, %v5391_v33  ;;  %7065 = vtanh.f32 %v10515_v34  ;;  %v3401_v22 = vmul.f32 %v9476_v43, %v7052_v15  ;;  %v7058_v33 = vpop.eup %7057  ;;  %v10516_v11 = vld [vmem:[#allocation93_spill] sm:$0xff] }
 0x283   :  { %3723 = vadd.xlane.f32.xlu1 %v3722_v35  ;;  %7067 = vtanh.f32 %v10516_v11  ;;  %v3713_v15 = vsel %vm62_vm1, %v3272_v61, 0.0  ;;  %v4115_v34 = vsel %vm62_vm1, %v3406_v10, 0.0 }
 0x284   :  { %v4759_v16 = vsel %vm4501_vm7, %v4758_v20, %v9616_v52  ;;  %4089 = vadd.xlane.f32.xlu0 %v4088_v62  ;;  %7069 = vtanh.f32 %v10517_v30  ;;  %v4100_v35 = vsel %vm62_vm1, %v3401_v22, 0.0 }
 0x285   :  { %v4764_v60 = vsel %vm4508_vm8, %v4763_v7, %v4759_v16  ;;  %v3988_v1 = vpop.xlane.xlu1 %3987  ;;  %7071 = vtanh.f32 %v10518_v39 }
 0x286   :  { %v5400_v18 = vrot.slane %v3988_v1, %v8844_v57  ;;  %v3991_v44 = vpop.xlane.xlu0 %3990  ;;  %v4769_v52 = vsel %vm4515_vm9, %v4768_v50, %v4764_v60  ;;  %v3400_v50 = vmul.f32 %v9476_v43, %v7058_v33  ;;  %v10519_v60 = vld [vmem:[#allocation25_spill] sm:$0xff]  ;;  %v4783_v1 = vrot.slane %v9637_v32, %v8969_v36 }
 0x287   :  { %v5405_v49 = vrot.slane %v3991_v44, %v8946_v41  ;;  %v4774_v5 = vsel %vm4522_vm10, %v4773_v54, %v4769_v52  ;;  %3717 = vadd.xlane.f32.xlu1 %v3716_v19  ;;  %7073 = vtanh.f32 %v10519_v60  ;;  %v10521_v32 = vld [vmem:[#allocation97_spill] sm:$0xff]  ;;  %v10523_v60 = vld [vmem:[#allocation99_spill] sm:$0xff] }
 0x288   :  { %v5401_v28 = vsel %vm4515_vm9, %v5400_v18, %v5396_v17  ;;  %3720 = vadd.xlane.f32.xlu0 %v3719_v23  ;;  %v7060_v17 = vpop.eup %7059  ;;  %v4097_v19 = vsel %vm62_vm1, %v3400_v50, 0.0  ;;  %7075 = vtanh.f32 %v10520_v12  ;;  %v10526_v12 = vld [vmem:[#allocation100_spill] sm:$0xff] }
 0x289   :  { %v5406_v8 = vsel %vm4522_vm10, %v5405_v49, %v5401_v28  ;;  %v3616_v20 = vpop.xlane.xlu1 %3615  ;;  %v7062_v16 = vpop.eup %7061  ;;  %v3279_v18 = vmul.f32 %v9476_v43, %v7060_v17  ;;  %7077 = vtanh.f32 %v10521_v32 }
 0x28a   :  { %v4000_v7 = vpop.xlane.xlu0 %3999  ;;  %v7064_v54 = vpop.eup %7063  ;;  %v4788_v52 = vrot.slane %v3616_v20, %v8966_v46  ;;  %v3278_v22 = vmul.f32 %v9476_v43, %v7062_v16  ;;  %7079 = vtanh.f32 %v10523_v60 }
 0x28b   :  { %4101 = vadd.xlane.f32.xlu1 %v4100_v35  ;;  %v3734_v35 = vsel %vm62_vm1, %v3279_v18, 0.0  ;;  %v10524_v18 = vld [vmem:[#allocation96_spill] sm:$0xff] }
 0x28c   :  { %3714 = vadd.xlane.f32.xlu0 %v3713_v15  ;;  %v7066_v44 = vpop.eup %7065  ;;  %v5420_v15 = vrot.slane %v4000_v7, %v8966_v46  ;;  %v3731_v16 = vsel %vm62_vm1, %v3278_v22, 0.0  ;;  %7081 = vtanh.f32 %v10524_v18 }
 0x28d   :  { %v3610_v62 = vpop.xlane.xlu1 %3609  ;;  %v7068_v20 = vpop.eup %7067  ;;  %v3277_v10 = vmul.f32 %v9476_v43, %v7066_v44 }
 0x28e   :  { %v4778_v4 = vrot.slane %v3610_v62, %v8936_v51  ;;  %v9694_v47 = vpop.xlane.xlu0 %3624  ;;  %v7070_v17 = vpop.eup %7069  ;;  %v3276_v62 = vmul.f32 %v9476_v43, %v7064_v54  ;;  %v3407_v7 = vmul.f32 %v9476_v43, %v7068_v20 }
 0x28f   :  { %4116 = vadd.xlane.f32.xlu1 %v4115_v34  ;;  %v3404_v44 = vmul.f32 %v9476_v43, %v7070_v17  ;;  %v7072_v54 = vpop.eup %7071 }
 0x290   :  { %v4779_v49 = vsel %vm4529_vm11, %v4778_v4, %v4774_v5  ;;  %4098 = vadd.xlane.f32.xlu0 %v4097_v19  ;;  %v5415_v5 = vrot.slane %v9659_v37, %v8969_v36  ;;  %v10525_v19 = vld [vmem:[#allocation98_spill] sm:$0xff]  ;;  %v4118_v32 = vsel %vm62_vm1, %v3407_v7, 0.0 }
 0x291   :  { %v4784_v28 = vsel %vm4536_vm12, %v4783_v1, %v4779_v49  ;;  %v3994_v23 = vpop.xlane.xlu1 %3993  ;;  %v7074_v49 = vpop.eup %7073  ;;  %7083 = vtanh.f32 %v10525_v19  ;;  %v4109_v20 = vsel %vm62_vm1, %v3404_v44, 0.0 }
 0x292   :  { %v5410_v61 = vrot.slane %v3994_v23, %v8936_v51  ;;  %v4789_v33 = vsel %vm10522_vm13, %v4788_v52, %v4784_v28  ;;  %v3619_v11 = vpop.xlane.xlu0 %3618  ;;  %v3725_v52 = vsel %vm62_vm1, %v3276_v62, 0.0  ;;  %7085 = vtanh.f32 %v10526_v12  ;;  %v10528_v62 = vld [vmem:[#allocation102_spill] sm:$0xff] }
 0x293   :  { %v4793_v30 = vrot.slane %v3619_v11, %v9087_v58  ;;  %3735 = vadd.xlane.f32.xlu1 %v3734_v35  ;;  %v3282_v17 = vmul.f32 %v9476_v43, %v7074_v49 }
 0x294   :  { %v5411_v50 = vsel %vm4529_vm11, %v5410_v61, %v5406_v8  ;;  %3732 = vadd.xlane.f32.xlu0 %v3731_v16  ;;  %v3728_v8 = vsel %vm62_vm1, %v3277_v10, 0.0  ;;  %v7076_v61 = vpop.eup %7075 }
 0x295   :  { %v5416_v39 = vsel %vm4536_vm12, %v5415_v5, %v5411_v50  ;;  %v4794_v37 = vsel %vm4550_vm14, %v4793_v30, %v4789_v33  ;;  %v3628_v4 = vpop.xlane.xlu1 %3627  ;;  %v4803_v33 = vrot.slane %v9694_v47, %v9114_v25  ;;  %v3405_v5 = vmul.f32 %v9476_v43, %v7072_v54  ;;  %v7078_v30 = vpop.eup %7077 }
 0x296   :  { %v4009_v1 = vpop.xlane.xlu0 %4008  ;;  %v5421_v34 = vsel %vm10522_vm13, %v5420_v15, %v5416_v39  ;;  %v4808_v35 = vrot.slane %v3628_v4, %v9108_v27  ;;  %vm5762_vm13 = vcmask 1043459   ;;  %v10527_v15 = vld [vmem:[#allocation101_spill] sm:$0xff]  ;;  %v3283_v18 = vmul.f32 %v9476_v43, %v7078_v30 }
 0x297   :  { %3729 = vadd.xlane.f32.xlu1 %v3728_v8  ;;  %7087 = vtanh.f32 %v10527_v15  ;;  %v4112_v7 = vsel %vm62_vm1, %v3405_v5, 0.0  ;;  %v7080_v8 = vpop.eup %7079  ;;  %v3743_v44 = vsel %vm62_vm1, %v3282_v17, 0.0  ;;  %v3280_v54 = vmul.f32 %v9476_v43, %v7076_v61 }
 0x298   :  { %3726 = vadd.xlane.f32.xlu0 %v3725_v52  ;;  %7089 = vtanh.f32 %v10528_v62  ;;  %v7082_v52 = vpop.eup %7081  ;;  %v3281_v61 = vmul.f32 %v9476_v43, %v7080_v8 }
 0x299   :  { %v3622_v22 = vpop.xlane.xlu1 %3621  ;;  %7091 = vtanh.f32 %v8957_v29 }
 0x29a   :  { %v4798_v28 = vrot.slane %v3622_v22, %v9095_v0  ;;  %v4003_v23 = vpop.xlane.xlu0 %4002  ;;  %v7218_v22 = vmov 0   ;;  %7093 = vtanh.f32 %v8951_v63 }
 0x29b   :  { %v5425_v11 = vrot.slane %v4003_v23, %v9087_v58  ;;  %4119 = vadd.xlane.f32.xlu1 %v4118_v32  ;;  %6528 = vset.pattern.permute.xlu0 %v7218_v22  ;;  %v3746_v32 = vsel %vm62_vm1, %v3283_v18, 0.0  ;;  %7095 = vtanh.f32 %v8960_v24 }
 0x29c   :  { %v4799_v10 = vsel %vm4557_vm15, %v4798_v28, %v4794_v37  ;;  %4110 = vadd.xlane.f32.xlu0 %v4109_v20  ;;  %6529 = vset.pattern.permute.xlu1 %v7218_v22  ;;  %v3410_v20 = vmul.f32 %v9476_v43, %v7082_v52  ;;  %7097 = vtanh.f32 %v9005_v9  ;;  %v10530_v52 = vld [vmem:[#allocation104_spill] sm:$0xff] }
 0x29d   :  { %v4804_v50 = vsel %vm4564_vm0, %v4803_v33, %v4799_v10  ;;  %v5426_v47 = vsel %vm4550_vm14, %v5425_v11, %v5421_v34  ;;  %v4012_v16 = vpop.xlane.xlu1 %4011  ;;  %v5435_v34 = vrot.slane %v4009_v1, %v9114_v25  ;;  %v7084_v1 = vpop.eup %7083  ;;  %v3737_v11 = vsel %vm62_vm1, %v3280_v54, 0.0 }
 0x29e   :  { %v4809_v39 = vsel %vm4571_vm2, %v4808_v35, %v4804_v50  ;;  %v4006_v60 = vpop.xlane.xlu0 %4005  ;;  %v5440_v49 = vrot.slane %v4012_v16, %v9108_v27  ;;  %v7086_v33 = vpop.eup %7085  ;;  %v3740_v35 = vsel %vm62_vm1, %v3281_v61, 0.0  ;;  %v4127_v15 = vsel %vm62_vm1, %v3410_v20, 0.0 }
 0x29f   :  { %v9747_v4 = vsel %vm5762_vm13, %v4809_v39, %v9562_v48  ;;  %v5430_v37 = vrot.slane %v4006_v60, %v9095_v0  ;;  %4113 = vadd.xlane.f32.xlu1 %v4112_v7  ;;  %v3411_v10 = vmul.f32 %v9476_v43, %v7086_v33  ;;  %v3408_v50 = vmul.f32 %v9476_v43, %v7084_v1  ;;  %v10532_v33 = vld [vmem:[#allocation12_spill] sm:$0xff] }
 0x2a0   :  { %3744 = vadd.xlane.f32.xlu0 %v3743_v44 }
 0x2a1   :  { %v5431_v48 = vsel %vm4557_vm15, %v5430_v37, %v5426_v47  ;;  %v3640_v19 = vpop.xlane.xlu1 %3639  ;;  %v7088_v30 = vpop.eup %7087  ;;  %v10529_v47 = vld [vmem:[#allocation103_spill] sm:$0xff]  ;;  %v4130_v39 = vsel %vm62_vm1, %v3411_v10, 0.0  ;;  %v4121_v8 = vsel %vm62_vm1, %v3408_v50, 0.0 }
 0x2a2   :  { %v5436_v12 = vsel %vm4564_vm0, %v5435_v34, %v5431_v48  ;;  %v3637_v28 = vpop.xlane.xlu0 %3636  ;;  %v7090_v17 = vpop.eup %7089  ;;  %7099 = vtanh.f32 %v10529_v47  ;;  %v3409_v60 = vmul.f32 %v9476_v43, %v7088_v30  ;;  %v4827_v7 = vrot.slane %v3640_v19, %v8664_v13 }
 0x2a3   :  { %v5441_v23 = vsel %vm4571_vm2, %v5440_v49, %v5436_v12  ;;  %3747 = vadd.xlane.f32.xlu1 %v3746_v32  ;;  %7101 = vtanh.f32 %v9011_v6  ;;  %v4822_v9 = vrot.slane %v3637_v28, %v8652_v42  ;;  %v7092_v37 = vpop.eup %7091  ;;  %v3286_v34 = vmul.f32 %v9476_v43, %v7090_v17  ;;  %v10531_v32 = vld [vmem:[#allocation105_spill] sm:$0xff] }
 0x2a4   :  { %v9767_v29 = vsel %vm5762_vm13, %v5441_v23, %v9589_v55  ;;  %3738 = vadd.xlane.f32.xlu0 %v3737_v11  ;;  %v7094_v44 = vpop.eup %7093  ;;  %7103 = vtanh.f32 %v10530_v52  ;;  %v4124_v19 = vsel %vm62_vm1, %v3409_v60, 0.0  ;;  %v3414_v22 = vmul.f32 %v9476_v43, %v7092_v37  ;;  %v10533_v11 = vld [vmem:[#allocation27_spill] sm:$0xff] }
 0x2a5   :  { %v4015_v5 = vpop.xlane.xlu1 %4014  ;;  %7105 = vtanh.f32 %v9026_v40  ;;  %v7096_v12 = vpop.eup %7095  ;;  %v3755_v28 = vsel %vm62_vm1, %v3286_v34, 0.0  ;;  %v3284_v1 = vmul.f32 %v9476_v43, %v7094_v44  ;;  %v2775_v40 = vadd.f32 %v10533_v11, %v10532_v33  ;;  %v10537_v11 = vld [vmem:[#allocation26_spill] sm:$0xff] }
 0x2a6   :  { %v3631_v63 = vpop.xlane.xlu0 %3630  ;;  %v7098_v23 = vpop.eup %7097  ;;  %7107 = vtanh.f32 %v10531_v32  ;;  %v3287_v10 = vmul.f32 %v9476_v43, %v7096_v12  ;;  %vm10545_vm13 = vcmask 786112  }
 0x2a7   :  { %3741 = vadd.xlane.f32.xlu1 %v3740_v35  ;;  %v4813_v24 = vrot.slane %v3631_v63, %v8661_v21  ;;  %7109 = vtanh.f32 %v9045_v26  ;;  %v5445_v63 = vrot.slane %v4015_v5, %v8661_v21  ;;  %v4139_v35 = vsel %vm62_vm1, %v3414_v22, 0.0  ;;  %v10536_v22 = vld [vmem:[#allocation108_spill] sm:$0xff] }
 0x2a8   :  { %4128 = vadd.xlane.f32.xlu0 %v4127_v15  ;;  %v3749_v50 = vsel %vm62_vm1, %v3284_v1, 0.0  ;;  %v3290_v26 = vmul.f32 %v9476_v43, %v7098_v23 }
 0x2a9   :  { %v3634_v55 = vpop.xlane.xlu1 %3633 }
 0x2aa   :  { %v4817_v16 = vrot.slane %v3634_v55, %v8673_v59  ;;  %v4021_v62 = vpop.xlane.xlu0 %4020  ;;  %v3767_v44 = vsel %vm62_vm1, %v3290_v26, 0.0 }
 0x2ab   :  { %4131 = vadd.xlane.f32.xlu1 %v4130_v39  ;;  %v5454_v15 = vrot.slane %v4021_v62, %v8652_v42 }
 0x2ac   :  { %v4818_v18 = vsel %vm4473_vm3, %v4817_v16, %v4813_v24  ;;  %4122 = vadd.xlane.f32.xlu0 %v4121_v8  ;;  %v7100_v17 = vpop.eup %7099  ;;  %v10534_v16 = vld [vmem:[#allocation106_spill] sm:$0xff] }
 0x2ad   :  { %v4823_v54 = vsel %vm4480_vm4, %v4822_v9, %v4818_v18  ;;  %v9787_v6 = vpop.xlane.xlu1 %3651  ;;  %v7102_v55 = vpop.eup %7101  ;;  %7111 = vtanh.f32 %v10534_v16  ;;  %v10535_v9 = vld [vmem:[#allocation109_spill] sm:$0xff]  ;;  %v3412_v18 = vmul.f32 %v9476_v43, %v7100_v17 }
 0x2ae   :  { %v4024_v49 = vpop.xlane.xlu0 %4023  ;;  %v9791_v48 = vsel %vm4487_vm5, %v4827_v7, %v4823_v54  ;;  %v2773_v39 = vadd.f32 %v10532_v33, %v10535_v9  ;;  %7113 = vtanh.f32 %v2775_v40  ;;  %v3758_v7 = vsel %vm62_vm1, %v3287_v10, 0.0  ;;  %v7104_v34 = vpop.eup %7103 }
 0x2af   :  { %4125 = vadd.xlane.f32.xlu1 %v4124_v19  ;;  %v5459_v47 = vrot.slane %v4024_v49, %v8664_v13  ;;  %v3288_v52 = vmul.f32 %v9476_v43, %v7102_v55  ;;  %v7106_v49 = vpop.eup %7105  ;;  %7115 = vtanh.f32 %v10536_v22  ;;  %v4133_v23 = vsel %vm62_vm1, %v3412_v18, 0.0 }
 0x2b0   :  { %3756 = vadd.xlane.f32.xlu0 %v3755_v28  ;;  %v7108_v28 = vpop.eup %7107  ;;  %7117 = vtanh.f32 %v2773_v39  ;;  %v3285_v32 = vmul.f32 %v9476_v43, %v7104_v34  ;;  %v10539_v34 = vld [vmem:[#allocation28_spill] sm:$0xff] }
 0x2b1   :  { %v4027_v61 = vpop.xlane.xlu1 %4026  ;;  %7119 = vtanh.f32 %v10537_v11 }
 0x2b2   :  { %v4018_v20 = vpop.xlane.xlu0 %4017  ;;  %v5464_v60 = vrot.slane %v4027_v61, %v8817_v56  ;;  %v7110_v61 = vpop.eup %7109  ;;  %7121 = vtanh.f32 %v9081_v2  ;;  %v3415_v2 = vmul.f32 %v9476_v43, %v7108_v28 }
 0x2b3   :  { %v5449_v30 = vrot.slane %v4018_v20, %v8673_v59  ;;  %4140 = vadd.xlane.f32.xlu1 %v4139_v35  ;;  %v3761_v20 = vsel %vm62_vm1, %v3288_v52, 0.0 }
 0x2b4   :  { %3750 = vadd.xlane.f32.xlu0 %v3749_v50  ;;  %v4142_v52 = vsel %vm62_vm1, %v3415_v2, 0.0 }
 0x2b5   :  { %v5450_v24 = vsel %vm4473_vm3, %v5449_v30, %v5445_v63  ;;  %v3646_v5 = vpop.xlane.xlu1 %3645  ;;  %v3416_v63 = vmul.f32 %v9476_v43, %v7106_v49  ;;  %v2776_v30 = vadd.f32 %v9074_v3, %v10532_v33  ;;  %v3752_v3 = vsel %vm62_vm1, %v3285_v32, 0.0  ;;  %v9862_v49 = vld [vmem:[%s10256_s6] ss:$0 sm:$0xff] }
 0x2b6   :  { %v5455_v62 = vsel %vm4480_vm4, %v5454_v15, %v5450_v24  ;;  %v3649_v37 = vpop.xlane.xlu0 %3648  ;;  %v4837_v40 = vrot.slane %v3646_v5, %v8814_v53  ;;  %v4847_v15 = vrot.slane %v9787_v6, %v8844_v57  ;;  %v3417_v24 = vmul.f32 %v9476_v43, %v7110_v61  ;;  %v10538_v43 = vld [vmem:[#allocation11_spill] sm:$0xff]  ;;  %v10541_v61 = vld [vmem:[#allocation113_spill] sm:$0xff] }
 0x2b7   :  { %v5460_v8 = vsel %vm4487_vm5, %v5459_v47, %v5455_v62  ;;  %3759 = vadd.xlane.f32.xlu1 %v3758_v7  ;;  %v4842_v35 = vrot.slane %v3649_v37, %v8835_v38  ;;  %v7112_v5 = vpop.eup %7111  ;;  %v4145_v9 = vsel %vm62_vm1, %v3416_v63, 0.0  ;;  %7123 = vtanh.f32 %v2776_v30 }
 0x2b8   :  { %v5465_v54 = vsel %vm4494_vm6, %v5464_v60, %v5460_v8  ;;  %3768 = vadd.xlane.f32.xlu0 %v3767_v44  ;;  %v7114_v60 = vpop.eup %7113  ;;  %v2774_v7 = vadd.f32 %v10532_v33, %v10538_v43  ;;  %7125 = vtanh.f32 %v10539_v34  ;;  %v10540_v44 = vld [vmem:[#allocation112_spill] sm:$0xff]  ;;  %v2777_v11 = vadd.f32 %v10532_v33, %v10541_v61  ;;  %v10547_v61 = vld [vmem:[#allocation115_spill] sm:$0xff] }
 0x2b9   :  { %v4036_v19 = vpop.xlane.xlu1 %4035  ;;  %v7116_v22 = vpop.eup %7115  ;;  %v3294_v28 = vmul.f32 %v9862_v49, %v7114_v60 }
 0x2ba   :  { %v3643_v12 = vpop.xlane.xlu0 %3642  ;;  %v5479_v16 = vrot.slane %v4036_v19, %v8844_v57  ;;  %v3413_v19 = vmul.f32 %v9862_v49, %v7112_v5  ;;  %7127 = vtanh.f32 %v2774_v7 }
 0x2bb   :  { %v4832_v1 = vrot.slane %v3643_v12, %v8817_v56  ;;  %4134 = vadd.xlane.f32.xlu1 %v4133_v23  ;;  %v4148_v12 = vsel %vm62_vm1, %v3417_v24, 0.0 }
 0x2bc   :  { %3762 = vadd.xlane.f32.xlu0 %v3761_v20  ;;  %v4136_v30 = vsel %vm62_vm1, %v3413_v19, 0.0 }
 0x2bd   :  { %v4833_v10 = vsel %vm4494_vm6, %v4832_v1, %v9791_v48  ;;  %v4030_v17 = vpop.xlane.xlu1 %4029  ;;  %v7118_v1 = vpop.eup %7117 }
 0x2be   :  { %v4838_v50 = vsel %vm4501_vm7, %v4837_v40, %v4833_v10  ;;  %v5469_v26 = vrot.slane %v4030_v17, %v8814_v53  ;;  %v4033_v55 = vpop.xlane.xlu0 %4032  ;;  %v7120_v32 = vpop.eup %7119  ;;  %v3779_v10 = vsel %vm62_vm1, %v3294_v28, 0.0  ;;  %v3292_v17 = vmul.f32 %v9862_v49, %v7118_v1 }
 0x2bf   :  { %v5474_v47 = vrot.slane %v4033_v55, %v8835_v38  ;;  %v4843_v48 = vsel %vm4508_vm8, %v4842_v35, %v4838_v50  ;;  %3753 = vadd.xlane.f32.xlu1 %v3752_v3  ;;  %v7122_v20 = vpop.eup %7121  ;;  %v3291_v35 = vmul.f32 %v9862_v49, %v7116_v22 }
 0x2c0   :  { %v5470_v6 = vsel %vm4501_vm7, %v5469_v26, %v5465_v54  ;;  %v4848_v39 = vsel %vm4515_vm9, %v4847_v15, %v4843_v48  ;;  %4146 = vadd.xlane.f32.xlu0 %v4145_v9  ;;  %v2779_v54 = vadd.f32 %v10540_v44, %v10532_v33  ;;  %v10542_v15 = vld [vmem:[#allocation110_spill] sm:$0xff]  ;;  %v3289_v48 = vmul.f32 %v9862_v49, %v7120_v32  ;;  %v10544_v44 = vld [vmem:[#allocation111_spill] sm:$0xff] }
 0x2c1   :  { %v5475_v62 = vsel %vm4508_vm8, %v5474_v47, %v5470_v6  ;;  %v9850_v37 = vpop.xlane.xlu1 %4044  ;;  %v3770_v24 = vsel %vm62_vm1, %v3291_v35, 0.0  ;;  %v7124_v5 = vpop.eup %7123  ;;  %v3773_v9 = vsel %vm62_vm1, %v3292_v17, 0.0  ;;  %v10546_v32 = vld [vmem:[#allocation30_spill] sm:$0xff] }
 0x2c2   :  { %v3661_v18 = vpop.xlane.xlu0 %3660  ;;  %v5480_v8 = vsel %vm4515_vm9, %v5479_v16, %v5475_v62  ;;  %7129 = vtanh.f32 %v2779_v54  ;;  %v7126_v60 = vpop.eup %7125  ;;  %v10543_v62 = vld [vmem:[#allocation114_spill] sm:$0xff]  ;;  %v3764_v19 = vsel %vm62_vm1, %v3289_v48, 0.0  ;;  %v3295_v22 = vmul.f32 %v9862_v49, %v7124_v5  ;;  %v10548_v48 = vld [vmem:[#allocation33_spill] sm:$0xff]  ;;  %v10549_v5 = vld [vmem:[#allocation31_spill] sm:$0xff] }
 0x2c3   :  { %4143 = vadd.xlane.f32.xlu1 %v4142_v52  ;;  %7131 = vtanh.f32 %v10542_v15  ;;  %v4862_v47 = vrot.slane %v3661_v18, %v8969_v36  ;;  %v2780_v43 = vadd.f32 %v10543_v62, %v10532_v33 }
 0x2c4   :  { %4149 = vadd.xlane.f32.xlu0 %v4148_v12  ;;  %7133 = vtanh.f32 %v2777_v11  ;;  %v7128_v12 = vpop.eup %7127  ;;  %v2778_v11 = vadd.f32 %v10532_v33, %v10547_v61  ;;  %v3782_v35 = vsel %vm62_vm1, %v3295_v22, 0.0 }
 0x2c5   :  { %v3664_v23 = vpop.xlane.xlu1 %3663  ;;  %7135 = vtanh.f32 %v10544_v44  ;;  %v10551_v44 = vld [vmem:[#allocation116_spill] sm:$0xff] }
 0x2c6   :  { %v3655_v40 = vpop.xlane.xlu0 %3654  ;;  %v4867_v16 = vrot.slane %v3664_v23, %v8966_v46  ;;  %7137 = vtanh.f32 %v9135_v14 }
 0x2c7   :  { %v4852_v63 = vrot.slane %v3655_v40, %v8946_v41  ;;  %4137 = vadd.xlane.f32.xlu1 %v4136_v30  ;;  %7139 = vtanh.f32 %v2780_v43 }
 0x2c8   :  { %3780 = vadd.xlane.f32.xlu0 %v3779_v10  ;;  %7141 = vtanh.f32 %v10546_v32  ;;  %v3293_v10 = vmul.f32 %v9862_v49, %v7128_v12 }
 0x2c9   :  { %v4853_v50 = vsel %vm4522_vm10, %v4852_v63, %v4848_v39  ;;  %v3658_v26 = vpop.xlane.xlu1 %3657  ;;  %v3422_v39 = vmul.f32 %v9862_v49, %v7122_v20  ;;  %v5494_v63 = vrot.slane %v9850_v37, %v8969_v36  ;;  %7143 = vtanh.f32 %v2778_v11 }
 0x2ca   :  { %v4857_v55 = vrot.slane %v3658_v26, %v8936_v51  ;;  %v4039_v2 = vpop.xlane.xlu0 %4038  ;;  %7145 = vtanh.f32 %v10548_v48  ;;  %v2782_v11 = vadd.f32 %v10532_v33, %v9183_v45 }
 0x2cb   :  { %v5484_v3 = vrot.slane %v4039_v2, %v8946_v41  ;;  %3771 = vadd.xlane.f32.xlu1 %v3770_v24  ;;  %v4163_v28 = vsel %vm62_vm1, %v3422_v39, 0.0  ;;  %7147 = vtanh.f32 %v10551_v44 }
 0x2cc   :  { %v4858_v6 = vsel %vm4529_vm11, %v4857_v55, %v4853_v50  ;;  %3774 = vadd.xlane.f32.xlu0 %v3773_v9  ;;  %v7130_v1 = vpop.eup %7129 }
 0x2cd   :  { %v4863_v7 = vsel %vm4536_vm12, %v4862_v47, %v4858_v6  ;;  %v5485_v18 = vsel %vm4522_vm10, %v5484_v3, %v5480_v8  ;;  %v4048_v34 = vpop.xlane.xlu1 %4047  ;;  %v3420_v8 = vmul.f32 %v9862_v49, %v7126_v60  ;;  %v7132_v20 = vpop.eup %7131  ;;  %v3298_v55 = vmul.f32 %v9862_v49, %v7130_v1 }
 0x2ce   :  { %v9890_v54 = vpop.xlane.xlu0 %3672  ;;  %v4868_v52 = vsel %vm10545_vm13, %v4867_v16, %v4863_v7  ;;  %v7134_v17 = vpop.eup %7133  ;;  %v5499_v15 = vrot.slane %v4048_v34, %v8966_v46  ;;  %v2783_v16 = vadd.f32 %v10549_v5, %v10532_v33  ;;  %v3776_v6 = vsel %vm62_vm1, %v3293_v10, 0.0  ;;  %v10550_v7 = vld [vmem:[#allocation117_spill] sm:$0xff] }
 0x2cf   :  { %3765 = vadd.xlane.f32.xlu1 %v3764_v19  ;;  %v4157_v26 = vsel %vm62_vm1, %v3420_v8, 0.0  ;;  %v3423_v9 = vmul.f32 %v9862_v49, %v7132_v20  ;;  %v7136_v39 = vpop.eup %7135  ;;  %v3791_v60 = vsel %vm62_vm1, %v3298_v55, 0.0  ;;  %v3296_v62 = vmul.f32 %v9862_v49, %v7134_v17 }
 0x2d0   :  { %4164 = vadd.xlane.f32.xlu0 %v4163_v28  ;;  %v7138_v43 = vpop.eup %7137  ;;  %7149 = vtanh.f32 %v2783_v16  ;;  %v3421_v8 = vmul.f32 %v9862_v49, %v7136_v39 }
 0x2d1   :  { %v4042_v23 = vpop.xlane.xlu1 %4041  ;;  %v7140_v12 = vpop.eup %7139  ;;  %v4166_v28 = vsel %vm62_vm1, %v3423_v9, 0.0  ;;  %v3426_v32 = vmul.f32 %v9862_v49, %v7138_v43 }
 0x2d2   :  { %v5489_v14 = vrot.slane %v4042_v23, %v8936_v51  ;;  %v3667_v40 = vpop.xlane.xlu0 %3666  ;;  %v7142_v1 = vpop.eup %7141  ;;  %v3785_v23 = vsel %vm62_vm1, %v3296_v62, 0.0  ;;  %v3299_v20 = vmul.f32 %v9862_v49, %v7140_v12 }
 0x2d3   :  { %v4872_v30 = vrot.slane %v3667_v40, %v9087_v58  ;;  %3783 = vadd.xlane.f32.xlu1 %v3782_v35  ;;  %v4160_v35 = vsel %vm62_vm1, %v3421_v8, 0.0  ;;  %v3424_v10 = vmul.f32 %v9862_v49, %v7142_v1  ;;  %v7144_v17 = vpop.eup %7143 }
 0x2d4   :  { %v5490_v50 = vsel %vm4529_vm11, %v5489_v14, %v5485_v18  ;;  %4158 = vadd.xlane.f32.xlu0 %v4157_v26  ;;  %v2781_v18 = vadd.f32 %v10532_v33, %v10550_v7  ;;  %v10553_v26 = vld [vmem:[#allocation119_spill] sm:$0xff] }
 0x2d5   :  { %v5495_v2 = vsel %vm4536_vm12, %v5494_v63, %v5490_v50  ;;  %v4873_v37 = vsel %vm4550_vm14, %v4872_v30, %v4868_v52  ;;  %v3676_v47 = vpop.xlane.xlu1 %3675  ;;  %v10552_v52 = vld [vmem:[#allocation118_spill] sm:$0xff]  ;;  %v4882_v63 = vrot.slane %v9890_v54, %v9114_v25  ;;  %v7146_v50 = vpop.eup %7145  ;;  %v4169_v43 = vsel %vm62_vm1, %v3424_v10, 0.0 }
 0x2d6   :  { %v9913_v3 = vpop.xlane.xlu0 %4056  ;;  %v5500_v24 = vsel %vm10545_vm13, %v5499_v15, %v5495_v2  ;;  %v2784_v19 = vadd.f32 %v10552_v52, %v10532_v33  ;;  %7151 = vtanh.f32 %v2781_v18  ;;  %v4887_v15 = vrot.slane %v3676_v47, %v9108_v27  ;;  %v7148_v39 = vpop.eup %7147 }
 0x2d7   :  { %3777 = vadd.xlane.f32.xlu1 %v3776_v6  ;;  %v4175_v33 = vsel %vm62_vm1, %v3426_v32, 0.0  ;;  %vm5764_vm13 = vcmask 1044484   ;;  %v5514_v47 = vrot.slane %v9913_v3, %v9114_v25  ;;  %v3297_v6 = vmul.f32 %v9862_v49, %v7144_v17 }
 0x2d8   :  { %3792 = vadd.xlane.f32.xlu0 %v3791_v60  ;;  %7153 = vtanh.f32 %v2784_v19  ;;  %v3427_v7 = vmul.f32 %v9862_v49, %v7146_v50  ;;  %v10555_v19 = vld [vmem:[#allocation120_spill] sm:$0xff]  ;;  %v3425_v12 = vmul.f32 %v9862_v49, %v7148_v39 }
 0x2d9   :  { %v4051_v34 = vpop.xlane.xlu1 %4050  ;;  %7155 = vtanh.f32 %v10553_v26  ;;  %v10559_v26 = vld [vmem:[#allocation88_spill] sm:$0xff] }
 0x2da   :  { %v4060_v22 = vpop.xlane.xlu0 %4059  ;;  %v5504_v30 = vrot.slane %v4051_v34, %v9087_v58  ;;  %7157 = vtanh.f32 %v2782_v11  ;;  %v7150_v18 = vpop.eup %7149  ;;  %v10554_v34 = vld [vmem:[#allocation32_spill] sm:$0xff]  ;;  %v4178_v1 = vsel %vm62_vm1, %v3427_v7, 0.0 }
 0x2db   :  { %4167 = vadd.xlane.f32.xlu1 %v4166_v28  ;;  %v5519_v60 = vrot.slane %v4060_v22, %v9108_v27  ;;  %7159 = vtanh.f32 %v10554_v34  ;;  %v3788_v22 = vsel %vm62_vm1, %v3297_v6, 0.0 }
 0x2dc   :  { %3786 = vadd.xlane.f32.xlu0 %v3785_v23  ;;  %v5505_v16 = vsel %vm4550_vm14, %v5504_v30, %v5500_v24  ;;  %7161 = vtanh.f32 %v10555_v19  ;;  %v3302_v23 = vmul.f32 %v9862_v49, %v7150_v18 }
 0x2dd   :  { %v3670_v61 = vpop.xlane.xlu1 %3669 }
 0x2de   :  { %v4877_v14 = vrot.slane %v3670_v61, %v9095_v0  ;;  %v9935_v40 = vpop.xlane.xlu0 %3684  ;;  %v10556_v61 = vld [vmem:[#allocation107_spill] sm:$0xff] }
 0x2df   :  { %4161 = vadd.xlane.f32.xlu1 %v4160_v35  ;;  %7163 = vtanh.f32 %v10556_v61  ;;  %v3803_v35 = vsel %vm62_vm1, %v3302_v23, 0.0  ;;  %v4901_v34 = vrot.slane %v9935_v40, %v8652_v42  ;;  %v10561_v23 = vld [vmem:[#allocation36_spill] sm:$0xff] }
 0x2e0   :  { %v4878_v45 = vsel %vm4557_vm15, %v4877_v14, %v4873_v37  ;;  %4176 = vadd.xlane.f32.xlu0 %v4175_v33  ;;  %v3794_v37 = vsel %vm62_vm1, %v3299_v20, 0.0  ;;  %v7152_v52 = vpop.eup %7151  ;;  %v10557_v20 = vld [vmem:[#allocation121_spill] sm:$0xff] }
 0x2e1   :  { %v4883_v54 = vsel %vm4564_vm0, %v4882_v63, %v4878_v45  ;;  %v4054_v55 = vpop.xlane.xlu1 %4053  ;;  %7165 = vtanh.f32 %v10557_v20  ;;  %v4172_v63 = vsel %vm62_vm1, %v3425_v12, 0.0  ;;  %v3300_v10 = vmul.f32 %v9862_v49, %v7152_v52 }
 0x2e2   :  { %v4888_v2 = vsel %vm4571_vm2, %v4887_v15, %v4883_v54  ;;  %v5509_v48 = vrot.slane %v4054_v55, %v9095_v0  ;;  %v9950_v5 = vpop.xlane.xlu0 %3678  ;;  %v7154_v8 = vpop.eup %7153  ;;  %v10558_v15 = vld [vmem:[#allocation29_spill] sm:$0xff] }
 0x2e3   :  { %v9959_v9 = vsel %vm5764_vm13, %v4888_v2, %v9747_v4  ;;  %3795 = vadd.xlane.f32.xlu1 %v3794_v37  ;;  %v7156_v14 = vpop.eup %7155  ;;  %v3303_v30 = vmul.f32 %v9862_v49, %v7154_v8  ;;  %7167 = vtanh.f32 %v10558_v15  ;;  %v4892_v7 = vrot.slane %v9950_v5, %v8661_v21 }
 0x2e4   :  { %v5510_v62 = vsel %vm4557_vm15, %v5509_v48, %v5505_v16  ;;  %4170 = vadd.xlane.f32.xlu0 %v4169_v43  ;;  %7169 = vtanh.f32 %v10559_v26  ;;  %v3797_v16 = vsel %vm62_vm1, %v3300_v10, 0.0  ;;  %v3430_v6 = vmul.f32 %v9862_v49, %v7156_v14  ;;  %v10560_v43 = vld [vmem:[#allocation34_spill] sm:$0xff] }
 0x2e5   :  { %v5515_v3 = vsel %vm4564_vm0, %v5514_v47, %v5510_v62  ;;  %v4069_v24 = vpop.xlane.xlu1 %4068  ;;  %v3806_v55 = vsel %vm62_vm1, %v3303_v30, 0.0  ;;  %7171 = vtanh.f32 %v10560_v43 }
 0x2e6   :  { %v5520_v4 = vsel %vm4571_vm2, %v5519_v60, %v5515_v3  ;;  %v4072_v44 = vpop.xlane.xlu0 %4071  ;;  %v5533_v54 = vrot.slane %v4069_v24, %v8652_v42  ;;  %7173 = vtanh.f32 %v9231_v31  ;;  %v4187_v5 = vsel %vm62_vm1, %v3430_v6, 0.0 }
 0x2e7   :  { %v9973_v28 = vsel %vm5764_vm13, %v5520_v4, %v9767_v29  ;;  %3789 = vadd.xlane.f32.xlu1 %v3788_v22  ;;  %v7158_v29 = vpop.eup %7157  ;;  %v5538_v37 = vrot.slane %v4072_v44, %v8664_v13  ;;  %7175 = vtanh.f32 %v10561_v23 }
 0x2e8   :  { %4179 = vadd.xlane.f32.xlu0 %v4178_v1  ;;  %v3301_v2 = vmul.f32 %v9862_v49, %v7158_v29  ;;  %v7160_v48 = vpop.eup %7159 }
 0x2e9   :  { %v3688_v32 = vpop.xlane.xlu1 %3687  ;;  %v7162_v39 = vpop.eup %7161  ;;  %v3431_v44 = vmul.f32 %v9862_v49, %v7160_v48 }
 0x2ea   :  { %v4066_v11 = vpop.xlane.xlu0 %4065  ;;  %v3800_v4 = vsel %vm62_vm1, %v3301_v2, 0.0  ;;  %v7164_v52 = vpop.eup %7163  ;;  %v4906_v19 = vrot.slane %v3688_v32, %v8664_v13  ;;  %v3428_v12 = vmul.f32 %v9862_v49, %v7162_v39  ;;  %v10562_v32 = vld [vmem:[#allocation122_spill] sm:$0xff] }
 0x2eb   :  { %4173 = vadd.xlane.f32.xlu1 %v4172_v63  ;;  %v5528_v45 = vrot.slane %v4066_v11, %v8673_v59  ;;  %v7166_v8 = vpop.eup %7165  ;;  %7177 = vtanh.f32 %v10562_v32  ;;  %v4190_v20 = vsel %vm62_vm1, %v3431_v44, 0.0  ;;  %v3418_v63 = vmul.f32 %v9862_v49, %v7164_v52 }
 0x2ec   :  { %3804 = vadd.xlane.f32.xlu0 %v3803_v35  ;;  %v4181_v29 = vsel %vm62_vm1, %v3428_v12, 0.0  ;;  %v3429_v35 = vmul.f32 %v9862_v49, %v7166_v8 }
 0x2ed   :  { %v4063_v17 = vpop.xlane.xlu1 %4062  ;;  %v7168_v30 = vpop.eup %7167 }
 0x2ee   :  { %v5524_v33 = vrot.slane %v4063_v17, %v8661_v21  ;;  %v9986_v50 = vpop.xlane.xlu0 %3696  ;;  %v7170_v10 = vpop.eup %7169 }
 0x2ef   :  { %3807 = vadd.xlane.f32.xlu1 %v3806_v55  ;;  %v3419_v55 = vmul.f32 %v9862_v49, %v7168_v30  ;;  %v7172_v2 = vpop.eup %7171 }
 0x2f0   :  { %v5529_v47 = vsel %vm4473_vm3, %v5528_v45, %v5524_v33  ;;  %3798 = vadd.xlane.f32.xlu0 %v3797_v16  ;;  %v4921_v33 = vrot.slane %v9986_v50, %v8835_v38  ;;  %v3403_v16 = vmul.f32 %v9862_v49, %v7170_v10  ;;  %v7174_v6 = vpop.eup %7173 }
 0x2f1   :  { %v5534_v60 = vsel %vm4480_vm4, %v5533_v54, %v5529_v47  ;;  %v3682_v62 = vpop.xlane.xlu1 %3681  ;;  %v4151_v54 = vsel %vm62_vm1, %v3418_v63, 0.0  ;;  %v4184_v47 = vsel %vm62_vm1, %v3429_v35, 0.0 }
 0x2f2   :  { %v4896_v18 = vrot.slane %v3682_v62, %v8673_v59  ;;  %v3691_v3 = vpop.xlane.xlu0 %3690  ;;  %v5539_v24 = vsel %vm4487_vm5, %v5538_v37, %v5534_v60 }
 0x2f3   :  { %3801 = vadd.xlane.f32.xlu1 %v3800_v4  ;;  %v4911_v1 = vrot.slane %v3691_v3, %v8817_v56  ;;  %v7176_v3 = vpop.eup %7175  ;;  %v3433_v4 = vmul.f32 %v9862_v49, %v7174_v6 }
 0x2f4   :  { %v4897_v22 = vsel %vm4473_vm3, %v4896_v18, %v4892_v7  ;;  %4188 = vadd.xlane.f32.xlu0 %v4187_v5  ;;  %v4154_v7 = vsel %vm62_vm1, %v3419_v55, 0.0  ;;  %v3432_v18 = vmul.f32 %v9862_v49, %v7172_v2  ;;  %v3435_v8 = vmul.f32 %v9862_v49, %v7176_v3 }
 0x2f5   :  { %v4902_v31 = vsel %vm4480_vm4, %v4901_v34, %v4897_v22  ;;  %v3700_v40 = vpop.xlane.xlu1 %3699  ;;  %v4106_v34 = vsel %vm62_vm1, %v3403_v16, 0.0  ;;  %v7178_v44 = vpop.eup %7177 }
 0x2f6   :  { %v4907_v61 = vsel %vm4487_vm5, %v4906_v19, %v4902_v31  ;;  %v4081_v11 = vpop.xlane.xlu0 %4080  ;;  %v4926_v48 = vrot.slane %v3700_v40, %v8844_v57  ;;  %v4193_v12 = vsel %vm62_vm1, %v3432_v18, 0.0  ;;  %v4196_v40 = vsel %vm62_vm1, %v3433_v4, 0.0 }
 0x2f7   :  { %v4912_v14 = vsel %vm4494_vm6, %v4911_v1, %v4907_v61  ;;  %4191 = vadd.xlane.f32.xlu1 %v4190_v20  ;;  %v5553_v22 = vrot.slane %v4081_v11, %v8835_v38  ;;  %v3434_v23 = vmul.f32 %v9862_v49, %v7178_v44  ;;  %v4202_v63 = vsel %vm62_vm1, %v3435_v8, 0.0  ;;  %v5791_v44 = vld [vmem:[%s10252_s2] sm:$0xff] }
 0x2f8   :  { %4182 = vadd.xlane.f32.xlu0 %v4181_v29 }
 0x2f9   :  { %v3694_v17 = vpop.xlane.xlu1 %3693  ;;  %v4199_v30 = vsel %vm62_vm1, %v3434_v23, 0.0  ;;  %vm10563_vm1 = vcmask 786112  }
 0x2fa   :  { %v4916_v15 = vrot.slane %v3694_v17, %v8814_v53  ;;  %v4075_v45 = vpop.xlane.xlu0 %4074  ;;  %vm10564_vm13 = vmmov %vm10563_vm1 }
 0x2fb   :  { %v5543_v26 = vrot.slane %v4075_v45, %v8817_v56  ;;  %4152 = vadd.xlane.f32.xlu1 %v4151_v54 }
 0x2fc   :  { %v4917_v37 = vsel %vm4501_vm7, %v4916_v15, %v4912_v14  ;;  %4185 = vadd.xlane.f32.xlu0 %v4184_v47 }
 0x2fd   :  { %v4922_v39 = vsel %vm4508_vm8, %v4921_v33, %v4917_v37  ;;  %v5544_v50 = vsel %vm4494_vm6, %v5543_v26, %v5539_v24  ;;  %v4084_v60 = vpop.xlane.xlu1 %4083 }
 0x2fe   :  { %v3709_v62 = vpop.xlane.xlu0 %3708  ;;  %v4927_v43 = vsel %vm4515_vm9, %v4926_v48, %v4922_v39  ;;  %v5558_v31 = vrot.slane %v4084_v60, %v8844_v57 }
 0x2ff   :  { %4155 = vadd.xlane.f32.xlu1 %v4154_v7  ;;  %v4941_v49 = vrot.slane %v3709_v62, %v8969_v36 }
 0x300   :  { %4107 = vadd.xlane.f32.xlu0 %v4106_v34 }
 0x301   :  { %v4078_v52 = vpop.xlane.xlu1 %4077 }
 0x302   :  { %v5548_v24 = vrot.slane %v4078_v52, %v8814_v53  ;;  %v3703_v19 = vpop.xlane.xlu0 %3702 }
 0x303   :  { %v4931_v5 = vrot.slane %v3703_v19, %v8946_v41  ;;  %4194 = vadd.xlane.f32.xlu1 %v4193_v12 }
 0x304   :  { %v5549_v1 = vsel %vm4501_vm7, %v5548_v24, %v5544_v50  ;;  %4197 = vadd.xlane.f32.xlu0 %v4196_v40 }
 0x305   :  { %v5554_v61 = vsel %vm4508_vm8, %v5553_v22, %v5549_v1  ;;  %v4932_v32 = vsel %vm4522_vm10, %v4931_v5, %v4927_v43  ;;  %v3712_v11 = vpop.xlane.xlu1 %3711  ;;  %v5792_v43 = vld [vmem:[%s10252_s2 + $0x8] sm:$0xff]  ;;  %s7219_s2 = smov [#allocation3]  }
 0x306   :  { %v4093_v14 = vpop.xlane.xlu0 %4092  ;;  %v5559_v20 = vsel %vm4515_vm9, %v5558_v31, %v5554_v61  ;;  %v4946_v15 = vrot.slane %v3712_v11, %v8966_v46  ;;  %s5828_s19 = sshll.u32 %s7219_s2, 4  ;;  %s5829_s19 = int_to_ptr.vmem [resolvable:$true] %s5828_s19 }
 0x307   :  { %4203 = vadd.xlane.f32.xlu1 %v4202_v63  ;;  %v5573_v16 = vrot.slane %v4093_v14, %v8969_v36  ;;  %s7191_s20 = scalar_lea.vmem %s5829_s19, 256  ;;  %p7196_p1 = scmp.lt.s32.totalorder %s5829_s19, %s5829_s19 }
 0x308   :  { %4200 = vadd.xlane.f32.xlu0 %v4199_v30  ;;  %p7192_p0 = scmp.ne.s32.totalorder %s5829_s19, %s7191_s20  ;;  %p7197_p2 = scmp.lt.s32.totalorder %s7191_s20, %s7191_s20 }
 0x309   :  { %v3706_v29 = vpop.xlane.xlu1 %3705 }
 0x30a   :  { %v4936_v35 = vrot.slane %v3706_v29, %v8936_v51  ;;  %v4087_v10 = vpop.xlane.xlu0 %4086  ;;  %p7198_p3 = por %p7197_p2, %p7196_p1 }
 0x30b   :  { %v5563_v17 = vrot.slane %v4087_v10, %v8946_v41 }
 0x30c   :  { %v4937_v45 = vsel %vm4529_vm11, %v4936_v35, %v4932_v32  ;;  %p7199_p4 = pnand %p7198_p3, %p7192_p0 }
 0x30d   :  { %v4942_v33 = vsel %vm4536_vm12, %v4941_v49, %v4937_v45  ;;  %v5564_v26 = vsel %vm4522_vm10, %v5563_v17, %v5559_v20  ;;  %v4105_v54 = vpop.xlane.xlu1 %4104 }
 0x30e   :  { %v4096_v55 = vpop.xlane.xlu0 %4095  ;;  %v4947_v2 = vsel %vm10563_vm1, %v4946_v15, %v4942_v33  ;;  %vm10271_vm1 = vcmask 1045509   ;;  %v5593_v23 = vrot.slane %v4105_v54, %v9114_v25 }
 0x30f   :  { %v5578_v6 = vrot.slane %v4096_v55, %v8966_v46 }
 0x311   :  { %v3724_v48 = vpop.xlane.xlu1 %3723 }
 0x312   :  { %v4090_v37 = vpop.xlane.xlu0 %4089  ;;  %v4966_v22 = vrot.slane %v3724_v48, %v9108_v27 }
 0x313   :  { %v5568_v47 = vrot.slane %v4090_v37, %v8936_v51 }
 0x315   :  { %v5569_v39 = vsel %vm4529_vm11, %v5568_v47, %v5564_v26  ;;  %v3718_v50 = vpop.xlane.xlu1 %3717 }
 0x316   :  { %v5574_v60 = vsel %vm4536_vm12, %v5573_v16, %v5569_v39  ;;  %v3721_v62 = vpop.xlane.xlu0 %3720  ;;  %v4956_v4 = vrot.slane %v3718_v50, %v9095_v0 }
 0x317   :  { %v5579_v7 = vsel %vm10564_vm13, %v5578_v6, %v5574_v60  ;;  %v4961_v52 = vrot.slane %v3721_v62, %v9114_v25 }
 0x318   :  { %5797 = vperm.xlu1 %6529, %v5792_v43  }
 0x319   :  { %v4102_v18 = vpop.xlane.xlu1 %4101 }
 0x31a   :  { %v3715_v3 = vpop.xlane.xlu0 %3714  ;;  %v5588_v1 = vrot.slane %v4102_v18, %v9095_v0 }
 0x31b   :  { %v4951_v34 = vrot.slane %v3715_v3, %v9087_v58 }
 0x31d   :  { %v4952_v24 = vsel %vm4550_vm14, %v4951_v34, %v4947_v2  ;;  %v4117_v19 = vpop.xlane.xlu1 %4116 }
 0x31e   :  { %v4957_v5 = vsel %vm4557_vm15, %v4956_v4, %v4952_v24  ;;  %v4099_v12 = vpop.xlane.xlu0 %4098  ;;  %5794 = vperm.xlu0 %6528, %v5791_v44   ;;  %v5612_v37 = vrot.slane %v4117_v19, %v8652_v42 }
 0x31f   :  { %v4962_v8 = vsel %vm4564_vm0, %v4961_v52, %v4957_v5  ;;  %v5583_v31 = vrot.slane %v4099_v12, %v9087_v58 }
 0x320   :  { %v4967_v40 = vsel %vm4571_vm2, %v4966_v22, %v4962_v8 }
 0x321   :  { %v5584_v61 = vsel %vm4550_vm14, %v5583_v31, %v5579_v7  ;;  %v3736_v32 = vpop.xlane.xlu1 %3735  ;;  %v10086_v11 = vsel %vm10271_vm1, %v4967_v40, %v9959_v9  ;;  %vm5768_vm1 = vcmask 1046534  }
 0x322   :  { %v5589_v14 = vsel %vm4557_vm15, %v5588_v1, %v5584_v61  ;;  %v3733_v20 = vpop.xlane.xlu0 %3732  ;;  %v4985_v17 = vrot.slane %v3736_v32, %v8664_v13 }
 0x323   :  { %v10090_v63 = vsel %vm4564_vm0, %v5593_v23, %v5589_v14  ;;  %v4980_v49 = vrot.slane %v3733_v20, %v8652_v42 }
 0x325   :  { %v3730_v30 = vpop.xlane.xlu1 %3729 }
 0x326   :  { %v4975_v29 = vrot.slane %v3730_v30, %v8673_v59  ;;  %v3727_v35 = vpop.xlane.xlu0 %3726 }
 0x327   :  { %v4971_v10 = vrot.slane %v3727_v35, %v8661_v21 }
 0x329   :  { %v4976_v15 = vsel %vm4473_vm3, %v4975_v29, %v4971_v10  ;;  %v4120_v9 = vpop.xlane.xlu1 %4119 }
 0x32a   :  { %v4981_v45 = vsel %vm4480_vm4, %v4980_v49, %v4976_v15  ;;  %v4111_v33 = vpop.xlane.xlu0 %4110  ;;  %v5617_v47 = vrot.slane %v4120_v9, %v8664_v13 }
 0x32b   :  { %v4986_v26 = vsel %vm4487_vm5, %v4985_v17, %v4981_v45  ;;  %v5603_v55 = vrot.slane %v4111_v33, %v8661_v21 }
 0x32d   :  { %v4114_v54 = vpop.xlane.xlu1 %4113 }
 0x32e   :  { %v5607_v2 = vrot.slane %v4114_v54, %v8673_v59  ;;  %v3745_v48 = vpop.xlane.xlu0 %3744 }
 0x32f   :  { %v5000_v34 = vrot.slane %v3745_v48, %v8835_v38 }
 0x330   :  { %v5608_v16 = vsel %vm4473_vm3, %v5607_v2, %v5603_v55 }
 0x331   :  { %v5613_v6 = vsel %vm4480_vm4, %v5612_v37, %v5608_v16  ;;  %v3748_v39 = vpop.xlane.xlu1 %3747 }
 0x332   :  { %v3739_v50 = vpop.xlane.xlu0 %3738  ;;  %v5618_v60 = vsel %vm4487_vm5, %v5617_v47, %v5613_v6  ;;  %v5005_v4 = vrot.slane %v3748_v39, %v8844_v57 }
 0x333   :  { %v4990_v62 = vrot.slane %v3739_v50, %v8817_v56 }
 0x335   :  { %v4991_v43 = vsel %vm4494_vm6, %v4990_v62, %v4986_v26  ;;  %v3742_v7 = vpop.xlane.xlu1 %3741 }
 0x336   :  { %v4995_v18 = vrot.slane %v3742_v7, %v8814_v53  ;;  %v4129_v3 = vpop.xlane.xlu0 %4128 }
 0x337   :  { %v5632_v40 = vrot.slane %v4129_v3, %v8835_v38 }
 0x338   :  { %v4996_v44 = vsel %vm4501_vm7, %v4995_v18, %v4991_v43 }
 0x339   :  { %v5001_v52 = vsel %vm4508_vm8, %v5000_v34, %v4996_v44  ;;  %v4132_v24 = vpop.xlane.xlu1 %4131 }
 0x33a   :  { %v4123_v19 = vpop.xlane.xlu0 %4122  ;;  %v5006_v22 = vsel %vm4515_vm9, %v5005_v4, %v5001_v52  ;;  %v5637_v23 = vrot.slane %v4132_v24, %v8844_v57 }
 0x33b   :  { %v5622_v5 = vrot.slane %v4123_v19, %v8817_v56 }
 0x33d   :  { %v5623_v12 = vsel %vm4494_vm6, %v5622_v5, %v5618_v60  ;;  %v4126_v8 = vpop.xlane.xlu1 %4125 }
 0x33e   :  { %v5627_v31 = vrot.slane %v4126_v8, %v8814_v53  ;;  %v3757_v1 = vpop.xlane.xlu0 %3756 }
 0x33f   :  { %v5020_v55 = vrot.slane %v3757_v1, %v8969_v36 }
 0x340   :  { %v5628_v61 = vsel %vm4501_vm7, %v5627_v31, %v5623_v12 }
 0x341   :  { %v5633_v32 = vsel %vm4508_vm8, %v5632_v40, %v5628_v61  ;;  %v4141_v14 = vpop.xlane.xlu1 %4140 }
 0x342   :  { %v3751_v20 = vpop.xlane.xlu0 %3750  ;;  %v5638_v30 = vsel %vm4515_vm9, %v5637_v23, %v5633_v32  ;;  %v5652_v7 = vrot.slane %v4141_v14, %v8969_v36 }
 0x343   :  { %v5010_v29 = vrot.slane %v3751_v20, %v8946_v41 }
 0x345   :  { %v5011_v35 = vsel %vm4522_vm10, %v5010_v29, %v5006_v22  ;;  %v3760_v10 = vpop.xlane.xlu1 %3759 }
 0x346   :  { %v3769_v49 = vpop.xlane.xlu0 %3768  ;;  %v5025_v2 = vrot.slane %v3760_v10, %v8966_v46 }
 0x347   :  { %v5040_v1 = vrot.slane %v3769_v49, %v9114_v25 }
 0x349   :  { %v4135_v17 = vpop.xlane.xlu1 %4134 }
 0x34a   :  { %v5642_v15 = vrot.slane %v4135_v17, %v8946_v41  ;;  %v3763_v9 = vpop.xlane.xlu0 %3762 }
 0x34b   :  { %v5030_v37 = vrot.slane %v3763_v9, %v9087_v58 }
 0x34c   :  { %v5643_v45 = vsel %vm4522_vm10, %v5642_v15, %v5638_v30 }
 0x34d   :  { %v3754_v33 = vpop.xlane.xlu1 %3753 }
 0x34e   :  { %v5015_v26 = vrot.slane %v3754_v33, %v8936_v51  ;;  %v4147_v54 = vpop.xlane.xlu0 %4146 }
 0x34f   :  { %v5662_v34 = vrot.slane %v4147_v54, %v9087_v58 }
 0x350   :  { %v5016_v48 = vsel %vm4529_vm11, %v5015_v26, %v5011_v35 }
 0x351   :  { %v5021_v47 = vsel %vm4536_vm12, %v5020_v55, %v5016_v48  ;;  %v4144_v16 = vpop.xlane.xlu1 %4143 }
 0x352   :  { %v4150_v6 = vpop.xlane.xlu0 %4149  ;;  %v5026_v39 = vsel %vm10564_vm13, %v5025_v2, %v5021_v47  ;;  %v5657_v18 = vrot.slane %v4144_v16, %v8966_v46 }
 0x353   :  { %v5031_v50 = vsel %vm4550_vm14, %v5030_v37, %v5026_v39  ;;  %v5667_v52 = vrot.slane %v4150_v6, %v9095_v0 }
 0x355   :  { %v4138_v60 = vpop.xlane.xlu1 %4137 }
 0x356   :  { %v5647_v62 = vrot.slane %v4138_v60, %v8936_v51  ;;  %v3781_v43 = vpop.xlane.xlu0 %3780 }
 0x357   :  { %v5059_v55 = vrot.slane %v3781_v43, %v8652_v42 }
 0x358   :  { %v5648_v3 = vsel %vm4529_vm11, %v5647_v62, %v5643_v45 }
 0x359   :  { %v5653_v4 = vsel %vm4536_vm12, %v5652_v7, %v5648_v3  ;;  %v3772_v44 = vpop.xlane.xlu1 %3771 }
 0x35a   :  { %v5658_v24 = vsel %vm10564_vm13, %v5657_v18, %v5653_v4  ;;  %v3775_v19 = vpop.xlane.xlu0 %3774  ;;  %v5045_v40 = vrot.slane %v3772_v44, %v9108_v27 }
 0x35b   :  { %v5663_v22 = vsel %vm4550_vm14, %v5662_v34, %v5658_v24  ;;  %v5050_v33 = vrot.slane %v3775_v19, %v8661_v21 }
 0x35c   :  { %v10144_v5 = vsel %vm4557_vm15, %v5667_v52, %v5663_v22 }
 0x35d   :  { %v3766_v12 = vpop.xlane.xlu1 %3765 }
 0x35e   :  { %v5035_v8 = vrot.slane %v3766_v12, %v9095_v0  ;;  %v4165_v31 = vpop.xlane.xlu0 %4164 }
 0x35f   :  { %v5691_v44 = vrot.slane %v4165_v31, %v8652_v42 }
 0x360   :  { %v5036_v23 = vsel %vm4557_vm15, %v5035_v8, %v5031_v50 }
 0x361   :  { %v5041_v61 = vsel %vm4564_vm0, %v5040_v1, %v5036_v23  ;;  %v3784_v32 = vpop.xlane.xlu1 %3783 }
 0x362   :  { %v5046_v14 = vsel %vm4571_vm2, %v5045_v40, %v5041_v61  ;;  %v4159_v20 = vpop.xlane.xlu0 %4158  ;;  %v5064_v47 = vrot.slane %v3784_v32, %v8664_v13 }
 0x363   :  { %v10154_v30 = vsel %vm5768_vm1, %v5046_v14, %v10086_v11  ;;  %v5682_v43 = vrot.slane %v4159_v20, %v8661_v21  ;;  %v10565_v14 = vld [vmem:[#allocation79_spill] sm:$0xff] }
 0x365   :  { %v3778_v29 = vpop.xlane.xlu1 %3777 }
 0x366   :  { %v3793_v35 = vpop.xlane.xlu0 %3792  ;;  %v5054_v9 = vrot.slane %v3778_v29, %v8673_v59 }
 0x367   :  { %v5079_v18 = vrot.slane %v3793_v35, %v8835_v38  ;;  %v10566_v35 = vld [vmem:[#allocation78_spill] sm:$0xff] }
 0x368   :  { %v5055_v54 = vsel %vm4473_vm3, %v5054_v9, %v5050_v33 }
 0x369   :  { %v4168_v10 = vpop.xlane.xlu1 %4167  ;;  %v5060_v11 = vsel %vm4480_vm4, %v5059_v55, %v5055_v54  ;;  %v10569_v55 = vld [vmem:[#allocation84_spill] sm:$0xff] }
 0x36a   :  { %v3787_v17 = vpop.xlane.xlu0 %3786  ;;  %v5065_v39 = vsel %vm4487_vm5, %v5064_v47, %v5060_v11  ;;  %v5696_v12 = vrot.slane %v4168_v10, %v8664_v13  ;;  %v5109_v13 = vrot.slane %v10565_v14, %v9087_v58  ;;  %v5114_v10 = vrot.slane %v10566_v35, %v9095_v0 }
 0x36b   :  { %v5069_v37 = vrot.slane %v3787_v17, %v8817_v56 }
 0x36d   :  { %v4162_v49 = vpop.xlane.xlu1 %4161  ;;  %v5070_v62 = vsel %vm4494_vm6, %v5069_v37, %v5065_v39 }
 0x36e   :  { %v4177_v15 = vpop.xlane.xlu0 %4176  ;;  %v5686_v50 = vrot.slane %v4162_v49, %v8673_v59 }
 0x370   :  { %v5687_v34 = vsel %vm4473_vm3, %v5686_v50, %v5682_v43  ;;  %vm10567_vm3 = vmmov %vm10564_vm13 }
 0x371   :  { %v3796_v45 = vpop.xlane.xlu1 %3795  ;;  %v5692_v19 = vsel %vm4480_vm4, %v5691_v44, %v5687_v34  ;;  %vm5770_vm4 = vcmask 1047559  }
 0x372   :  { %v4171_v26 = vpop.xlane.xlu0 %4170  ;;  %v5084_v59 = vrot.slane %v3796_v45, %v8844_v57  ;;  %v5697_v61 = vsel %vm4487_vm5, %v5696_v12, %v5692_v19  ;;  %v10568_v45 = vld [vmem:[#allocation87_spill] sm:$0xff]  ;;  %vm10570_vm5 = vcmask 1045509  }
 0x373   :  { %v5701_v21 = vrot.slane %v4171_v26, %v8817_v56  ;;  %v5119_v33 = vrot.slane %v10568_v45, %v9114_v25  ;;  %v5711_v26 = vrot.slane %v4177_v15, %v8835_v38 }
 0x375   :  { %v3790_v2 = vpop.xlane.xlu1 %3789 }
 0x376   :  { %v4180_v48 = vpop.xlane.xlu0 %4179  ;;  %v5074_v16 = vrot.slane %v3790_v2, %v8814_v53  ;;  %v5124_v2 = vrot.slane %v10569_v55, %v9108_v27 }
 0x377   :  { %v5716_v39 = vrot.slane %v4180_v48, %v8844_v57 }
 0x378   :  { %v5075_v7 = vsel %vm4501_vm7, %v5074_v16, %v5070_v62 }
 0x379   :  { %v4174_v6 = vpop.xlane.xlu1 %4173  ;;  %v5080_v52 = vsel %vm4508_vm8, %v5079_v18, %v5075_v7 }
 0x37a   :  { %v3805_v60 = vpop.xlane.xlu0 %3804  ;;  %v5706_v8 = vrot.slane %v4174_v6, %v8814_v53  ;;  %v5085_v1 = vsel %vm4515_vm9, %v5084_v59, %v5080_v52  ;;  %v5702_v53 = vsel %vm4494_vm6, %v5701_v21, %v5697_v61  ;;  %vm10571_vm6 = vmmov %vm10567_vm3 }
 0x37b   :  { %v5099_v31 = vrot.slane %v3805_v60, %v8969_v36 }
 0x37c   :  { %v5707_v17 = vsel %vm4501_vm7, %v5706_v8, %v5702_v53 }
 0x37d   :  { %v3808_v3 = vpop.xlane.xlu1 %3807  ;;  %v5712_v37 = vsel %vm4508_vm8, %v5711_v26, %v5707_v17 }
 0x37e   :  { %v3799_v4 = vpop.xlane.xlu0 %3798  ;;  %v5104_v32 = vrot.slane %v3808_v3, %v8966_v46  ;;  %v5717_v62 = vsel %vm4515_vm9, %v5716_v39, %v5712_v37 }
 0x37f   :  { %v5089_v24 = vrot.slane %v3799_v4, %v8946_v41 }
 0x381   :  { %v3802_v22 = vpop.xlane.xlu1 %3801  ;;  %v5090_v23 = vsel %vm4522_vm10, %v5089_v24, %v5085_v1 }
 0x382   :  { %v5094_v40 = vrot.slane %v3802_v22, %v8936_v51  ;;  %v4189_v42 = vpop.xlane.xlu0 %4188 }
 0x383   :  { %v5731_v48 = vrot.slane %v4189_v42, %v8969_v36 }
 0x384   :  { %v5095_v56 = vsel %vm4529_vm11, %v5094_v40, %v5090_v23 }
 0x385   :  { %v5100_v20 = vsel %vm4536_vm12, %v5099_v31, %v5095_v56  ;;  %v4192_v29 = vpop.xlane.xlu1 %4191  ;;  %v10572_v31 = vld [vmem:[#allocation67_spill] sm:$0xff] }
 0x386   :  { %v5105_v49 = vsel %vm10567_vm3, %v5104_v32, %v5100_v20  ;;  %v4183_v9 = vpop.xlane.xlu0 %4182  ;;  %v5736_v52 = vrot.slane %v4192_v29, %v8966_v46 }
 0x387   :  { %v5110_v54 = vsel %vm4550_vm14, %v5109_v13, %v5105_v49  ;;  %v5721_v16 = vrot.slane %v4183_v9, %v8946_v41 }
 0x388   :  { %v5115_v11 = vsel %vm4557_vm15, %v5114_v10, %v5110_v54 }
 0x389   :  { %v5120_v47 = vsel %vm4564_vm0, %v5119_v33, %v5115_v11  ;;  %v4153_v6 = vpop.xlane.xlu1 %4152  ;;  %v5722_v43 = vsel %vm4522_vm10, %v5721_v16, %v5717_v62 }
 0x38a   :  { %v4186_v50 = vpop.xlane.xlu0 %4185  ;;  %v5125_v38 = vsel %vm4571_vm2, %v5124_v2, %v5120_v47  ;;  %v5672_v7 = vrot.slane %v4153_v6, %v9114_v25 }
 0x38b   :  { %v5726_v15 = vrot.slane %v4186_v50, %v8936_v51  ;;  %v5771_v60 = vsel %vm5770_vm4, %v5125_v38, %v10154_v30 }
 0x38c   :  { %v5673_v51 = vsel %vm4564_vm0, %v5672_v7, %v10144_v5 }
 0x38d   :  { %v4156_v18 = vpop.xlane.xlu1 %4155  ;;  %v5727_v41 = vsel %vm4529_vm11, %v5726_v15, %v5722_v43 }
 0x38e   :  { %v5677_v3 = vrot.slane %v4156_v18, %v9108_v27  ;;  %v4108_v57 = vpop.xlane.xlu0 %4107  ;;  %v5732_v30 = vsel %vm4536_vm12, %v5731_v48, %v5727_v41 }
 0x38f   :  { %v5598_v34 = vrot.slane %v4108_v57, %v9108_v27  ;;  %v5737_v5 = vsel %vm10571_vm6, %v5736_v52, %v5732_v30 }
 0x390   :  { %v5678_v24 = vsel %vm4571_vm2, %v5677_v3, %v5673_v51 }
 0x391   :  { %v5599_v4 = vsel %vm4571_vm2, %v5598_v34, %v10090_v63  ;;  %v4195_v44 = vpop.xlane.xlu1 %4194 }
 0x392   :  { %v5776_v59 = vsel %vm10570_vm5, %v5599_v4, %v9973_v28  ;;  %v5741_v36 = vrot.slane %v4195_v44, %v9087_v58  ;;  %v4198_v19 = vpop.xlane.xlu0 %4197 }
 0x393   :  { %v5777_v21 = vsel %vm5768_vm1, %v5678_v24, %v5776_v59  ;;  %v5746_v22 = vrot.slane %v4198_v19, %v9095_v0 }
 0x394   :  { %v5742_v12 = vsel %vm4550_vm14, %v5741_v36, %v5737_v5 }
 0x395   :  { %v4204_v63 = vpop.xlane.xlu1 %4203  ;;  %v5747_v1 = vsel %vm4557_vm15, %v5746_v22, %v5742_v12 }
 0x396   :  { %v4201_v8 = vpop.xlane.xlu0 %4200  ;;  %v5756_v40 = vrot.slane %v4204_v63, %v9108_v27 }
 0x397   :  { %v5751_v46 = vrot.slane %v4201_v8, %v9114_v25 }
 0x399   :  { %v5752_v28 = vsel %vm4564_vm0, %v5751_v46, %v5747_v1  ;;  %v5798_v58 = vpop.permute.xlu1 %5797 }
 0x39a   :  { %v5757_v42 = vsel %vm4571_vm2, %v5756_v40, %v5752_v28  ;;  %vm5800_vm7 = vcmp.lt.s32.totalorder %v10572_v31, %v5798_v58 }
 0x39b   :  { %v5778_v23 = vsel %vm5770_vm4, %v5757_v42, %v5777_v21 }
 0x39c   :  { %v5802_v0 = vsel %vm5800_vm7, %v5778_v23, -1e+30 }
 0x39d   :  { %5805 = vmax.xlane.f32.xlu0 %v5802_v0  ;;  %v5795_v61 = vpop.permute.xlu0 %5794 }
 0x39e   :  { %vm5799_vm8 = vcmp.lt.s32.totalorder %v10572_v31, %v5795_v61 }
 0x39f   :  { %v5801_v32 = vsel %vm5799_vm8, %v5771_v60, -1e+30 }
 0x3a0   :  { %5803 = vmax.xlane.f32.xlu1 %v5801_v32 }
 0x42a   :  { %v5806_v25 = vpop.xlane.xlu0 %5805 }
 0x42b   :  { %v5808_v27 = vsub.f32 %v5802_v0, %v5806_v25 }
 0x42d   :  { %v5804_v56 = vpop.xlane.xlu1 %5803  ;;  %v5811_v53 = vmul.f32 1.442695, %v5808_v27 }
 0x42e   :  { %v5807_v14 = vsub.f32 %v5801_v32, %v5804_v56 }
 0x430   :  { %v5809_v13 = vmul.f32 1.442695, %v5807_v14 }
 0x432   :  { %7179 = vpow2.f32 %v5809_v13 }
 0x433   :  { %7181 = vpow2.f32 %v5811_v53 }
 0x43c   :  { %v7180_v20 = vpop.eup %7179 }
 0x43d   :  { %5813 = vadd.xlane.f32.xlu1 %v7180_v20  ;;  %v7182_v29 = vpop.eup %7181 }
 0x441   :  { %5815 = vadd.xlane.f32.xlu1 %v7182_v29 }
 0x4ca   :  { %v5814_v35 = vpop.xlane.xlu1 %5813 }
 0x4cb   :  { %7183 = vrcp.f32 %v5814_v35 }
 0x4ce   :  { %v5816_v10 = vpop.xlane.xlu1 %5815 }
 0x4cf   :  { %7185 = vrcp.f32 %v5816_v10 }
 0x4d5   :  { %v7184_v17 = vpop.eup %7183 }
 0x4d6   :  { %v5819_v49 = vmul.f32 %v7184_v17, %v7180_v20 }
 0x4d8   :  { %5821 = vst [vmem:[#allocation3] sm:$0xff] %v5819_v49 }
 0x4d9   :  { %v7186_v9 = vpop.eup %7185 }
 0x4da   :  { %v5820_v45 = vmul.f32 %v7186_v9, %v7182_v29 }
 0x4dc   :  { %5822 = vst [vmem:[#allocation3 + $0x8] sm:$0xff] %v5820_v45 }
 0x4dd   :  { %7202 = shalt.err (!%p7199_p4)
}
 0x4de   :  { %s7203_s23 = scalar_lea.hbm %s10257_s7, 256 }
 0x4df   :  { %p7204_p5 = scmp.ne.s32.totalorder %s10257_s7, %s7203_s23  ;;  %p7207_p6 = scmp.lt.u32.totalorder %s7203_s23, %s10257_s7 }
 0x4e1   :  { %p7209_p7 = pnand %p7207_p6, %p7204_p5 }
 0x4e3   :  { %7212 = shalt.err (!%p7209_p7)
}
 0x4e4   :  { %s7220_s28 = smov 128   ;;  %s7221_s29 = smov 8  }
 0x4e5   :  { %5834 = dma.vmem_to_hbm [thread:$0]  %s5829_s19, 256, %s10257_s7, [#allocation4], %s7220_s28, %s7220_s28, %s7221_s29  }
 0x4e6   :  { %7213 = dma.done.wait [#allocation4], 256  }
 0x4e7   :  { %7214 = vsyncadd [#allocation4], 4294967040 }
 0x4e8   :  { %5838 = vsyncpa [#allocation4], 1 }

</bundles_post_ra>
